<compile_context>
chip_gen: v7x
topology: tpu7x:2x2x1
jax: 0.10.0
libtpu: 0.0.40
codegen_flags: <defaults>
</compile_context>

<pallas_src>
import functools
import math

import jax
import jax.numpy as jnp
from jax.experimental import pallas as pl
from jax.experimental.pallas import tpu as pltpu


def _gcn_kernel(adj_ref, x_ref, h0_ref, wt_ref, out_ref, *, theta, x_resident):
    k = pl.program_id(1)
    tk = adj_ref.shape[1]

    @pl.when(k == 0)
    def _init():
        out_ref[...] = jnp.zeros_like(out_ref)

    if x_resident:
        # x is the whole [N, F] array resident in VMEM; slice this k-tile.
        start = pl.multiple_of(k * tk, tk)
        xk = x_ref[pl.ds(start, tk), :]
    else:
        xk = x_ref[...]

    # acc += adj_tile @ x_tile  (bf16 inputs, f32 MXU accumulation); the
    # (1 - alpha) scale is pre-folded into x.  Accumulates straight into the
    # VMEM-resident output tile (its block index is constant across k).
    adj_tile = adj_ref[...].astype(jnp.bfloat16)
    out_ref[...] += jnp.dot(adj_tile, xk, preferred_element_type=jnp.float32)

    @pl.when(k == pl.num_programs(1) - 1)
    def _epilogue():
        # support = (1 - alpha) * hi + alpha * h0   (f32; alpha folded in h0)
        support = out_ref[...] + h0_ref[...]
        # out = relu(theta * (support @ W.T) + (1 - theta) * support)
        # mm is a tiny matmul; (1-theta)*support stays in f32.
        mm = jnp.dot(support.astype(wt_ref.dtype), wt_ref[...],
                     preferred_element_type=jnp.float32)
        out_ref[...] = jnp.maximum(theta * mm + (1.0 - theta) * support,
                                   0.0).astype(out_ref.dtype)


def prepare_adj(adj):
    """One-time per-model cast of the (layer-invariant) adjacency to bf16.

    GCNII reuses the same adj for every layer; casting once amortizes the
    f32->bf16 HBM pass across all layers and halves the kernel's adj stream.
    """
    return adj.astype(jnp.bfloat16)


def _pick_tile(n, want, align):
    """Largest `align`-aligned divisor of n that is <= want (or n itself)."""
    if n <= want:
        return n
    t = (want // align) * align
    while t >= align:
        if n % t == 0:
            return t
        t -= align
    return n


def _default_dim_semantics():
    try:
        kind = jax.devices()[0].device_kind.lower()
    except Exception:
        kind = ""
    if "v7" in kind:
        # v7x has 2 TensorCores; plain "parallel" does not by itself split the
        # grid across them — CORE_PARALLEL does.  Row tiles are independent,
        # so whole-row-tile-per-core keeps the out_ref accumulation correct.
        return (pltpu.CORE_PARALLEL, pltpu.ARBITRARY)
    return ("parallel", "arbitrary")


def graph_convolution(x, adj, h0, weight, lamda, alpha, l, *, tm=512, tk=512):
    """Pallas forward for GraphConvolution (relu=True; dropout/residual/variant off).

    x, h0 : [N, F] float32
    adj   : [N, N] float32 or bfloat16 dense adjacency (pass prepare_adj(adj)
            once per model to avoid any per-call cast pass)
    weight: [F_out, F_in] float32 (nn.Linear weight layout, bias=False)
    """
    n, f_in = x.shape
    f_out, f_in_w = weight.shape
    assert f_in_w == f_in, "weight second dim must match feature dim"
    # theta*mm + (1-theta)*support needs a square weight in the non-variant path.
    assert f_in == f_out, "GraphConvolution default path requires F_in == F_out"
    assert h0.shape == (n, f_in) and adj.shape == (n, n)

    theta = math.log(lamda / l + 1.0)

    tm = _pick_tile(n, tm, 8)     # row tile (sublane-aligned divisor of N)
    tk = _pick_tile(n, tk, 128)   # contraction tile (lane-aligned divisor of N)
    grid = (n // tm, n // tk)

    # --- small per-call precompute: O(N*F) and O(F^2) only -------------------
    wt = weight.T.astype(jnp.bfloat16)               # [F_in, F_out], VMEM-resident
    x_s = ((1.0 - alpha) * x).astype(jnp.bfloat16)   # (1 - alpha) folded in
    h0_s = (alpha * h0).astype(jnp.float32)          # alpha folded in, f32 add

    # Keep x fully VMEM-resident when it fits comfortably; otherwise stream a
    # (tk, F) slab per contraction step (re-streamed once per row tile).
    x_resident = (n * f_in * 2) <= (8 << 20)
    if x_resident:
        x_spec = pl.BlockSpec((n, f_in), lambda i, k: (0, 0))
    else:
        x_spec = pl.BlockSpec((tk, f_in), lambda i, k: (k, 0))

    adj_bytes = n * n * adj.dtype.itemsize
    x_passes = 1 if x_resident else grid[0]
    cost = pl.CostEstimate(
        flops=2 * n * n * f_in + 2 * n * f_in * f_out,
        transcendentals=0,
        bytes_accessed=(adj_bytes                       # adj stream
                        + n * f_in * 2 * x_passes       # x (bf16)
                        + n * f_in * 4                  # h0 (f32)
                        + f_in * f_out * 2              # W.T (bf16)
                        + n * f_out * 4),               # out (f32)
    )

    kernel = functools.partial(_gcn_kernel, theta=theta, x_resident=x_resident)

    def _run(dim_sem):
        return pl.pallas_call(
            kernel,
            out_shape=jax.ShapeDtypeStruct((n, f_out), jnp.float32),
            grid_spec=pltpu.PrefetchScalarGridSpec(
                num_scalar_prefetch=0,
                grid=grid,
                in_specs=[
                    pl.BlockSpec((tm, tk), lambda i, k: (i, k)),       # adj tile
                    x_spec,                                            # x (resident/streamed)
                    pl.BlockSpec((tm, f_in), lambda i, k: (i, 0)),     # h0 row tile
                    pl.BlockSpec((f_in, f_out), lambda i, k: (0, 0)),  # W.T resident
                ],
                out_specs=pl.BlockSpec((tm, f_out), lambda i, k: (i, 0)),
            ),
            compiler_params=pltpu.CompilerParams(
                dimension_semantics=dim_sem,
                vmem_limit_bytes=48 << 20,
            ),
            cost_estimate=cost,
        )(adj, x_s, h0_s, wt)

    dim_sem = _default_dim_semantics()
    try:
        return _run(dim_sem)
    except Exception:
        if dim_sem == ("parallel", "arbitrary"):
            raise
        return _run(("parallel", "arbitrary"))


def _reference(x, adj, h0, weight, lamda, alpha, l):
    theta = math.log(lamda / l + 1.0)
    hi = adj @ x
    support = (1.0 - alpha) * hi + alpha * h0
    r = support
    mm_term = support @ weight.T
    out = theta * mm_term + (1.0 - theta) * r
    return jnp.maximum(out, 0.0)


if __name__ == "__main__":
    # N nodes x F features (F_in == F_out).  N=1024 with 512-tiles gives a
    # (2, 2) grid so both the parallel row axis and the reduction axis run.
    N, F = 1024, 128
    lamda, alpha, layer_idx = 0.5, 0.1, 1

    key = jax.random.PRNGKey(0)
    k_adj, k_x, k_h0, k_w = jax.random.split(key, 4)

    adj = jax.random.uniform(k_adj, (N, N), dtype=jnp.float32)
    # Row-normalize adj (typical GCN preprocessing; keeps values well-scaled).
    adj = adj / jnp.sum(adj, axis=1, keepdims=True)

    x = jax.random.normal(k_x, (N, F), dtype=jnp.float32)
    h0 = jax.random.normal(k_h0, (N, F), dtype=jnp.float32)

    # Deterministic Linear weight init (bias=False): uniform(-stdv, stdv).
    stdv = 1.0 / math.sqrt(F)
    weight = jax.random.uniform(k_w, (F, F), minval=-stdv, maxval=stdv,
                                dtype=jnp.float32)

    # One-time per-model cast (adj is layer-invariant in GCNII).
    adj_bf16 = jax.block_until_ready(prepare_adj(adj))

    out = graph_convolution(x, adj_bf16, h0, weight, lamda, alpha, layer_idx)
    out = jax.block_until_ready(out)

    ref = _reference(x, adj, h0, weight, lamda, alpha, layer_idx)
    assert out.shape == (N, F)
    # bf16 adj/x/W streams vs f32 reference -> relaxed tolerance.
    assert jnp.allclose(out, ref, atol=2e-2, rtol=2e-2), "mismatch vs reference"

    # TODO(synk): dropout (training-mode stochastic masking), the `variant`
    # concat path, and the `residual` add are not implemented; only the
    # nn.Module default inference config is exercised.
    print("KERNEL_OK")
</pallas_src>

<mosaic_0001>
module attributes {stable_mosaic.version = 11 : i64} {
  func.func @_gcn_kernel(%arg0: i32, %arg1: i32, %arg2: memref<512x512xbf16, #tpu.memory_space<vmem>>, %arg3: memref<1024x128xbf16, #tpu.memory_space<vmem>>, %arg4: memref<512x128xf32, #tpu.memory_space<vmem>>, %arg5: memref<128x128xbf16, #tpu.memory_space<vmem>>, %arg6: memref<512x128xf32, #tpu.memory_space<vmem>>) attributes {dimension_semantics = [#tpu.dimension_semantics<parallel>, #tpu.dimension_semantics<arbitrary>], iteration_bounds = array<i64: 2, 2>, scalar_prefetch = 0 : i64, scratch_operands = 0 : i64, tpu.core_type = #tpu.core_type<tc>, window_params = [{transform_indices = @transform_0, window_bounds = array<i64: 512, 512>}, {pipeline_mode = #tpu.pipeline_mode<synchronous>, transform_indices = @transform_1, window_bounds = array<i64: 1024, 128>}, {transform_indices = @transform_2, window_bounds = array<i64: 512, 128>}, {pipeline_mode = #tpu.pipeline_mode<synchronous>, transform_indices = @transform_3, window_bounds = array<i64: 128, 128>}, {transform_indices = @transform_4, window_bounds = array<i64: 512, 128>}]} {
    %c0_i32 = arith.constant 0 : i32
    %0 = arith.cmpi eq, %arg1, %c0_i32 : i32
    %1 = arith.extui %0 : i1 to i32
    %c0_i32_0 = arith.constant 0 : i32
    %2 = arith.cmpi ne, %1, %c0_i32_0 : i32
    scf.if %2 {
      %cst_8 = arith.constant 0.000000e+00 : f32
      %15 = vector.broadcast %cst_8 : f32 to vector<512x128xf32>
      %c0_9 = arith.constant 0 : index
      %c0_10 = arith.constant 0 : index
      %16 = vector.load %arg6[%c0_9, %c0_10] : memref<512x128xf32, #tpu.memory_space<vmem>>, vector<512x128xf32>
      tpu.vector_store %arg6[%c0_9, %c0_10], %15 {strides = array<i32>} : memref<512x128xf32, #tpu.memory_space<vmem>>, vector<512x128xf32>,
    } else {
    }
    %c512_i32 = arith.constant 512 : i32
    %3 = arith.muli %arg1, %c512_i32 : i32
    %4 = tpu.assume_multiple %3, 512 : i32
    %5 = arith.index_cast %4 : i32 to index
    %c0 = arith.constant 0 : index
    %6 = vector.load %arg3[%5, %c0] : memref<1024x128xbf16, #tpu.memory_space<vmem>>, vector<512x128xbf16>
    %c0_1 = arith.constant 0 : index
    %c0_2 = arith.constant 0 : index
    %7 = vector.load %arg2[%c0_1, %c0_2] : memref<512x512xbf16, #tpu.memory_space<vmem>>, vector<512x512xbf16>
    %c0_3 = arith.constant 0 : index
    %c0_4 = arith.constant 0 : index
    %8 = vector.load %arg6[%c0_3, %c0_4] : memref<512x128xf32, #tpu.memory_space<vmem>>, vector<512x128xf32>
    %cst = arith.constant dense<0.000000e+00> : vector<512x128xf32>
    %9 = tpu.matmul %7, %6, %cst {dimension_numbers = #tpu.dot_dimension_numbers<[1], [0], [0], [1], [0, 0, 1, 1], [], []>} : vector<512x512xbf16>, vector<512x128xbf16>, vector<512x128xf32> -> vector<512x128xf32>
    %10 = arith.addf %8, %9 : vector<512x128xf32>
    %c0_5 = arith.constant 0 : index
    %c0_6 = arith.constant 0 : index
    %11 = vector.load %arg6[%c0_5, %c0_6] : memref<512x128xf32, #tpu.memory_space<vmem>>, vector<512x128xf32>
    tpu.vector_store %arg6[%c0_5, %c0_6], %10 {strides = array<i32>} : memref<512x128xf32, #tpu.memory_space<vmem>>, vector<512x128xf32>,
    %c1_i32 = arith.constant 1 : i32
    %12 = arith.cmpi eq, %arg1, %c1_i32 : i32
    %13 = arith.extui %12 : i1 to i32
    %c0_i32_7 = arith.constant 0 : i32
    %14 = arith.cmpi ne, %13, %c0_i32_7 : i32
    scf.if %14 {
      %c0_8 = arith.constant 0 : index
      %c0_9 = arith.constant 0 : index
      %15 = vector.load %arg6[%c0_8, %c0_9] : memref<512x128xf32, #tpu.memory_space<vmem>>, vector<512x128xf32>
      %c0_10 = arith.constant 0 : index
      %c0_11 = arith.constant 0 : index
      %16 = vector.load %arg4[%c0_10, %c0_11] : memref<512x128xf32, #tpu.memory_space<vmem>>, vector<512x128xf32>
      %17 = arith.addf %15, %16 : vector<512x128xf32>
      %18 = arith.truncf %17 : vector<512x128xf32> to vector<512x128xbf16>
      %c0_12 = arith.constant 0 : index
      %c0_13 = arith.constant 0 : index
      %19 = vector.load %arg5[%c0_12, %c0_13] : memref<128x128xbf16, #tpu.memory_space<vmem>>, vector<128x128xbf16>
      %cst_14 = arith.constant dense<0.000000e+00> : vector<512x128xf32>
      %20 = tpu.matmul %18, %19, %cst_14 {dimension_numbers = #tpu.dot_dimension_numbers<[1], [0], [0], [1], [0, 0, 1, 1], [], []>} : vector<512x128xbf16>, vector<128x128xbf16>, vector<512x128xf32> -> vector<512x128xf32>
      %cst_15 = arith.constant 0.405465096 : f32
      %21 = vector.broadcast %cst_15 : f32 to vector<512x128xf32>
      %22 = arith.mulf %21, %20 : vector<512x128xf32>
      %cst_16 = arith.constant 0.594534874 : f32
      %23 = vector.broadcast %cst_16 : f32 to vector<512x128xf32>
      %24 = arith.mulf %23, %17 : vector<512x128xf32>
      %25 = arith.addf %22, %24 : vector<512x128xf32>
      %cst_17 = arith.constant 0.000000e+00 : f32
      %26 = vector.broadcast %cst_17 : f32 to vector<512x128xf32>
      %27 = arith.maximumf %25, %26 : vector<512x128xf32>
      %c0_18 = arith.constant 0 : index
      %c0_19 = arith.constant 0 : index
      %28 = vector.load %arg6[%c0_18, %c0_19] : memref<512x128xf32, #tpu.memory_space<vmem>>, vector<512x128xf32>
      tpu.vector_store %arg6[%c0_18, %c0_19], %27 {strides = array<i32>} : memref<512x128xf32, #tpu.memory_space<vmem>>, vector<512x128xf32>,
    } else {
    }
    return
  }
  func.func @transform_0(%arg0: i32, %arg1: i32) -> (i32, i32) {
    %c0_i32 = arith.constant 0 : i32
    return %arg0, %arg1 : i32, i32
  }
  func.func @transform_1(%arg0: i32, %arg1: i32) -> (i32, i32) {
    %c0_i32 = arith.constant 0 : i32
    %c0_i32_0 = arith.constant 0 : i32
    %c0_i32_1 = arith.constant 0 : i32
    return %c0_i32, %c0_i32_0 : i32, i32
  }
  func.func @transform_2(%arg0: i32, %arg1: i32) -> (i32, i32) {
    %c0_i32 = arith.constant 0 : i32
    %c0_i32_0 = arith.constant 0 : i32
    return %arg0, %c0_i32 : i32, i32
  }
  func.func @transform_3(%arg0: i32, %arg1: i32) -> (i32, i32) {
    %c0_i32 = arith.constant 0 : i32
    %c0_i32_0 = arith.constant 0 : i32
    %c0_i32_1 = arith.constant 0 : i32
    return %c0_i32, %c0_i32_0 : i32, i32
  }
  func.func @transform_4(%arg0: i32, %arg1: i32) -> (i32, i32) {
    %c0_i32 = arith.constant 0 : i32
    %c0_i32_0 = arith.constant 0 : i32
    return %arg0, %c0_i32 : i32, i32
  }
}

</mosaic_0001>

<bundles_post_ra>
// kernel: tpu_custom_call.1
= control target key start
LH: loop header
LB: loop body
LE: loop exit
PB: predicated region body
PF: predicated region fallthrough
CT: control target
= control target key end

     0   :  { %s5654_s0 = inlined_call_operand.hbm [shape: bf16[1024,1024], index: 0, kind: input, shape index: {}]   ;;  %s5655_s1 = inlined_call_operand.hbm [shape: bf16[1024,128], index: 1, kind: input, shape index: {}]   ;;  %s5656_s2 = inlined_call_operand.hbm [shape: f32[1024,128], index: 2, kind: input, shape index: {}]   ;;  %s5657_s3 = inlined_call_operand.hbm [shape: bf16[128,128], index: 3, kind: input, shape index: {}]   ;;  %s5658_s4 = inlined_call_operand.hbm [shape: f32[1024,128], index: 4, kind: output, shape index: {}]  }
   0x1   :  { %5699 = sst [smem:[#allocation45_spill]] %s5654_s0 }
   0x2   :  { %5700 = sst [smem:[#allocation46_spill]] %s5655_s1 }
   0x3   :  { %5701 = sst [smem:[#allocation47_spill]] %s5658_s4 }
   0x4   :  { %9 = vsyncpa [#allocation3], 0 }
   0x5   :  { %11 = vsyncpa [#allocation3 + $0x1], 0 }
   0x6   :  { %12 = vsyncpa [#allocation6], 0 }
   0x7   :  { %13 = vsyncpa [#allocation4], 0 }
   0x8   :  { %15 = vsyncpa [#allocation4 + $0x1], 0  ;;  %s4214_s15 = smov 0   ;;  %s4216_s16 = smov 0  }
   0x9   :  { %s4218_s17 = smov 0   ;;  %s4220_s18 = smov 0  }
   0xa   :  { %s4222_s19 = smov 0   ;;  %s4224_s20 = smov 0  }
   0xb   :  { %s4226_s21 = smov 0   ;;  %s4228_s22 = smov 0  }
   0xc   :  { %s4230_s23 = smov 0   ;;  %s4232_s24 = smov 0  }
   0xd   :  { %s4234_s25 = smov 0  }
   0xe LB: > { %5702 = sst [smem:[#allocation15_spill]] %s4131_s15  ;;  %s4268_s26 = sadd.s32 4294967295, %s4171_s25   ;;  %s4171_s25 = sphi %s4234_s25, %s21_s25   ;;  %s4167_s24 = sphi %s4232_s24, %s5810_s24   ;;  %s4163_s23 = sphi %s4230_s23, %s5809_s23   ;;  %s4159_s22 = sphi %s4228_s22, %s5808_s22   ;;  %s4155_s21 = sphi %s4226_s21, %s5807_s21   ;;  %s4151_s20 = sphi %s4224_s20, %s5806_s20   ;;  %s4147_s19 = sphi %s4222_s19, %s5805_s19   ;;  %s4143_s18 = sphi %s4220_s18, %s5804_s18   ;;  %s4139_s17 = sphi %s4218_s17, %s5803_s17   ;;  %s4135_s16 = sphi %s4216_s16, %s5802_s16   ;;  %s4131_s15 = sphi %s4214_s15, %s5801_s15  }
   0xf   : > { %5703 = sst [smem:[#allocation16_spill]] %s4155_s21  ;;  %s3215_s27 = sadd.s32 4294967294, %s4171_s25  }
  0x10   : > { %5704 = sst [smem:[#allocation17_spill]] %s4159_s22  ;;  %p55_p0 = scmp.ne.s32.totalorder %s4147_s19, %s4143_s18 }
  0x11   : > { %p5659_p1 = scmp.eq.s32.totalorder %s4268_s26, 0  ;;  %p102_p2 = scmp.ne.s32.totalorder %s4135_s16, %s4131_s15 }
  0x12   : > { %p153_p5 = scmp.eq.s32.totalorder %s3215_s27, 3  ;;  %p3216_p7 = scmp.ge.s32.totalorder %s4171_s25, 1 }
  0x13   : > { %p4278_p4 = por %p5659_p1, %p55_p0  ;;  %p4284_p6 = por %p102_p2, %p5659_p1 }
  0x14   : > { %p4289_p8 = por %p153_p5, %p102_p2  ;;  %p160_p9 = scmp.lt.s32.totalorder %s4171_s25, 5 }
  0x15   : > { %s5705_s28 = scalar_select %p4278_p4, 1, 0 }
  0x16   : > { %s5707_s29 = scalar_select %p4284_p6, 1, 0 }
  0x17   : > { %5706 = sst [smem:[#allocation18_spill]] %s5705_s28  ;;  %p4294_p10 = pnand %p3216_p7, %p160_p9 }
  0x18   : > { %5708 = sst [smem:[#allocation19_spill]] %s5707_s29  ;;  %s4173_s6 = smov [#allocation5]  }
  0x19   : > { %s5709_s30 = scalar_select %p4289_p8, 1, 0 }
  0x1a   : > { %s5711_s5 = scalar_select %p4294_p10, 1, 0 }
  0x1b   : > { %5710 = sst [smem:[#allocation20_spill]] %s5709_s30  ;;  %s172_s7 = sshll.u32 %s4173_s6, 4  ;;  %s173_s7 = int_to_ptr.vmem [resolvable:$true] %s172_s7 }
  0x1c   : > { %p3564_p11 = pneg %p4294_p10  ;;  %s5713_s1 = sld [smem:[#allocation46_spill]] }
  0x1e   : > { %p4302_p12 = pnand %p3564_p11, %p5659_p1 }
  0x20   : > { %p5677_p0 = pneg %p4302_p12 }
  0x22   : > { %s3921_s11 = scalar_lea.hbm %s5713_s1, 8192 }
  0x23   : > { %p3922_p13 = scmp.ne.s32.totalorder %s5713_s1, %s3921_s11  ;;  %p3928_p7 = scmp.lt.u32.totalorder %s3921_s11, %s5713_s1 }
  0x25   : > { %p3924_p2 = pnand %p5677_p0, %p3922_p13 }
  0x27   : > { %p3925_p5 = pneg %p3924_p2 }
  0x29   : > { %p3930_p9 = pnand %p3928_p7, %p3925_p5 }
  0x2b   : > { %3933 = shalt.err (!%p3930_p9)
}
  0x2c   : > { %s3934_s27 = scalar_lea.vmem %s173_s7, 8192  ;;  %p3942_p8 = scmp.lt.s32.totalorder %s173_s7, %s173_s7 }
  0x2d   : > { %p3935_p11 = scmp.ne.s32.totalorder %s173_s7, %s3934_s27  ;;  %p3943_p6 = scmp.lt.s32.totalorder %s3934_s27, %s3934_s27 }
  0x2f   : > { %p3937_p1 = pnand %p3935_p11, %p5677_p0  ;;  %p3944_p4 = por %p3943_p6, %p3942_p8 }
  0x31   : > { %p3938_p3 = pneg %p3937_p1 }
  0x33   : > { %p3945_p10 = pnand %p3944_p4, %p3938_p3 }
  0x35   : > { %3948 = shalt.err (!%p3945_p10)
}
  0x36   : > { %s5663_s6 = smov 64   ;;  %s5664_s9 = smov 4  }
  0x37   : > { %3567 = dma.hbm_to_vmem [thread:$0]  (!%p4302_p12), %s5713_s1, 8192, %s173_s7, [#allocation6], %s5663_s6, %s5663_s6, %s5664_s9  }
  0x38   : > { %s30_s12 = sadd.s32 1, %s4163_s23  ;;  %s33_s13 = sadd.s32 1, %s4167_s24 }
  0x39   : > { %p31_p1 = scmp.ge.s32.totalorder %s30_s12, 2  ;;  %s42_s14 = sadd.s32 1, %s4151_s20 }
  0x3a   : > { %p49_p3 = scmp.ne.s32.totalorder %s4151_s20, %s4147_s19  ;;  %p5676_p4 = scmp.eq.s32.totalorder %s4171_s25, 0 }
  0x3b   : > { %s5812_s12 = smov (%p31_p1, %s30_s12), 0  ;;  %s5814_s13 = smov (!%p31_p1, %s33_s13), %s4167_s24 }
  0x3c   : > { %5714 = sst [smem:[#allocation21_spill]] %s5812_s12  ;;  %s38_s18 = ssub.s32 %s4163_s23, %s5812_s12 }
  0x3d   : > { %p35_p6 = scmp.ge.s32.totalorder %s5814_s13, 2  ;;  %p5675_p8 = scmp.lt.s32.totalorder %s4171_s25, 4 }
  0x3e   : > { %p4345_p10 = por %p5676_p4, %p49_p3  ;;  %s199_s27 = sand.u32 1, %s4171_s25  }
  0x3f   : > { %s5816_s13 = smov (%p35_p6, %s5814_s13), 0  ;;  %s201_s10 = sand.u32 1, %s4151_s20  }
  0x40   : > { %5716 = sst [smem:[#allocation22_spill]] %s5816_s13  ;;  %s4355_s11 = ssub.s32 %s4167_s24, %s5816_s13 }
  0x41   : > { %s3220_s6 = sshll.u32 %s201_s10, 10  ;;  %s39_s9 = sor.u32 %s38_s18, %s4355_s11 }
  0x42   : > { %p40_p2 = scmp.eq.s32.totalorder %s39_s9, 0  ;;  %s3222_s1 = sshll.u32 %s4163_s23, 2 }
  0x43   : > { %s3411_s12 = sshll.u32 %s4167_s24, 9  ;;  %s203_s4 = scalar_lea.vmem [#allocation2], %s3220_s6 }
  0x44   : > { %s4362_s30 = scalar_select %p40_p2, %s4151_s20, %s42_s14  }
  0x45   : > { %s210_s15 = sadd.s32 %s3411_s12, %s3222_s1  ;;  %s213_s22 = sshll.u32 %s203_s4, 4  ;;  %s4364_s22 = int_to_ptr.vmem [resolvable:$true] %s213_s22 }
  0x46   : > { %s3224_s21 = sshll.u32 %s210_s15, 6  ;;  %s5717_s0 = sld [smem:[#allocation45_spill]] }
  0x47   : > { %p4375_p5 = pnand %p5675_p8, %p4345_p10  ;;  %s4379_s1 = scalar_lea.sflag [#allocation3], %s199_s27 }
  0x49   : > { %p3951_p9 = pneg %p4375_p5 }
  0x4c   : > { %s4369_s13 = scalar_lea.hbm %s5717_s0, %s3224_s21  ;;  %s3954_s28 = scalar_lea.hbm %s5717_s0, 65536 }
  0x4d   : > { %s3949_s4 = scalar_lea.hbm %s4369_s13, 16384  ;;  %p3955_p3 = scmp.lt.u32.totalorder %s4369_s13, %s5717_s0 }
  0x4e   : > { %p3950_p7 = scmp.ne.s32.totalorder %s4369_s13, %s3949_s4  ;;  %p3956_p6 = scmp.lt.u32.totalorder %s3954_s28, %s3949_s4 }
  0x4f   : > { %p3958_p2 = scmp.lt.u32.totalorder %s3949_s4, %s4369_s13 }
  0x50   : > { %p3952_p11 = pnand %p3951_p9, %p3950_p7  ;;  %p3957_p10 = por %p3956_p6, %p3955_p3 }
  0x52   : > { %p3953_p1 = pneg %p3952_p11  ;;  %p3959_p8 = por %p3958_p2, %p3957_p10 }
  0x54   : > { %p3960_p4 = pnand %p3959_p8, %p3953_p1 }
  0x56   : > { %3963 = shalt.err (!%p3960_p4)
}
  0x57   : > { %s3964_s12 = scalar_lea.vmem %s4364_s22, 16384  ;;  %s4176_s14 = smov [#allocation2]  }
  0x58   : > { %p3965_p7 = scmp.ne.s32.totalorder %s4364_s22, %s3964_s12  ;;  %s3969_s18 = sshll.u32 %s4176_s14, 4  ;;  %s3970_s18 = int_to_ptr.vmem [resolvable:$false] %s3969_s18 }
  0x59   : > { %s3971_s7 = scalar_lea.vmem %s3970_s18, 32768  ;;  %p3972_p0 = scmp.lt.s32.totalorder %s4364_s22, %s3970_s18 }
  0x5a   : > { %p3967_p11 = pnand %p3965_p7, %p3951_p9  ;;  %p3973_p3 = scmp.lt.s32.totalorder %s3971_s7, %s3964_s12 }
  0x5c   : > { %p3968_p13 = pneg %p3967_p11  ;;  %p3974_p6 = por %p3973_p3, %p3972_p0 }
  0x5e   : > { %p3975_p10 = pnand %p3974_p6, %p3968_p13 }
  0x60   : > { %3978 = shalt.err (!%p3975_p10)
}
  0x61   : > { %s4177_s27 = smov 512   ;;  %s4178_s10 = smov 256  }
  0x62   : > { %s4179_s4 = smov 16   ;;  %s4180_s15 = smov [#allocation8]  }
  0x63   : > { %3574 = dma.hbm_to_vmem [thread:$0]  (!%p4375_p5), %s4369_s13, 16384, %s4364_s22, %s4379_s1, %s4177_s27, %s4178_s10, %s4179_s4  }
  0x64   : > { %s185_s21 = sshll.u32 %s4180_s15, 4  ;;  %s89_s28 = sadd.s32 1, %s4139_s17  ;;  %s186_s21 = int_to_ptr.vmem [resolvable:$true] %s185_s21 }
  0x65   : > { %s3979_s12 = scalar_lea.hbm %s5657_s3, 1024  ;;  %p5719_p4 = pneg %p4302_p12 }
  0x66   : > { %p3980_p0 = scmp.ne.s32.totalorder %s5657_s3, %s3979_s12  ;;  %p3986_p5 = scmp.lt.u32.totalorder %s3979_s12, %s5657_s3 }
  0x68   : > { %p3982_p8 = pnand %p3980_p0, %p5719_p4 }
  0x6a   : > { %p3983_p13 = pneg %p3982_p8 }
  0x6c   : > { %p3988_p9 = pnand %p3986_p5, %p3983_p13 }
  0x6e   : > { %3991 = shalt.err (!%p3988_p9)
}
  0x6f   : > { %s3992_s22 = scalar_lea.vmem %s186_s21, 1024  ;;  %p5720_p2 = pmov %p5719_p4 }
  0x70   : > { %p3993_p1 = scmp.ne.s32.totalorder %s186_s21, %s3992_s22  ;;  %p4000_p3 = scmp.lt.s32.totalorder %s186_s21, %s186_s21 }
  0x71   : > { %p4001_p6 = scmp.lt.s32.totalorder %s3992_s22, %s3992_s22 }
  0x72   : > { %p3995_p7 = pnand %p3993_p1, %p5720_p2 }
  0x73   : > { %p4002_p10 = por %p4001_p6, %p4000_p3 }
  0x74   : > { %p3996_p11 = pneg %p3995_p7 }
  0x76   : > { %p4003_p0 = pnand %p4002_p10, %p3996_p11 }
  0x78   : > { %4006 = shalt.err (!%p4003_p0)
}
  0x79   : > { %s5721_s13 = smov 4   ;;  %s5722_s9 = smov 64  }
  0x7a   : > { %3570 = dma.hbm_to_vmem [thread:$0]  (!%p4302_p12), %s5657_s3, 1024, %s186_s21, [#allocation6], %s5722_s9, %s5722_s9, %s5721_s13  }
  0x7b   : > { %p5723_p4 = scmp.eq.s32.totalorder %s4355_s11, 0  ;;  %p96_p8 = scmp.ne.s32.totalorder %s4139_s17, %s4135_s16 }
  0x7c   : > { %s225_s8 = sand.u32 1, %s4139_s17   ;;  %s3412_s15 = sshll.u32 %s4167_s24, 13 }
  0x7d   : > { %s4434_s10 = scalar_select %p5723_p4, %s4139_s17, %s89_s28  }
  0x7e   : > { %s3225_s4 = sshll.u32 %s225_s8, 9  ;;  %p5724_p13 = scmp.eq.s32.totalorder %s4171_s25, 0 }
  0x7f   : > { %p5725_p9 = scmp.eq.s32.totalorder %s4268_s26, 3  ;;  %s4451_s14 = scalar_lea.hbm %s5656_s2, %s3412_s15 }
  0x80   : > { %p98_p5 = por %p96_p8, %p5724_p13  ;;  %s227_s11 = scalar_lea.vmem [#allocation7], %s3225_s4 }
  0x81   : > { %p4444_p1 = por %p5725_p9, %p96_p8  ;;  %s234_s21 = sshll.u32 %s227_s11, 4  ;;  %s4459_s21 = int_to_ptr.vmem [resolvable:$true] %s234_s21 }
  0x82   : > { %p5727_p12 = scmp.lt.s32.totalorder %s4171_s25, 4  ;;  %s4007_s18 = scalar_lea.hbm %s4451_s14, 8192 }
  0x83   : > { %p4008_p7 = scmp.ne.s32.totalorder %s4451_s14, %s4007_s18  ;;  %s4012_s13 = scalar_lea.hbm %s5656_s2, 16384 }
  0x84   : > { %p4455_p2 = pnand %p5727_p12, %p98_p5  ;;  %p4013_p10 = scmp.lt.u32.totalorder %s4451_s14, %s5656_s2 }
  0x85   : > { %p4014_p0 = scmp.lt.u32.totalorder %s4012_s13, %s4007_s18  ;;  %p4016_p8 = scmp.lt.u32.totalorder %s4007_s18, %s4451_s14 }
  0x86   : > { %p4009_p11 = pneg %p4455_p2 }
  0x87   : > { %p4015_p4 = por %p4014_p0, %p4013_p10 }
  0x88   : > { %p4010_p3 = pnand %p4009_p11, %p4008_p7 }
  0x89   : > { %p4017_p13 = por %p4016_p8, %p4015_p4 }
  0x8a   : > { %p4011_p6 = pneg %p4010_p3 }
  0x8c   : > { %p4018_p5 = pnand %p4017_p13, %p4011_p6 }
  0x8e   : > { %4021 = shalt.err (!%p4018_p5)
}
  0x8f   : > { %s4022_s27 = scalar_lea.vmem %s4459_s21, 8192  ;;  %s4181_s8 = smov [#allocation7]  }
  0x90   : > { %p4023_p9 = scmp.ne.s32.totalorder %s4459_s21, %s4022_s27  ;;  %s4027_s4 = sshll.u32 %s4181_s8, 4  ;;  %s4028_s4 = int_to_ptr.vmem [resolvable:$false] %s4027_s4 }
  0x91   : > { %s4029_s15 = scalar_lea.vmem %s4028_s4, 16384  ;;  %p4030_p3 = scmp.lt.s32.totalorder %s4459_s21, %s4028_s4 }
  0x92   : > { %p4025_p12 = pnand %p4023_p9, %p4009_p11  ;;  %p4031_p10 = scmp.lt.s32.totalorder %s4029_s15, %s4022_s27 }
  0x94   : > { %p4026_p7 = pneg %p4025_p12  ;;  %p4032_p0 = por %p4031_p10, %p4030_p3 }
  0x96   : > { %p4033_p4 = pnand %p4032_p0, %p4026_p7 }
  0x98   : > { %4036 = shalt.err (!%p4033_p4)
}
  0x99   : > { %s4182_s6 = smov 128   ;;  %s4183_s12 = smov 8  }
  0x9a   : > { %3577 = dma.hbm_to_vmem [thread:$0]  (!%p4455_p2), %s4451_s14, 8192, %s4459_s21, %s4379_s1, %s4182_s6, %s4182_s6, %s4183_s12  }
  0x9b   : > { %p5729_p11 = scmp.ne.s32.totalorder %s5711_s5, 0 }
  0x9c   : > { %s5730_s11 = sld [smem:[#allocation18_spill]] (!%p5729_p11)  ;;  %s248_s18 = sand.u32 (!%p5729_p11), 1, %s4268_s26  }
  0x9d   : > { %246 = sbr.rel (%p5729_p11) target bundleno = 1104 (0x450), region = 36  ;;  %s250_s7 = sand.u32 (!%p5729_p11), 1, %s4147_s19  }
  0x9e   : > { %s3229_s22 = sshll.u32 (!%p5729_p11), %s250_s7, 10  ;;  %s249_s13 = scalar_lea.sflag (!%p5729_p11), [#allocation3], %s248_s18 }
  0x9f   : > { %s4491_s9 = scalar_lea.vmem (!%p5729_p11), [#allocation2], %s3229_s22 }
  0xa2   : > { %p5731_p6 = scmp.ne.s32.totalorder (!%p5729_p11), %s5730_s11, 0 }
  0xa4   : > { %4110 = dma.done.wait (%p5731_p6), %s249_s13, 16384  }
  0xa5   : > { %4112 = vsyncadd (%p5731_p6), %s249_s13, 4294950912  ;;  %p5732_p8 = scmp.eq.s32.totalorder %s4268_s26, 0 }
  0xa7   : > { %4114 = dma.done.wait (%p5732_p8), [#allocation6], 8192   ;;  %p5733_p2 = pmov %p5732_p8 }
  0xa8   : > { %s5734_s5 = sld [smem:[#allocation19_spill]]  ;;  %s263_s1 = sand.u32 1, %s4135_s16  }
  0xa9   : > { %4116 = vsyncadd (%p5733_p2), [#allocation6], 4294959104  ;;  %s3231_s14 = sshll.u32 %s263_s1, 9 }
  0xaa   : > { %s4504_s21 = scalar_lea.vmem [#allocation7], %s3231_s14 }
  0xae   : > { %p5735_p13 = scmp.ne.s32.totalorder %s5734_s5, 0 }
  0xb0   : > { %4118 = dma.done.wait (%p5735_p13), %s249_s13, 8192  }
  0xb1   : > { %4120 = vsyncadd (%p5735_p13), %s249_s13, 4294959104  ;;  %p5736_p5 = pmov %p5733_p2 }
  0xb2   : > { %p5737_p9 = pmov %p5733_p2 }
  0xb3   : > { %4122 = dma.done.wait (%p5736_p5), [#allocation6], 1024  }
  0xb4   : > { %4124 = vsyncadd (%p5737_p9), [#allocation6], 4294966272  ;;  %s4514_s28 = scalar_lea.vmem [#allocation9], %s3231_s14  ;;  %s5738_s0 = sld [smem:[#allocation16_spill]] }
  0xba   : > { %p3234_p12 = scmp.ne.s32.totalorder %s5738_s0, 0 }
  0xbb   : > { %v4184_v0 = vmov (!%p3234_p12), 0.0  }
  0xbc   : > { %307 = sbr.rel (%p3234_p12) target bundleno = 220 (0xdc), region = 56  ;;  %308 = vst [vmem:[%s4514_s28] sm:$0xff] (!%p3234_p12), %v4184_v0  ;;  %309 = vst [vmem:[%s4514_s28 + $0x8] sm:$0xff] (!%p3234_p12), %v4184_v0 }
  0xbd   : > { %310 = vst [vmem:[%s4514_s28 + $0x10] sm:$0xff] (!%p3234_p12), %v4184_v0  ;;  %311 = vst [vmem:[%s4514_s28 + $0x18] sm:$0xff] (!%p3234_p12), %v4184_v0 }
  0xbe   : > { %312 = vst [vmem:[%s4514_s28 + $0x20] sm:$0xff] (!%p3234_p12), %v4184_v0  ;;  %313 = vst [vmem:[%s4514_s28 + $0x28] sm:$0xff] (!%p3234_p12), %v4184_v0 }
  0xbf   : > { %314 = vst [vmem:[%s4514_s28 + $0x30] sm:$0xff] (!%p3234_p12), %v4184_v0  ;;  %315 = vst [vmem:[%s4514_s28 + $0x38] sm:$0xff] (!%p3234_p12), %v4184_v0 }
  0xc0   : > { %316 = vst [vmem:[%s4514_s28 + $0x40] sm:$0xff] (!%p3234_p12), %v4184_v0  ;;  %317 = vst [vmem:[%s4514_s28 + $0x48] sm:$0xff] (!%p3234_p12), %v4184_v0 }
  0xc1   : > { %318 = vst [vmem:[%s4514_s28 + $0x50] sm:$0xff] (!%p3234_p12), %v4184_v0  ;;  %319 = vst [vmem:[%s4514_s28 + $0x58] sm:$0xff] (!%p3234_p12), %v4184_v0 }
  0xc2   : > { %320 = vst [vmem:[%s4514_s28 + $0x60] sm:$0xff] (!%p3234_p12), %v4184_v0  ;;  %321 = vst [vmem:[%s4514_s28 + $0x68] sm:$0xff] (!%p3234_p12), %v4184_v0 }
  0xc3   : > { %322 = vst [vmem:[%s4514_s28 + $0x70] sm:$0xff] %v4184_v0  ;;  %323 = vst [vmem:[%s4514_s28 + $0x78] sm:$0xff] %v4184_v0 }
  0xc4   : > { %324 = vst [vmem:[%s4514_s28 + $0x80] sm:$0xff] %v4184_v0  ;;  %325 = vst [vmem:[%s4514_s28 + $0x88] sm:$0xff] %v4184_v0 }
  0xc5   : > { %326 = vst [vmem:[%s4514_s28 + $0x90] sm:$0xff] %v4184_v0  ;;  %327 = vst [vmem:[%s4514_s28 + $0x98] sm:$0xff] %v4184_v0 }
  0xc6   : > { %328 = vst [vmem:[%s4514_s28 + $0xa0] sm:$0xff] %v4184_v0  ;;  %329 = vst [vmem:[%s4514_s28 + $0xa8] sm:$0xff] %v4184_v0 }
  0xc7   : > { %330 = vst [vmem:[%s4514_s28 + $0xb0] sm:$0xff] %v4184_v0  ;;  %331 = vst [vmem:[%s4514_s28 + $0xb8] sm:$0xff] %v4184_v0 }
  0xc8   : > { %332 = vst [vmem:[%s4514_s28 + $0xc0] sm:$0xff] %v4184_v0  ;;  %333 = vst [vmem:[%s4514_s28 + $0xc8] sm:$0xff] %v4184_v0 }
  0xc9   : > { %334 = vst [vmem:[%s4514_s28 + $0xd0] sm:$0xff] %v4184_v0  ;;  %335 = vst [vmem:[%s4514_s28 + $0xd8] sm:$0xff] %v4184_v0 }
  0xca   : > { %336 = vst [vmem:[%s4514_s28 + $0xe0] sm:$0xff] %v4184_v0  ;;  %337 = vst [vmem:[%s4514_s28 + $0xe8] sm:$0xff] %v4184_v0 }
  0xcb   : > { %338 = vst [vmem:[%s4514_s28 + $0xf0] sm:$0xff] %v4184_v0  ;;  %339 = vst [vmem:[%s4514_s28 + $0xf8] sm:$0xff] %v4184_v0 }
  0xcc   : > { %340 = vst [vmem:[%s4514_s28 + $0x100] sm:$0xff] %v4184_v0  ;;  %341 = vst [vmem:[%s4514_s28 + $0x108] sm:$0xff] %v4184_v0 }
  0xcd   : > { %342 = vst [vmem:[%s4514_s28 + $0x110] sm:$0xff] %v4184_v0  ;;  %343 = vst [vmem:[%s4514_s28 + $0x118] sm:$0xff] %v4184_v0 }
  0xce   : > { %344 = vst [vmem:[%s4514_s28 + $0x120] sm:$0xff] %v4184_v0  ;;  %345 = vst [vmem:[%s4514_s28 + $0x128] sm:$0xff] %v4184_v0 }
  0xcf   : > { %346 = vst [vmem:[%s4514_s28 + $0x130] sm:$0xff] %v4184_v0  ;;  %347 = vst [vmem:[%s4514_s28 + $0x138] sm:$0xff] %v4184_v0 }
  0xd0   : > { %348 = vst [vmem:[%s4514_s28 + $0x140] sm:$0xff] %v4184_v0  ;;  %349 = vst [vmem:[%s4514_s28 + $0x148] sm:$0xff] %v4184_v0 }
  0xd1   : > { %350 = vst [vmem:[%s4514_s28 + $0x150] sm:$0xff] %v4184_v0  ;;  %351 = vst [vmem:[%s4514_s28 + $0x158] sm:$0xff] %v4184_v0 }
  0xd2   : > { %352 = vst [vmem:[%s4514_s28 + $0x160] sm:$0xff] %v4184_v0  ;;  %353 = vst [vmem:[%s4514_s28 + $0x168] sm:$0xff] %v4184_v0 }
  0xd3   : > { %354 = vst [vmem:[%s4514_s28 + $0x170] sm:$0xff] %v4184_v0  ;;  %355 = vst [vmem:[%s4514_s28 + $0x178] sm:$0xff] %v4184_v0 }
  0xd4   : > { %356 = vst [vmem:[%s4514_s28 + $0x180] sm:$0xff] %v4184_v0  ;;  %357 = vst [vmem:[%s4514_s28 + $0x188] sm:$0xff] %v4184_v0 }
  0xd5   : > { %358 = vst [vmem:[%s4514_s28 + $0x190] sm:$0xff] %v4184_v0  ;;  %359 = vst [vmem:[%s4514_s28 + $0x198] sm:$0xff] %v4184_v0 }
  0xd6   : > { %360 = vst [vmem:[%s4514_s28 + $0x1a0] sm:$0xff] %v4184_v0  ;;  %361 = vst [vmem:[%s4514_s28 + $0x1a8] sm:$0xff] %v4184_v0 }
  0xd7   : > { %362 = vst [vmem:[%s4514_s28 + $0x1b0] sm:$0xff] %v4184_v0  ;;  %363 = vst [vmem:[%s4514_s28 + $0x1b8] sm:$0xff] %v4184_v0 }
  0xd8   : > { %364 = vst [vmem:[%s4514_s28 + $0x1c0] sm:$0xff] %v4184_v0  ;;  %365 = vst [vmem:[%s4514_s28 + $0x1c8] sm:$0xff] %v4184_v0 }
  0xd9   : > { %366 = vst [vmem:[%s4514_s28 + $0x1d0] sm:$0xff] %v4184_v0  ;;  %367 = vst [vmem:[%s4514_s28 + $0x1d8] sm:$0xff] %v4184_v0 }
  0xda   : > { %368 = vst [vmem:[%s4514_s28 + $0x1e0] sm:$0xff] %v4184_v0  ;;  %369 = vst [vmem:[%s4514_s28 + $0x1e8] sm:$0xff] %v4184_v0 }
  0xdb   : > { %370 = vst [vmem:[%s4514_s28 + $0x1f0] sm:$0xff] %v4184_v0  ;;  %371 = vst [vmem:[%s4514_s28 + $0x1f8] sm:$0xff] %v4184_v0 }
  0xdc PF: > { %s5739_s26 = sld [smem:[#allocation16_spill]]  ;;  %v4185_v1 = vmov 0   ;;  %v3723_v2 = vld [vmem:[%s4491_s9 + $0x4] ss:$16 sps:$4 sm:$0xff]   ;;  %v3726_v3 = vld [vmem:[%s4491_s9 + $0xc] ss:$16 sps:$4 sm:$0xff]  }
  0xdd   : > { %1465 = vmatprep.subr.bf16.mxu0 %v4185_v1  ;;  %1754 = vmatprep.subr.bf16.mxu1 %v4185_v1  ;;  %v3721_v36 = vld [vmem:[%s4491_s9] ss:$16 sps:$4 sm:$0xff]   ;;  %v3724_v37 = vld [vmem:[%s4491_s9 + $0x8] ss:$16 sps:$4 sm:$0xff]   ;;  %v3727_v38 = vld [vmem:[%s4491_s9 + $0x24] ss:$16 sps:$4 sm:$0xff]  }
  0xde   : > { %1497 = vmatprep.mubr.bf16.mxu0 %v3723_v2  ;;  %1786 = vmatprep.mubr.bf16.mxu1 %v3726_v3  ;;  %v3729_v39 = vld [vmem:[%s4491_s9 + $0x2c] ss:$16 sps:$4 sm:$0xff]   ;;  %v3731_v40 = vld [vmem:[%s4491_s9 + $0x20] ss:$16 sps:$4 sm:$0xff]   ;;  %v3732_v41 = vld [vmem:[%s4491_s9 + $0x28] ss:$16 sps:$4 sm:$0xff]  }
  0xdf   : > { %v3733_v42 = vld [vmem:[%s4491_s9 + $0x44] ss:$16 sps:$4 sm:$0xff]   ;;  %v3735_v43 = vld [vmem:[%s4491_s9 + $0x4c] ss:$16 sps:$4 sm:$0xff]   ;;  %v3737_v44 = vld [vmem:[%s4491_s9 + $0x40] ss:$16 sps:$4 sm:$0xff]  }
  0xe0   : > { %v3738_v45 = vld [vmem:[%s4491_s9 + $0x48] ss:$16 sps:$4 sm:$0xff]   ;;  %v3739_v46 = vld [vmem:[%s4491_s9 + $0x64] ss:$16 sps:$4 sm:$0xff]   ;;  %v3741_v47 = vld [vmem:[%s4491_s9 + $0x6c] ss:$16 sps:$4 sm:$0xff]  }
  0xe1   : > { %v3743_v48 = vld [vmem:[%s4491_s9 + $0x60] ss:$16 sps:$4 sm:$0xff]   ;;  %v3744_v49 = vld [vmem:[%s4491_s9 + $0x68] ss:$16 sps:$4 sm:$0xff]   ;;  %v3745_v50 = vld [vmem:[%s4491_s9 + $0x84] ss:$16 sps:$4 sm:$0xff]  }
  0xe2   : > { %s3235_s27 = sshll.u32 %s5739_s26, 9  ;;  %v3747_v51 = vld [vmem:[%s4491_s9 + $0x8c] ss:$16 sps:$4 sm:$0xff]   ;;  %v3749_v52 = vld [vmem:[%s4491_s9 + $0x80] ss:$16 sps:$4 sm:$0xff]   ;;  %p3397_p7 = scmp.ne.s32.totalorder %s5739_s26, 1 }
  0xe3   : > { %s373_s8 = sshra.s32 %s3235_s27, 3  ;;  %v3750_v53 = vld [vmem:[%s4491_s9 + $0x88] ss:$16 sps:$4 sm:$0xff]   ;;  %v3751_v54 = vld [vmem:[%s4491_s9 + $0xa4] ss:$16 sps:$4 sm:$0xff]  }
  0xe4   : > { %s3236_s4 = sshll.u32 %s373_s8, 2  ;;  %v3753_v55 = vld [vmem:[%s4491_s9 + $0xac] ss:$16 sps:$4 sm:$0xff]   ;;  %v3755_v56 = vld [vmem:[%s4491_s9 + $0xa0] ss:$16 sps:$4 sm:$0xff]  }
  0xe5   : > { %s4650_s15 = scalar_lea.vmem [#allocation5], %s3236_s4  ;;  %v3756_v57 = vld [vmem:[%s4491_s9 + $0xa8] ss:$16 sps:$4 sm:$0xff]   ;;  %v3757_v58 = vld [vmem:[%s4491_s9 + $0xc4] ss:$16 sps:$4 sm:$0xff]  }
  0xe6   : > { %v3689_v4 = vld [vmem:[%s4650_s15] sm:$0xff]   ;;  %v3691_v6 = vld [vmem:[%s4650_s15 + $0x8] sm:$0xff]   ;;  %v3693_v8 = vld [vmem:[%s4650_s15 + $0x10] sm:$0xff]  }
  0xe7   : > { %v3690_v5 = vld [vmem:[%s4650_s15 + $0x80] sm:$0xff]   ;;  %1466 = vmatpush1.bf16.msra.mxu0 %v3689_v4  ;;  %v3692_v7 = vld [vmem:[%s4650_s15 + $0x88] sm:$0xff]   ;;  %v3694_v9 = vld [vmem:[%s4650_s15 + $0x90] sm:$0xff]  }
  0xe8   : > { %1755 = vmatpush1.bf16.msra.mxu1 %v3690_v5  ;;  %1467 = vmatprep.subr.bf16.mxu0 %v4185_v1  ;;  %v3695_v10 = vld [vmem:[%s4650_s15 + $0x18] sm:$0xff]   ;;  %v3697_v12 = vld [vmem:[%s4650_s15 + $0x20] sm:$0xff]   ;;  %v3699_v14 = vld [vmem:[%s4650_s15 + $0x28] sm:$0xff]  }
  0xe9   : > { %1756 = vmatprep.subr.bf16.mxu1 %v4185_v1  ;;  %v3696_v11 = vld [vmem:[%s4650_s15 + $0x98] sm:$0xff]   ;;  %v3698_v13 = vld [vmem:[%s4650_s15 + $0xa0] sm:$0xff]   ;;  %v3700_v15 = vld [vmem:[%s4650_s15 + $0xa8] sm:$0xff]  }
  0xea   : > { %v3701_v16 = vld [vmem:[%s4650_s15 + $0x30] sm:$0xff]   ;;  %v3703_v18 = vld [vmem:[%s4650_s15 + $0x38] sm:$0xff]   ;;  %v3705_v20 = vld [vmem:[%s4650_s15 + $0x40] sm:$0xff]  }
  0xeb   : > { %1468 = vmatpush1.bf16.msra.mxu0 %v3691_v6  ;;  %v3702_v17 = vld [vmem:[%s4650_s15 + $0xb0] sm:$0xff]   ;;  %v3704_v19 = vld [vmem:[%s4650_s15 + $0xb8] sm:$0xff]   ;;  %v3706_v21 = vld [vmem:[%s4650_s15 + $0xc0] sm:$0xff]  }
  0xec   : > { %1757 = vmatpush1.bf16.msra.mxu1 %v3692_v7  ;;  %1469 = vmatprep.subr.bf16.mxu0 %v4185_v1  ;;  %v3707_v22 = vld [vmem:[%s4650_s15 + $0x48] sm:$0xff]   ;;  %v3709_v24 = vld [vmem:[%s4650_s15 + $0x50] sm:$0xff]   ;;  %v3711_v26 = vld [vmem:[%s4650_s15 + $0x58] sm:$0xff]  }
  0xed   : > { %1758 = vmatprep.subr.bf16.mxu1 %v4185_v1  ;;  %v3708_v23 = vld [vmem:[%s4650_s15 + $0xc8] sm:$0xff]   ;;  %v3710_v25 = vld [vmem:[%s4650_s15 + $0xd0] sm:$0xff]   ;;  %v3712_v27 = vld [vmem:[%s4650_s15 + $0xd8] sm:$0xff]  }
  0xee   : > { %v3713_v28 = vld [vmem:[%s4650_s15 + $0x60] sm:$0xff]   ;;  %v3715_v30 = vld [vmem:[%s4650_s15 + $0x68] sm:$0xff]   ;;  %v3717_v32 = vld [vmem:[%s4650_s15 + $0x70] sm:$0xff]  }
  0xef   : > { %1470 = vmatpush1.bf16.msra.mxu0 %v3693_v8  ;;  %v3714_v29 = vld [vmem:[%s4650_s15 + $0xe0] sm:$0xff]   ;;  %v3716_v31 = vld [vmem:[%s4650_s15 + $0xe8] sm:$0xff]   ;;  %v3718_v33 = vld [vmem:[%s4650_s15 + $0xf0] sm:$0xff]  }
  0xf0   : > { %1759 = vmatpush1.bf16.msra.mxu1 %v3694_v9  ;;  %1471 = vmatprep.subr.bf16.mxu0 %v4185_v1  ;;  %v3719_v34 = vld [vmem:[%s4650_s15 + $0x78] sm:$0xff]   ;;  %v3761_v60 = vld [vmem:[%s4491_s9 + $0xc0] ss:$16 sps:$4 sm:$0xff]   ;;  %v3763_v62 = vld [vmem:[%s4491_s9 + $0xe4] ss:$16 sps:$4 sm:$0xff]  }
  0xf1   : > { %1760 = vmatprep.subr.bf16.mxu1 %v4185_v1  ;;  %v3720_v35 = vld [vmem:[%s4650_s15 + $0xf8] sm:$0xff]   ;;  %v3767_v0 = vld [vmem:[%s4491_s9 + $0xe0] ss:$16 sps:$4 sm:$0xff]   ;;  %v3769_v2 = vld [vmem:[%s4491_s9 + $0x104] ss:$16 sps:$4 sm:$0xff]  }
  0xf2   : > { %v3759_v59 = vld [vmem:[%s4491_s9 + $0xcc] ss:$16 sps:$4 sm:$0xff]   ;;  %v3762_v61 = vld [vmem:[%s4491_s9 + $0xc8] ss:$16 sps:$4 sm:$0xff]   ;;  %v3773_v4 = vld [vmem:[%s4491_s9 + $0x100] ss:$16 sps:$4 sm:$0xff]  }
  0xf3   : > { %1472 = vmatpush1.bf16.msra.mxu0 %v3695_v10  ;;  %v3765_v63 = vld [vmem:[%s4491_s9 + $0xec] ss:$16 sps:$4 sm:$0xff]   ;;  %v3774_v5 = vld [vmem:[%s4491_s9 + $0x108] ss:$16 sps:$4 sm:$0xff]   ;;  %v3775_v6 = vld [vmem:[%s4491_s9 + $0x124] ss:$16 sps:$4 sm:$0xff]  }
  0xf4   : > { %1761 = vmatpush1.bf16.msra.mxu1 %v3696_v11  ;;  %1473 = vmatprep.subr.bf16.mxu0 %v4185_v1  ;;  %v3771_v3 = vld [vmem:[%s4491_s9 + $0x10c] ss:$16 sps:$4 sm:$0xff]   ;;  %v3779_v8 = vld [vmem:[%s4491_s9 + $0x120] ss:$16 sps:$4 sm:$0xff]   ;;  %v3780_v9 = vld [vmem:[%s4491_s9 + $0x128] ss:$16 sps:$4 sm:$0xff]  }
  0xf5   : > { %1762 = vmatprep.subr.bf16.mxu1 %v4185_v1  ;;  %v3777_v7 = vld [vmem:[%s4491_s9 + $0x12c] ss:$16 sps:$4 sm:$0xff]   ;;  %v3781_v10 = vld [vmem:[%s4491_s9 + $0x144] ss:$16 sps:$4 sm:$0xff]  }
  0xf6   : > { %v3783_v11 = vld [vmem:[%s4491_s9 + $0x14c] ss:$16 sps:$4 sm:$0xff]  }
  0xf7   : > { %1474 = vmatpush1.bf16.msra.mxu0 %v3697_v12  ;;  %v3785_v12 = vld [vmem:[%s4491_s9 + $0x140] ss:$16 sps:$4 sm:$0xff]  }
  0xf8   : > { %1763 = vmatpush1.bf16.msra.mxu1 %v3698_v13  ;;  %1475 = vmatprep.subr.bf16.mxu0 %v4185_v1  ;;  %v3786_v13 = vld [vmem:[%s4491_s9 + $0x148] ss:$16 sps:$4 sm:$0xff]  }
  0xf9   : > { %1764 = vmatprep.subr.bf16.mxu1 %v4185_v1 }
  0xfb   : > { %1476 = vmatpush1.bf16.msra.mxu0 %v3699_v14  ;;  %v3787_v14 = vld [vmem:[%s4491_s9 + $0x164] ss:$16 sps:$4 sm:$0xff]  }
  0xfc   : > { %1765 = vmatpush1.bf16.msra.mxu1 %v3700_v15  ;;  %1477 = vmatprep.subr.bf16.mxu0 %v4185_v1  ;;  %v3789_v15 = vld [vmem:[%s4491_s9 + $0x16c] ss:$16 sps:$4 sm:$0xff]  }
  0xfd   : > { %1766 = vmatprep.subr.bf16.mxu1 %v4185_v1 }
  0xff   : > { %1478 = vmatpush1.bf16.msra.mxu0 %v3701_v16  ;;  %v3791_v16 = vld [vmem:[%s4491_s9 + $0x160] ss:$16 sps:$4 sm:$0xff]  }
 0x100   : > { %1767 = vmatpush1.bf16.msra.mxu1 %v3702_v17  ;;  %1479 = vmatprep.subr.bf16.mxu0 %v4185_v1  ;;  %v3792_v17 = vld [vmem:[%s4491_s9 + $0x168] ss:$16 sps:$4 sm:$0xff]  }
 0x101   : > { %1768 = vmatprep.subr.bf16.mxu1 %v4185_v1 }
 0x103   : > { %1480 = vmatpush1.bf16.msra.mxu0 %v3703_v18  ;;  %v3793_v18 = vld [vmem:[%s4491_s9 + $0x184] ss:$16 sps:$4 sm:$0xff]  }
 0x104   : > { %1769 = vmatpush1.bf16.msra.mxu1 %v3704_v19  ;;  %1481 = vmatprep.subr.bf16.mxu0 %v4185_v1  ;;  %v3795_v19 = vld [vmem:[%s4491_s9 + $0x18c] ss:$16 sps:$4 sm:$0xff]  }
 0x105   : > { %1770 = vmatprep.subr.bf16.mxu1 %v4185_v1 }
 0x107   : > { %1482 = vmatpush1.bf16.msra.mxu0 %v3705_v20  ;;  %v3797_v20 = vld [vmem:[%s4491_s9 + $0x180] ss:$16 sps:$4 sm:$0xff]  }
 0x108   : > { %1771 = vmatpush1.bf16.msra.mxu1 %v3706_v21  ;;  %1483 = vmatprep.subr.bf16.mxu0 %v4185_v1  ;;  %v3798_v21 = vld [vmem:[%s4491_s9 + $0x188] ss:$16 sps:$4 sm:$0xff]  }
 0x109   : > { %1772 = vmatprep.subr.bf16.mxu1 %v4185_v1 }
 0x10b   : > { %1484 = vmatpush1.bf16.msra.mxu0 %v3707_v22  ;;  %v3799_v22 = vld [vmem:[%s4491_s9 + $0x1a4] ss:$16 sps:$4 sm:$0xff]  }
 0x10c   : > { %1773 = vmatpush1.bf16.msra.mxu1 %v3708_v23  ;;  %1485 = vmatprep.subr.bf16.mxu0 %v4185_v1  ;;  %v3801_v23 = vld [vmem:[%s4491_s9 + $0x1ac] ss:$16 sps:$4 sm:$0xff]  }
 0x10d   : > { %1774 = vmatprep.subr.bf16.mxu1 %v4185_v1 }
 0x10f   : > { %1486 = vmatpush1.bf16.msra.mxu0 %v3709_v24  ;;  %v3803_v24 = vld [vmem:[%s4491_s9 + $0x1a0] ss:$16 sps:$4 sm:$0xff]  }
 0x110   : > { %1775 = vmatpush1.bf16.msra.mxu1 %v3710_v25  ;;  %1487 = vmatprep.subr.bf16.mxu0 %v4185_v1  ;;  %v3804_v25 = vld [vmem:[%s4491_s9 + $0x1a8] ss:$16 sps:$4 sm:$0xff]  }
 0x111   : > { %1776 = vmatprep.subr.bf16.mxu1 %v4185_v1 }
 0x113   : > { %1488 = vmatpush1.bf16.msra.mxu0 %v3711_v26  ;;  %v3805_v26 = vld [vmem:[%s4491_s9 + $0x1c4] ss:$16 sps:$4 sm:$0xff]  }
 0x114   : > { %1777 = vmatpush1.bf16.msra.mxu1 %v3712_v27  ;;  %1489 = vmatprep.subr.bf16.mxu0 %v4185_v1  ;;  %v3807_v27 = vld [vmem:[%s4491_s9 + $0x1cc] ss:$16 sps:$4 sm:$0xff]  }
 0x115   : > { %1778 = vmatprep.subr.bf16.mxu1 %v4185_v1 }
 0x117   : > { %1490 = vmatpush1.bf16.msra.mxu0 %v3713_v28  ;;  %v3809_v28 = vld [vmem:[%s4491_s9 + $0x1c0] ss:$16 sps:$4 sm:$0xff]  }
 0x118   : > { %1779 = vmatpush1.bf16.msra.mxu1 %v3714_v29  ;;  %1491 = vmatprep.subr.bf16.mxu0 %v4185_v1  ;;  %v3810_v29 = vld [vmem:[%s4491_s9 + $0x1c8] ss:$16 sps:$4 sm:$0xff]  }
 0x119   : > { %1780 = vmatprep.subr.bf16.mxu1 %v4185_v1 }
 0x11b   : > { %1492 = vmatpush1.bf16.msra.mxu0 %v3715_v30  ;;  %v3811_v30 = vld [vmem:[%s4491_s9 + $0x1e4] ss:$16 sps:$4 sm:$0xff]  }
 0x11c   : > { %1781 = vmatpush1.bf16.msra.mxu1 %v3716_v31  ;;  %1493 = vmatprep.subr.bf16.mxu0 %v4185_v1  ;;  %v3813_v31 = vld [vmem:[%s4491_s9 + $0x1ec] ss:$16 sps:$4 sm:$0xff]  }
 0x11d   : > { %1782 = vmatprep.subr.bf16.mxu1 %v4185_v1 }
 0x11f   : > { %1494 = vmatpush1.bf16.msra.mxu0 %v3717_v32  ;;  %v3815_v32 = vld [vmem:[%s4491_s9 + $0x1e0] ss:$16 sps:$4 sm:$0xff]  }
 0x120   : > { %1783 = vmatpush1.bf16.msra.mxu1 %v3718_v33  ;;  %1495 = vmatprep.subr.bf16.mxu0 %v4185_v1  ;;  %v3816_v33 = vld [vmem:[%s4491_s9 + $0x1e8] ss:$16 sps:$4 sm:$0xff]  }
 0x121   : > { %1784 = vmatprep.subr.bf16.mxu1 %v4185_v1  ;;  %v3768_v1 = vld [vmem:[%s4491_s9 + $0xe8] ss:$16 sps:$4 sm:$0xff]  }
 0x123   : > { %1496 = vmatpush1.bf16.msra.mxu0 %v3719_v34  ;;  %v3817_v34 = vld [vmem:[%s4491_s9 + $0x204] ss:$16 sps:$4 sm:$0xff]  }
 0x124   : > { %1785 = vmatpush1.bf16.msra.mxu1 %v3720_v35  ;;  %v3819_v35 = vld [vmem:[%s4491_s9 + $0x20c] ss:$16 sps:$4 sm:$0xff]  }
 0x126   : > { %1498 = vmatmul.mubr.bf16.vlgmr.msra.gmra.mrb[0].mxu0 %v3721_v36  ;;  %v3821_v36 = vld [vmem:[%s4491_s9 + $0x200] ss:$16 sps:$4 sm:$0xff]  }
 0x127   : > { %1787 = vmatmul.mubr.bf16.vlgmr.msra.gmra.mrb[0].mxu1 %v3724_v37  ;;  %1505 = vmatprep.mubr.bf16.mxu0 %v3727_v38  ;;  %v3822_v37 = vld [vmem:[%s4491_s9 + $0x208] ss:$16 sps:$4 sm:$0xff]   ;;  %v3823_v38 = vld [vmem:[%s4491_s9 + $0x224] ss:$16 sps:$4 sm:$0xff]  }
 0x128   : > { %1794 = vmatprep.mubr.bf16.mxu1 %v3729_v39  ;;  %v3825_v39 = vld [vmem:[%s4491_s9 + $0x22c] ss:$16 sps:$4 sm:$0xff]  }
 0x12e   : > { %1506 = vmatmul.mubr.bf16.gmra.mrb[4].mxu0 %v3731_v40  ;;  %v3827_v40 = vld [vmem:[%s4491_s9 + $0x220] ss:$16 sps:$4 sm:$0xff]  }
 0x12f   : > { %1795 = vmatmul.mubr.bf16.gmra.mrb[4].mxu1 %v3732_v41  ;;  %1513 = vmatprep.mubr.bf16.mxu0 %v3733_v42  ;;  %v3828_v41 = vld [vmem:[%s4491_s9 + $0x228] ss:$16 sps:$4 sm:$0xff]   ;;  %v3829_v42 = vld [vmem:[%s4491_s9 + $0x244] ss:$16 sps:$4 sm:$0xff]  }
 0x130   : > { %1802 = vmatprep.mubr.bf16.mxu1 %v3735_v43  ;;  %v3831_v43 = vld [vmem:[%s4491_s9 + $0x24c] ss:$16 sps:$4 sm:$0xff]  }
 0x136   : > { %1514 = vmatmul.mubr.bf16.gmra.mrb[8].mxu0 %v3737_v44  ;;  %v3833_v44 = vld [vmem:[%s4491_s9 + $0x240] ss:$16 sps:$4 sm:$0xff]  }
 0x137   : > { %1803 = vmatmul.mubr.bf16.gmra.mrb[8].mxu1 %v3738_v45  ;;  %1521 = vmatprep.mubr.bf16.mxu0 %v3739_v46  ;;  %v3834_v45 = vld [vmem:[%s4491_s9 + $0x248] ss:$16 sps:$4 sm:$0xff]   ;;  %v3835_v46 = vld [vmem:[%s4491_s9 + $0x264] ss:$16 sps:$4 sm:$0xff]  }
 0x138   : > { %1810 = vmatprep.mubr.bf16.mxu1 %v3741_v47  ;;  %v3837_v47 = vld [vmem:[%s4491_s9 + $0x26c] ss:$16 sps:$4 sm:$0xff]  }
 0x13e   : > { %1522 = vmatmul.mubr.bf16.gmra.mrb[12].mxu0 %v3743_v48  ;;  %v3839_v48 = vld [vmem:[%s4491_s9 + $0x260] ss:$16 sps:$4 sm:$0xff]  }
 0x13f   : > { %1811 = vmatmul.mubr.bf16.gmra.mrb[12].mxu1 %v3744_v49  ;;  %1529 = vmatprep.mubr.bf16.mxu0 %v3745_v50  ;;  %v3840_v49 = vld [vmem:[%s4491_s9 + $0x268] ss:$16 sps:$4 sm:$0xff]   ;;  %v3841_v50 = vld [vmem:[%s4491_s9 + $0x284] ss:$16 sps:$4 sm:$0xff]  }
 0x140   : > { %1818 = vmatprep.mubr.bf16.mxu1 %v3747_v51  ;;  %v3843_v51 = vld [vmem:[%s4491_s9 + $0x28c] ss:$16 sps:$4 sm:$0xff]  }
 0x146   : > { %1530 = vmatmul.mubr.bf16.gmra.mrb[16].mxu0 %v3749_v52  ;;  %v3845_v52 = vld [vmem:[%s4491_s9 + $0x280] ss:$16 sps:$4 sm:$0xff]  }
 0x147   : > { %1819 = vmatmul.mubr.bf16.gmra.mrb[16].mxu1 %v3750_v53  ;;  %1537 = vmatprep.mubr.bf16.mxu0 %v3751_v54  ;;  %v3846_v53 = vld [vmem:[%s4491_s9 + $0x288] ss:$16 sps:$4 sm:$0xff]   ;;  %v3847_v54 = vld [vmem:[%s4491_s9 + $0x2a4] ss:$16 sps:$4 sm:$0xff]  }
 0x148   : > { %1826 = vmatprep.mubr.bf16.mxu1 %v3753_v55  ;;  %v3849_v55 = vld [vmem:[%s4491_s9 + $0x2ac] ss:$16 sps:$4 sm:$0xff]  }
 0x14e   : > { %1538 = vmatmul.mubr.bf16.gmra.mrb[20].mxu0 %v3755_v56  ;;  %v3851_v56 = vld [vmem:[%s4491_s9 + $0x2a0] ss:$16 sps:$4 sm:$0xff]  }
 0x14f   : > { %1827 = vmatmul.mubr.bf16.gmra.mrb[20].mxu1 %v3756_v57  ;;  %1545 = vmatprep.mubr.bf16.mxu0 %v3757_v58  ;;  %v3852_v57 = vld [vmem:[%s4491_s9 + $0x2a8] ss:$16 sps:$4 sm:$0xff]   ;;  %v3853_v58 = vld [vmem:[%s4491_s9 + $0x2c4] ss:$16 sps:$4 sm:$0xff]  }
 0x150   : > { %1834 = vmatprep.mubr.bf16.mxu1 %v3759_v59  ;;  %v3855_v59 = vld [vmem:[%s4491_s9 + $0x2cc] ss:$16 sps:$4 sm:$0xff]  }
 0x156   : > { %1546 = vmatmul.mubr.bf16.gmra.mrb[24].mxu0 %v3761_v60  ;;  %v3857_v60 = vld [vmem:[%s4491_s9 + $0x2c0] ss:$16 sps:$4 sm:$0xff]  }
 0x157   : > { %1835 = vmatmul.mubr.bf16.gmra.mrb[24].mxu1 %v3762_v61  ;;  %1553 = vmatprep.mubr.bf16.mxu0 %v3763_v62  ;;  %v3858_v61 = vld [vmem:[%s4491_s9 + $0x2c8] ss:$16 sps:$4 sm:$0xff]   ;;  %v3859_v62 = vld [vmem:[%s4491_s9 + $0x2e4] ss:$16 sps:$4 sm:$0xff]  }
 0x158   : > { %1842 = vmatprep.mubr.bf16.mxu1 %v3765_v63  ;;  %v3861_v63 = vld [vmem:[%s4491_s9 + $0x2ec] ss:$16 sps:$4 sm:$0xff]  }
 0x15e   : > { %1554 = vmatmul.mubr.bf16.gmra.mrb[28].mxu0 %v3767_v0  ;;  %v3863_v0 = vld [vmem:[%s4491_s9 + $0x2e0] ss:$16 sps:$4 sm:$0xff]  }
 0x15f   : > { %1843 = vmatmul.mubr.bf16.gmra.mrb[28].mxu1 %v3768_v1  ;;  %1561 = vmatprep.mubr.bf16.mxu0 %v3769_v2  ;;  %v3864_v1 = vld [vmem:[%s4491_s9 + $0x2e8] ss:$16 sps:$4 sm:$0xff]   ;;  %v3865_v2 = vld [vmem:[%s4491_s9 + $0x304] ss:$16 sps:$4 sm:$0xff]  }
 0x160   : > { %1850 = vmatprep.mubr.bf16.mxu1 %v3771_v3  ;;  %v3867_v3 = vld [vmem:[%s4491_s9 + $0x30c] ss:$16 sps:$4 sm:$0xff]  }
 0x166   : > { %1562 = vmatmul.mubr.bf16.gmra.mrb[32].mxu0 %v3773_v4  ;;  %v3869_v4 = vld [vmem:[%s4491_s9 + $0x300] ss:$16 sps:$4 sm:$0xff]  }
 0x167   : > { %1851 = vmatmul.mubr.bf16.gmra.mrb[32].mxu1 %v3774_v5  ;;  %1569 = vmatprep.mubr.bf16.mxu0 %v3775_v6  ;;  %v3870_v5 = vld [vmem:[%s4491_s9 + $0x308] ss:$16 sps:$4 sm:$0xff]   ;;  %v3871_v6 = vld [vmem:[%s4491_s9 + $0x324] ss:$16 sps:$4 sm:$0xff]  }
 0x168   : > { %1858 = vmatprep.mubr.bf16.mxu1 %v3777_v7  ;;  %v3873_v7 = vld [vmem:[%s4491_s9 + $0x32c] ss:$16 sps:$4 sm:$0xff]  }
 0x16e   : > { %1570 = vmatmul.mubr.bf16.gmra.mrb[36].mxu0 %v3779_v8  ;;  %v3875_v8 = vld [vmem:[%s4491_s9 + $0x320] ss:$16 sps:$4 sm:$0xff]  }
 0x16f   : > { %1859 = vmatmul.mubr.bf16.gmra.mrb[36].mxu1 %v3780_v9  ;;  %1577 = vmatprep.mubr.bf16.mxu0 %v3781_v10  ;;  %v3876_v9 = vld [vmem:[%s4491_s9 + $0x328] ss:$16 sps:$4 sm:$0xff]   ;;  %v3877_v10 = vld [vmem:[%s4491_s9 + $0x344] ss:$16 sps:$4 sm:$0xff]  }
 0x170   : > { %1866 = vmatprep.mubr.bf16.mxu1 %v3783_v11  ;;  %v3879_v11 = vld [vmem:[%s4491_s9 + $0x34c] ss:$16 sps:$4 sm:$0xff]  }
 0x176   : > { %1578 = vmatmul.mubr.bf16.gmra.mrb[40].mxu0 %v3785_v12  ;;  %v3881_v12 = vld [vmem:[%s4491_s9 + $0x340] ss:$16 sps:$4 sm:$0xff]  }
 0x177   : > { %1867 = vmatmul.mubr.bf16.gmra.mrb[40].mxu1 %v3786_v13  ;;  %1585 = vmatprep.mubr.bf16.mxu0 %v3787_v14  ;;  %v3882_v13 = vld [vmem:[%s4491_s9 + $0x348] ss:$16 sps:$4 sm:$0xff]   ;;  %v3883_v14 = vld [vmem:[%s4491_s9 + $0x364] ss:$16 sps:$4 sm:$0xff]  }
 0x178   : > { %1874 = vmatprep.mubr.bf16.mxu1 %v3789_v15  ;;  %v3885_v15 = vld [vmem:[%s4491_s9 + $0x36c] ss:$16 sps:$4 sm:$0xff]  }
 0x17e   : > { %1586 = vmatmul.mubr.bf16.gmra.mrb[44].mxu0 %v3791_v16 }
 0x17f   : > { %1875 = vmatmul.mubr.bf16.gmra.mrb[44].mxu1 %v3792_v17  ;;  %1593 = vmatprep.mubr.bf16.mxu0 %v3793_v18  ;;  %v569_v17 = vld [vmem:[%s4514_s28] sm:$0xff] }
 0x180   : > { %1882 = vmatprep.mubr.bf16.mxu1 %v3795_v19 }
 0x186   : > { %1594 = vmatmul.mubr.bf16.gmra.mrb[48].mxu0 %v3797_v20  ;;  %v3887_v20 = vld [vmem:[%s4491_s9 + $0x360] ss:$16 sps:$4 sm:$0xff]  }
 0x187   : > { %1883 = vmatmul.mubr.bf16.gmra.mrb[48].mxu1 %v3798_v21  ;;  %1601 = vmatprep.mubr.bf16.mxu0 %v3799_v22 }
 0x188   : > { %1890 = vmatprep.mubr.bf16.mxu1 %v3801_v23 }
 0x18e   : > { %1602 = vmatmul.mubr.bf16.gmra.mrb[52].mxu0 %v3803_v24  ;;  %v3888_v24 = vld [vmem:[%s4491_s9 + $0x368] ss:$16 sps:$4 sm:$0xff]  }
 0x18f   : > { %1891 = vmatmul.mubr.bf16.gmra.mrb[52].mxu1 %v3804_v25  ;;  %1609 = vmatprep.mubr.bf16.mxu0 %v3805_v26  ;;  %v3889_v25 = vld [vmem:[%s4491_s9 + $0x384] ss:$16 sps:$4 sm:$0xff]   ;;  %v570_v26 = vld [vmem:[%s4514_s28 + $0x8] sm:$0xff] }
 0x190   : > { %1898 = vmatprep.mubr.bf16.mxu1 %v3807_v27 }
 0x196   : > { %1610 = vmatmul.mubr.bf16.gmra.mrb[56].mxu0 %v3809_v28 }
 0x197   : > { %1899 = vmatmul.mubr.bf16.gmra.mrb[56].mxu1 %v3810_v29  ;;  %1617 = vmatprep.mubr.bf16.mxu0 %v3811_v30  ;;  %v3891_v29 = vld [vmem:[%s4491_s9 + $0x38c] ss:$16 sps:$4 sm:$0xff]  }
 0x198   : > { %1906 = vmatprep.mubr.bf16.mxu1 %v3813_v31 }
 0x19e   : > { %1618 = vmatmul.mubr.bf16.gmra.mrb[60].mxu0 %v3815_v32 }
 0x19f   : > { %1907 = vmatmul.mubr.bf16.gmra.mrb[60].mxu1 %v3816_v33  ;;  %1625 = vmatprep.mubr.bf16.mxu0 %v3817_v34 }
 0x1a0   : > { %1914 = vmatprep.mubr.bf16.mxu1 %v3819_v35  ;;  %v571_v35 = vld [vmem:[%s4514_s28 + $0x10] sm:$0xff] }
 0x1a6   : > { %1626 = vmatmul.mubr.bf16.gmra.mrb[64].mxu0 %v3821_v36 }
 0x1a7   : > { %1915 = vmatmul.mubr.bf16.gmra.mrb[64].mxu1 %v3822_v37  ;;  %1633 = vmatprep.mubr.bf16.mxu0 %v3823_v38  ;;  %v3893_v38 = vld [vmem:[%s4491_s9 + $0x380] ss:$16 sps:$4 sm:$0xff]  }
 0x1a8   : > { %1922 = vmatprep.mubr.bf16.mxu1 %v3825_v39 }
 0x1ae   : > { %1634 = vmatmul.mubr.bf16.gmra.mrb[68].mxu0 %v3827_v40 }
 0x1af   : > { %1923 = vmatmul.mubr.bf16.gmra.mrb[68].mxu1 %v3828_v41  ;;  %1641 = vmatprep.mubr.bf16.mxu0 %v3829_v42  ;;  %v3894_v42 = vld [vmem:[%s4491_s9 + $0x388] ss:$16 sps:$4 sm:$0xff]  }
 0x1b0   : > { %1930 = vmatprep.mubr.bf16.mxu1 %v3831_v43  ;;  %v3895_v43 = vld [vmem:[%s4491_s9 + $0x3a4] ss:$16 sps:$4 sm:$0xff]  }
 0x1b6   : > { %1642 = vmatmul.mubr.bf16.gmra.mrb[72].mxu0 %v3833_v44  ;;  %v572_v44 = vld [vmem:[%s4514_s28 + $0x18] sm:$0xff] }
 0x1b7   : > { %1931 = vmatmul.mubr.bf16.gmra.mrb[72].mxu1 %v3834_v45  ;;  %1649 = vmatprep.mubr.bf16.mxu0 %v3835_v46 }
 0x1b8   : > { %1938 = vmatprep.mubr.bf16.mxu1 %v3837_v47  ;;  %v3897_v47 = vld [vmem:[%s4491_s9 + $0x3ac] ss:$16 sps:$4 sm:$0xff]  }
 0x1be   : > { %1650 = vmatmul.mubr.bf16.gmra.mrb[76].mxu0 %v3839_v48 }
 0x1bf   : > { %1939 = vmatmul.mubr.bf16.gmra.mrb[76].mxu1 %v3840_v49  ;;  %1657 = vmatprep.mubr.bf16.mxu0 %v3841_v50 }
 0x1c0   : > { %1946 = vmatprep.mubr.bf16.mxu1 %v3843_v51 }
 0x1c6   : > { %1658 = vmatmul.mubr.bf16.gmra.mrb[80].mxu0 %v3845_v52 }
 0x1c7   : > { %1947 = vmatmul.mubr.bf16.gmra.mrb[80].mxu1 %v3846_v53  ;;  %1665 = vmatprep.mubr.bf16.mxu0 %v3847_v54  ;;  %v573_v53 = vld [vmem:[%s4514_s28 + $0x20] sm:$0xff] }
 0x1c8   : > { %1954 = vmatprep.mubr.bf16.mxu1 %v3849_v55 }
 0x1ce   : > { %1666 = vmatmul.mubr.bf16.gmra.mrb[84].mxu0 %v3851_v56  ;;  %v3899_v56 = vld [vmem:[%s4491_s9 + $0x3a0] ss:$16 sps:$4 sm:$0xff]  }
 0x1cf   : > { %1955 = vmatmul.mubr.bf16.gmra.mrb[84].mxu1 %v3852_v57  ;;  %1673 = vmatprep.mubr.bf16.mxu0 %v3853_v58 }
 0x1d0   : > { %1962 = vmatprep.mubr.bf16.mxu1 %v3855_v59 }
 0x1d6   : > { %1674 = vmatmul.mubr.bf16.gmra.mrb[88].mxu0 %v3857_v60  ;;  %v3900_v60 = vld [vmem:[%s4491_s9 + $0x3a8] ss:$16 sps:$4 sm:$0xff]  }
 0x1d7   : > { %1963 = vmatmul.mubr.bf16.gmra.mrb[88].mxu1 %v3858_v61  ;;  %1681 = vmatprep.mubr.bf16.mxu0 %v3859_v62  ;;  %v3901_v61 = vld [vmem:[%s4491_s9 + $0x3c4] ss:$16 sps:$4 sm:$0xff]   ;;  %v574_v62 = vld [vmem:[%s4514_s28 + $0x28] sm:$0xff] }
 0x1d8   : > { %1970 = vmatprep.mubr.bf16.mxu1 %v3861_v63 }
 0x1de   : > { %1682 = vmatmul.mubr.bf16.gmra.mrb[92].mxu0 %v3863_v0 }
 0x1df   : > { %1971 = vmatmul.mubr.bf16.gmra.mrb[92].mxu1 %v3864_v1  ;;  %1689 = vmatprep.mubr.bf16.mxu0 %v3865_v2  ;;  %v3903_v1 = vld [vmem:[%s4491_s9 + $0x3cc] ss:$16 sps:$4 sm:$0xff]  }
 0x1e0   : > { %1978 = vmatprep.mubr.bf16.mxu1 %v3867_v3 }
 0x1e6   : > { %1690 = vmatmul.mubr.bf16.gmra.mrb[96].mxu0 %v3869_v4 }
 0x1e7   : > { %1979 = vmatmul.mubr.bf16.gmra.mrb[96].mxu1 %v3870_v5  ;;  %1697 = vmatprep.mubr.bf16.mxu0 %v3871_v6 }
 0x1e8   : > { %1986 = vmatprep.mubr.bf16.mxu1 %v3873_v7  ;;  %v575_v7 = vld [vmem:[%s4514_s28 + $0x30] sm:$0xff] }
 0x1ee   : > { %1698 = vmatmul.mubr.bf16.gmra.mrb[100].mxu0 %v3875_v8 }
 0x1ef   : > { %1987 = vmatmul.mubr.bf16.gmra.mrb[100].mxu1 %v3876_v9  ;;  %1705 = vmatprep.mubr.bf16.mxu0 %v3877_v10  ;;  %v3905_v10 = vld [vmem:[%s4491_s9 + $0x3c0] ss:$16 sps:$4 sm:$0xff]  }
 0x1f0   : > { %1994 = vmatprep.mubr.bf16.mxu1 %v3879_v11 }
 0x1f6   : > { %1706 = vmatmul.mubr.bf16.gmra.mrb[104].mxu0 %v3881_v12 }
 0x1f7   : > { %1995 = vmatmul.mubr.bf16.gmra.mrb[104].mxu1 %v3882_v13  ;;  %1713 = vmatprep.mubr.bf16.mxu0 %v3883_v14  ;;  %v3906_v14 = vld [vmem:[%s4491_s9 + $0x3c8] ss:$16 sps:$4 sm:$0xff]  }
 0x1f8   : > { %2002 = vmatprep.mubr.bf16.mxu1 %v3885_v15  ;;  %v3907_v15 = vld [vmem:[%s4491_s9 + $0x3e4] ss:$16 sps:$4 sm:$0xff]  }
 0x1f9   : > { %v1499_v16 = vpop.f32.mrb[0].mxu0 }
 0x1fa   : > { %v1788_v18 = vpop.f32.mrb[0].mxu1  ;;  %v1501_v19 = vpop.f32.mrb[1].mxu0 }
 0x1fb   : > { %v1789_v21 = vadd.f32 %v1788_v18, %v1499_v16  ;;  %v1790_v22 = vpop.f32.mrb[1].mxu1  ;;  %v1502_v23 = vpop.f32.mrb[2].mxu0  ;;  %v576_v16 = vld [vmem:[%s4514_s28 + $0x38] sm:$0xff] }
 0x1fc   : > { %v1791_v27 = vpop.f32.mrb[2].mxu1  ;;  %v1504_v28 = vpop.f32.mrb[3].mxu0  ;;  %v3909_v19 = vld [vmem:[%s4491_s9 + $0x3ec] ss:$16 sps:$4 sm:$0xff]  }
 0x1fd   : > { %v2043_v30 = vadd.f32 %v1789_v21, %v569_v17  ;;  %v1792_v31 = vadd.f32 %v1791_v27, %v1502_v23  ;;  %v1793_v32 = vpop.f32.mrb[3].mxu1  ;;  %v3911_v28 = vld [vmem:[%s4491_s9 + $0x3e0] ss:$16 sps:$4 sm:$0xff]  }
 0x1fe   : > { %1714 = vmatmul.mubr.bf16.gmra.mrb[108].mxu0 %v3887_v20  ;;  %v3912_v32 = vld [vmem:[%s4491_s9 + $0x3e8] ss:$16 sps:$4 sm:$0xff]  }
 0x1ff   : > { %2107 = vst [vmem:[%s4514_s28] sm:$0xff] %v2043_v30  ;;  %v2044_v33 = vadd.f32 %v1792_v31, %v570_v26  ;;  %2003 = vmatmul.mubr.bf16.gmra.mrb[108].mxu1 %v3888_v24  ;;  %1721 = vmatprep.mubr.bf16.mxu0 %v3889_v25  ;;  %v577_v25 = vld [vmem:[%s4514_s28 + $0x40] sm:$0xff] }
 0x200   : > { %2010 = vmatprep.mubr.bf16.mxu1 %v3891_v29 }
 0x201   : > { %2108 = vst [vmem:[%s4514_s28 + $0x8] sm:$0xff] %v2044_v33  ;;  %v1507_v34 = vpop.f32.mrb[4].mxu0  ;;  %v578_v33 = vld [vmem:[%s4514_s28 + $0x48] sm:$0xff] }
 0x202   : > { %v1796_v36 = vpop.f32.mrb[4].mxu1  ;;  %v1509_v37 = vpop.f32.mrb[5].mxu0 }
 0x203   : > { %v1797_v39 = vadd.f32 %v1796_v36, %v1507_v34  ;;  %v1798_v40 = vpop.f32.mrb[5].mxu1  ;;  %v1510_v41 = vpop.f32.mrb[6].mxu0 }
 0x204   : > { %v1799_v45 = vpop.f32.mrb[6].mxu1  ;;  %v1512_v46 = vpop.f32.mrb[7].mxu0 }
 0x205   : > { %v2045_v48 = vadd.f32 %v1797_v39, %v571_v35  ;;  %v1800_v49 = vadd.f32 %v1799_v45, %v1510_v41  ;;  %v1801_v50 = vpop.f32.mrb[7].mxu1  ;;  %v579_v41 = vld [vmem:[%s4514_s28 + $0x50] sm:$0xff] }
 0x206   : > { %1722 = vmatmul.mubr.bf16.gmra.mrb[112].mxu0 %v3893_v38 }
 0x207   : > { %2109 = vst [vmem:[%s4514_s28 + $0x10] sm:$0xff] %v2045_v48  ;;  %v2046_v51 = vadd.f32 %v1800_v49, %v572_v44  ;;  %2011 = vmatmul.mubr.bf16.gmra.mrb[112].mxu1 %v3894_v42  ;;  %1729 = vmatprep.mubr.bf16.mxu0 %v3895_v43 }
 0x208   : > { %2018 = vmatprep.mubr.bf16.mxu1 %v3897_v47  ;;  %v580_v47 = vld [vmem:[%s4514_s28 + $0x58] sm:$0xff] }
 0x209   : > { %2110 = vst [vmem:[%s4514_s28 + $0x18] sm:$0xff] %v2046_v51  ;;  %v1515_v52 = vpop.f32.mrb[8].mxu0 }
 0x20a   : > { %v1804_v54 = vpop.f32.mrb[8].mxu1  ;;  %v1517_v55 = vpop.f32.mrb[9].mxu0 }
 0x20b   : > { %v1805_v57 = vadd.f32 %v1804_v54, %v1515_v52  ;;  %v1806_v58 = vpop.f32.mrb[9].mxu1  ;;  %v1518_v59 = vpop.f32.mrb[10].mxu0  ;;  %v581_v55 = vld [vmem:[%s4514_s28 + $0x60] sm:$0xff] }
 0x20c   : > { %v1807_v63 = vpop.f32.mrb[10].mxu1  ;;  %v1520_v0 = vpop.f32.mrb[11].mxu0 }
 0x20d   : > { %v2047_v2 = vadd.f32 %v1805_v57, %v573_v53  ;;  %v1808_v3 = vadd.f32 %v1807_v63, %v1518_v59  ;;  %v1809_v4 = vpop.f32.mrb[11].mxu1 }
 0x20e   : > { %1730 = vmatmul.mubr.bf16.gmra.mrb[116].mxu0 %v3899_v56 }
 0x20f   : > { %2111 = vst [vmem:[%s4514_s28 + $0x20] sm:$0xff] %v2047_v2  ;;  %v2048_v5 = vadd.f32 %v1808_v3, %v574_v62  ;;  %2019 = vmatmul.mubr.bf16.gmra.mrb[116].mxu1 %v3900_v60  ;;  %1737 = vmatprep.mubr.bf16.mxu0 %v3901_v61  ;;  %v582_v61 = vld [vmem:[%s4514_s28 + $0x68] sm:$0xff] }
 0x210   : > { %2026 = vmatprep.mubr.bf16.mxu1 %v3903_v1 }
 0x211   : > { %2112 = vst [vmem:[%s4514_s28 + $0x28] sm:$0xff] %v2048_v5  ;;  %v1523_v6 = vpop.f32.mrb[12].mxu0  ;;  %v583_v5 = vld [vmem:[%s4514_s28 + $0x70] sm:$0xff] }
 0x212   : > { %v1812_v8 = vpop.f32.mrb[12].mxu1  ;;  %v1525_v9 = vpop.f32.mrb[13].mxu0 }
 0x213   : > { %v1813_v11 = vadd.f32 %v1812_v8, %v1523_v6  ;;  %v1814_v12 = vpop.f32.mrb[13].mxu1  ;;  %v1526_v13 = vpop.f32.mrb[14].mxu0 }
 0x214   : > { %v1815_v17 = vpop.f32.mrb[14].mxu1  ;;  %v1528_v18 = vpop.f32.mrb[15].mxu0 }
 0x215   : > { %v2049_v20 = vadd.f32 %v1813_v11, %v575_v7  ;;  %v1816_v21 = vadd.f32 %v1815_v17, %v1526_v13  ;;  %v1817_v22 = vpop.f32.mrb[15].mxu1  ;;  %v584_v11 = vld [vmem:[%s4514_s28 + $0x78] sm:$0xff] }
 0x216   : > { %1738 = vmatmul.mubr.bf16.gmra.mrb[120].mxu0 %v3905_v10 }
 0x217   : > { %2113 = vst [vmem:[%s4514_s28 + $0x30] sm:$0xff] %v2049_v20  ;;  %v2050_v23 = vadd.f32 %v1816_v21, %v576_v16  ;;  %2027 = vmatmul.mubr.bf16.gmra.mrb[120].mxu1 %v3906_v14  ;;  %1745 = vmatprep.mubr.bf16.mxu0 %v3907_v15 }
 0x218   : > { %2034 = vmatprep.mubr.bf16.mxu1 %v3909_v19  ;;  %v585_v19 = vld [vmem:[%s4514_s28 + $0x80] sm:$0xff] }
 0x219   : > { %2114 = vst [vmem:[%s4514_s28 + $0x38] sm:$0xff] %v2050_v23  ;;  %v1531_v24 = vpop.f32.mrb[16].mxu0 }
 0x21a   : > { %v1820_v26 = vpop.f32.mrb[16].mxu1  ;;  %v1533_v27 = vpop.f32.mrb[17].mxu0 }
 0x21b   : > { %v1821_v29 = vadd.f32 %v1820_v26, %v1531_v24  ;;  %v1822_v30 = vpop.f32.mrb[17].mxu1  ;;  %v1534_v31 = vpop.f32.mrb[18].mxu0 }
 0x21c   : > { %v1823_v34 = vpop.f32.mrb[18].mxu1  ;;  %v1536_v35 = vpop.f32.mrb[19].mxu0 }
 0x21d   : > { %v2051_v36 = vadd.f32 %v1821_v29, %v577_v25  ;;  %v1824_v37 = vadd.f32 %v1823_v34, %v1534_v31  ;;  %v1825_v38 = vpop.f32.mrb[19].mxu1  ;;  %v586_v25 = vld [vmem:[%s4514_s28 + $0x88] sm:$0xff] }
 0x21e   : > { %1746 = vmatmul.mubr.bf16.gmra.mrb[124].mxu0 %v3911_v28 }
 0x21f   : > { %2115 = vst [vmem:[%s4514_s28 + $0x40] sm:$0xff] %v2051_v36  ;;  %v2052_v39 = vadd.f32 %v1824_v37, %v578_v33  ;;  %2035 = vmatmul.mubr.bf16.gmra.mrb[124].mxu1 %v3912_v32  ;;  %v587_v33 = vld [vmem:[%s4514_s28 + $0x90] sm:$0xff] }
 0x221   : > { %2116 = vst [vmem:[%s4514_s28 + $0x48] sm:$0xff] %v2052_v39  ;;  %v1539_v40 = vpop.f32.mrb[20].mxu0  ;;  %v588_v39 = vld [vmem:[%s4514_s28 + $0x98] sm:$0xff] }
 0x222   : > { %v1828_v42 = vpop.f32.mrb[20].mxu1  ;;  %v1541_v43 = vpop.f32.mrb[21].mxu0 }
 0x223   : > { %v1829_v44 = vadd.f32 %v1828_v42, %v1539_v40  ;;  %v1830_v45 = vpop.f32.mrb[21].mxu1  ;;  %v1542_v46 = vpop.f32.mrb[22].mxu0 }
 0x224   : > { %v1831_v48 = vpop.f32.mrb[22].mxu1  ;;  %v1544_v49 = vpop.f32.mrb[23].mxu0 }
 0x225   : > { %v2053_v50 = vadd.f32 %v1829_v44, %v579_v41  ;;  %v1832_v51 = vadd.f32 %v1831_v48, %v1542_v46  ;;  %v1833_v52 = vpop.f32.mrb[23].mxu1 }
 0x227   : > { %2117 = vst [vmem:[%s4514_s28 + $0x50] sm:$0xff] %v2053_v50  ;;  %v2054_v53 = vadd.f32 %v1832_v51, %v580_v47  ;;  %v589_v47 = vld [vmem:[%s4514_s28 + $0xa0] sm:$0xff] }
 0x229   : > { %2118 = vst [vmem:[%s4514_s28 + $0x58] sm:$0xff] %v2054_v53  ;;  %v1547_v54 = vpop.f32.mrb[24].mxu0  ;;  %v590_v53 = vld [vmem:[%s4514_s28 + $0xa8] sm:$0xff] }
 0x22a   : > { %v1836_v56 = vpop.f32.mrb[24].mxu1  ;;  %v1549_v57 = vpop.f32.mrb[25].mxu0 }
 0x22b   : > { %v1837_v58 = vadd.f32 %v1836_v56, %v1547_v54  ;;  %v1838_v59 = vpop.f32.mrb[25].mxu1  ;;  %v1550_v60 = vpop.f32.mrb[26].mxu0 }
 0x22c   : > { %v1839_v62 = vpop.f32.mrb[26].mxu1  ;;  %v1552_v63 = vpop.f32.mrb[27].mxu0 }
 0x22d   : > { %v2055_v0 = vadd.f32 %v1837_v58, %v581_v55  ;;  %v1840_v1 = vadd.f32 %v1839_v62, %v1550_v60  ;;  %v1841_v2 = vpop.f32.mrb[27].mxu1 }
 0x22f   : > { %2119 = vst [vmem:[%s4514_s28 + $0x60] sm:$0xff] %v2055_v0  ;;  %v2056_v3 = vadd.f32 %v1840_v1, %v582_v61  ;;  %v591_v61 = vld [vmem:[%s4514_s28 + $0xb0] sm:$0xff] }
 0x231   : > { %2120 = vst [vmem:[%s4514_s28 + $0x68] sm:$0xff] %v2056_v3  ;;  %v1555_v4 = vpop.f32.mrb[28].mxu0  ;;  %v592_v3 = vld [vmem:[%s4514_s28 + $0xb8] sm:$0xff] }
 0x232   : > { %v1844_v6 = vpop.f32.mrb[28].mxu1  ;;  %v1557_v7 = vpop.f32.mrb[29].mxu0 }
 0x233   : > { %v1845_v8 = vadd.f32 %v1844_v6, %v1555_v4  ;;  %v1846_v9 = vpop.f32.mrb[29].mxu1  ;;  %v1558_v10 = vpop.f32.mrb[30].mxu0 }
 0x234   : > { %v1847_v12 = vpop.f32.mrb[30].mxu1  ;;  %v1560_v13 = vpop.f32.mrb[31].mxu0 }
 0x235   : > { %v2057_v14 = vadd.f32 %v1845_v8, %v583_v5  ;;  %v1848_v15 = vadd.f32 %v1847_v12, %v1558_v10  ;;  %v1849_v16 = vpop.f32.mrb[31].mxu1 }
 0x237   : > { %2121 = vst [vmem:[%s4514_s28 + $0x70] sm:$0xff] %v2057_v14  ;;  %v2058_v17 = vadd.f32 %v1848_v15, %v584_v11  ;;  %v593_v11 = vld [vmem:[%s4514_s28 + $0xc0] sm:$0xff] }
 0x239   : > { %2122 = vst [vmem:[%s4514_s28 + $0x78] sm:$0xff] %v2058_v17  ;;  %v1563_v18 = vpop.f32.mrb[32].mxu0  ;;  %v594_v17 = vld [vmem:[%s4514_s28 + $0xc8] sm:$0xff] }
 0x23a   : > { %v1852_v20 = vpop.f32.mrb[32].mxu1  ;;  %v1565_v21 = vpop.f32.mrb[33].mxu0 }
 0x23b   : > { %v1853_v22 = vadd.f32 %v1852_v20, %v1563_v18  ;;  %v1854_v23 = vpop.f32.mrb[33].mxu1  ;;  %v1566_v24 = vpop.f32.mrb[34].mxu0 }
 0x23c   : > { %v1855_v26 = vpop.f32.mrb[34].mxu1  ;;  %v1568_v27 = vpop.f32.mrb[35].mxu0 }
 0x23d   : > { %v2059_v28 = vadd.f32 %v1853_v22, %v585_v19  ;;  %v1856_v29 = vadd.f32 %v1855_v26, %v1566_v24  ;;  %v1857_v30 = vpop.f32.mrb[35].mxu1 }
 0x23f   : > { %2123 = vst [vmem:[%s4514_s28 + $0x80] sm:$0xff] %v2059_v28  ;;  %v2060_v31 = vadd.f32 %v1856_v29, %v586_v25  ;;  %v595_v25 = vld [vmem:[%s4514_s28 + $0xd0] sm:$0xff] }
 0x241   : > { %2124 = vst [vmem:[%s4514_s28 + $0x88] sm:$0xff] %v2060_v31  ;;  %v1571_v32 = vpop.f32.mrb[36].mxu0  ;;  %v596_v31 = vld [vmem:[%s4514_s28 + $0xd8] sm:$0xff] }
 0x242   : > { %v1860_v34 = vpop.f32.mrb[36].mxu1  ;;  %v1573_v35 = vpop.f32.mrb[37].mxu0 }
 0x243   : > { %v1861_v36 = vadd.f32 %v1860_v34, %v1571_v32  ;;  %v1862_v37 = vpop.f32.mrb[37].mxu1  ;;  %v1574_v38 = vpop.f32.mrb[38].mxu0 }
 0x244   : > { %v1863_v40 = vpop.f32.mrb[38].mxu1  ;;  %v1576_v41 = vpop.f32.mrb[39].mxu0 }
 0x245   : > { %v2061_v42 = vadd.f32 %v1861_v36, %v587_v33  ;;  %v1864_v43 = vadd.f32 %v1863_v40, %v1574_v38  ;;  %v1865_v44 = vpop.f32.mrb[39].mxu1 }
 0x247   : > { %2125 = vst [vmem:[%s4514_s28 + $0x90] sm:$0xff] %v2061_v42  ;;  %v2062_v45 = vadd.f32 %v1864_v43, %v588_v39  ;;  %v597_v39 = vld [vmem:[%s4514_s28 + $0xe0] sm:$0xff] }
 0x249   : > { %2126 = vst [vmem:[%s4514_s28 + $0x98] sm:$0xff] %v2062_v45  ;;  %v1579_v46 = vpop.f32.mrb[40].mxu0  ;;  %v598_v45 = vld [vmem:[%s4514_s28 + $0xe8] sm:$0xff] }
 0x24a   : > { %v1868_v48 = vpop.f32.mrb[40].mxu1  ;;  %v1581_v49 = vpop.f32.mrb[41].mxu0 }
 0x24b   : > { %v1869_v50 = vadd.f32 %v1868_v48, %v1579_v46  ;;  %v1870_v51 = vpop.f32.mrb[41].mxu1  ;;  %v1582_v52 = vpop.f32.mrb[42].mxu0 }
 0x24c   : > { %v1871_v54 = vpop.f32.mrb[42].mxu1  ;;  %v1584_v55 = vpop.f32.mrb[43].mxu0 }
 0x24d   : > { %v2063_v56 = vadd.f32 %v1869_v50, %v589_v47  ;;  %v1872_v57 = vadd.f32 %v1871_v54, %v1582_v52  ;;  %v1873_v58 = vpop.f32.mrb[43].mxu1 }
 0x24f   : > { %2127 = vst [vmem:[%s4514_s28 + $0xa0] sm:$0xff] %v2063_v56  ;;  %v2064_v59 = vadd.f32 %v1872_v57, %v590_v53  ;;  %v599_v53 = vld [vmem:[%s4514_s28 + $0xf0] sm:$0xff] }
 0x251   : > { %2128 = vst [vmem:[%s4514_s28 + $0xa8] sm:$0xff] %v2064_v59  ;;  %v1587_v60 = vpop.f32.mrb[44].mxu0  ;;  %v600_v59 = vld [vmem:[%s4514_s28 + $0xf8] sm:$0xff] }
 0x252   : > { %v1876_v62 = vpop.f32.mrb[44].mxu1  ;;  %v1589_v63 = vpop.f32.mrb[45].mxu0 }
 0x253   : > { %v1877_v0 = vadd.f32 %v1876_v62, %v1587_v60  ;;  %v1878_v1 = vpop.f32.mrb[45].mxu1  ;;  %v1590_v2 = vpop.f32.mrb[46].mxu0 }
 0x254   : > { %v1879_v4 = vpop.f32.mrb[46].mxu1  ;;  %v1592_v5 = vpop.f32.mrb[47].mxu0 }
 0x255   : > { %v2065_v6 = vadd.f32 %v1877_v0, %v591_v61  ;;  %v1880_v7 = vadd.f32 %v1879_v4, %v1590_v2  ;;  %v1881_v8 = vpop.f32.mrb[47].mxu1 }
 0x257   : > { %2129 = vst [vmem:[%s4514_s28 + $0xb0] sm:$0xff] %v2065_v6  ;;  %v2066_v9 = vadd.f32 %v1880_v7, %v592_v3  ;;  %v601_v3 = vld [vmem:[%s4514_s28 + $0x100] sm:$0xff] }
 0x259   : > { %2130 = vst [vmem:[%s4514_s28 + $0xb8] sm:$0xff] %v2066_v9  ;;  %v1595_v10 = vpop.f32.mrb[48].mxu0  ;;  %v602_v9 = vld [vmem:[%s4514_s28 + $0x108] sm:$0xff] }
 0x25a   : > { %v1884_v12 = vpop.f32.mrb[48].mxu1  ;;  %v1597_v13 = vpop.f32.mrb[49].mxu0 }
 0x25b   : > { %v1885_v14 = vadd.f32 %v1884_v12, %v1595_v10  ;;  %v1886_v15 = vpop.f32.mrb[49].mxu1  ;;  %v1598_v16 = vpop.f32.mrb[50].mxu0 }
 0x25c   : > { %v1887_v18 = vpop.f32.mrb[50].mxu1  ;;  %v1600_v19 = vpop.f32.mrb[51].mxu0 }
 0x25d   : > { %v2067_v20 = vadd.f32 %v1885_v14, %v593_v11  ;;  %v1888_v21 = vadd.f32 %v1887_v18, %v1598_v16  ;;  %v1889_v22 = vpop.f32.mrb[51].mxu1 }
 0x25f   : > { %2131 = vst [vmem:[%s4514_s28 + $0xc0] sm:$0xff] %v2067_v20  ;;  %v2068_v23 = vadd.f32 %v1888_v21, %v594_v17  ;;  %v603_v17 = vld [vmem:[%s4514_s28 + $0x110] sm:$0xff] }
 0x261   : > { %2132 = vst [vmem:[%s4514_s28 + $0xc8] sm:$0xff] %v2068_v23  ;;  %v1603_v24 = vpop.f32.mrb[52].mxu0  ;;  %v604_v23 = vld [vmem:[%s4514_s28 + $0x118] sm:$0xff] }
 0x262   : > { %v1892_v26 = vpop.f32.mrb[52].mxu1  ;;  %v1605_v27 = vpop.f32.mrb[53].mxu0 }
 0x263   : > { %v1893_v28 = vadd.f32 %v1892_v26, %v1603_v24  ;;  %v1894_v29 = vpop.f32.mrb[53].mxu1  ;;  %v1606_v30 = vpop.f32.mrb[54].mxu0 }
 0x264   : > { %v1895_v32 = vpop.f32.mrb[54].mxu1  ;;  %v1608_v33 = vpop.f32.mrb[55].mxu0 }
 0x265   : > { %v2069_v34 = vadd.f32 %v1893_v28, %v595_v25  ;;  %v1896_v35 = vadd.f32 %v1895_v32, %v1606_v30  ;;  %v1897_v36 = vpop.f32.mrb[55].mxu1 }
 0x267   : > { %2133 = vst [vmem:[%s4514_s28 + $0xd0] sm:$0xff] %v2069_v34  ;;  %v2070_v37 = vadd.f32 %v1896_v35, %v596_v31  ;;  %v605_v31 = vld [vmem:[%s4514_s28 + $0x120] sm:$0xff] }
 0x269   : > { %2134 = vst [vmem:[%s4514_s28 + $0xd8] sm:$0xff] %v2070_v37  ;;  %v1611_v38 = vpop.f32.mrb[56].mxu0  ;;  %v606_v37 = vld [vmem:[%s4514_s28 + $0x128] sm:$0xff] }
 0x26a   : > { %v1900_v40 = vpop.f32.mrb[56].mxu1  ;;  %v1613_v41 = vpop.f32.mrb[57].mxu0 }
 0x26b   : > { %v1901_v42 = vadd.f32 %v1900_v40, %v1611_v38  ;;  %v1902_v43 = vpop.f32.mrb[57].mxu1  ;;  %v1614_v44 = vpop.f32.mrb[58].mxu0 }
 0x26c   : > { %v1903_v46 = vpop.f32.mrb[58].mxu1  ;;  %v1616_v47 = vpop.f32.mrb[59].mxu0 }
 0x26d   : > { %v2071_v48 = vadd.f32 %v1901_v42, %v597_v39  ;;  %v1904_v49 = vadd.f32 %v1903_v46, %v1614_v44  ;;  %v1905_v50 = vpop.f32.mrb[59].mxu1 }
 0x26f   : > { %2135 = vst [vmem:[%s4514_s28 + $0xe0] sm:$0xff] %v2071_v48  ;;  %v2072_v51 = vadd.f32 %v1904_v49, %v598_v45  ;;  %v607_v45 = vld [vmem:[%s4514_s28 + $0x130] sm:$0xff] }
 0x271   : > { %2136 = vst [vmem:[%s4514_s28 + $0xe8] sm:$0xff] %v2072_v51  ;;  %v1619_v52 = vpop.f32.mrb[60].mxu0  ;;  %v608_v51 = vld [vmem:[%s4514_s28 + $0x138] sm:$0xff] }
 0x272   : > { %v1908_v54 = vpop.f32.mrb[60].mxu1  ;;  %v1621_v55 = vpop.f32.mrb[61].mxu0 }
 0x273   : > { %v1909_v56 = vadd.f32 %v1908_v54, %v1619_v52  ;;  %v1910_v57 = vpop.f32.mrb[61].mxu1  ;;  %v1622_v58 = vpop.f32.mrb[62].mxu0 }
 0x274   : > { %v1911_v60 = vpop.f32.mrb[62].mxu1  ;;  %v1624_v61 = vpop.f32.mrb[63].mxu0 }
 0x275   : > { %v2073_v62 = vadd.f32 %v1909_v56, %v599_v53  ;;  %v1912_v63 = vadd.f32 %v1911_v60, %v1622_v58  ;;  %v1913_v0 = vpop.f32.mrb[63].mxu1 }
 0x277   : > { %2137 = vst [vmem:[%s4514_s28 + $0xf0] sm:$0xff] %v2073_v62  ;;  %v2074_v1 = vadd.f32 %v1912_v63, %v600_v59  ;;  %v609_v59 = vld [vmem:[%s4514_s28 + $0x140] sm:$0xff] }
 0x279   : > { %2138 = vst [vmem:[%s4514_s28 + $0xf8] sm:$0xff] %v2074_v1  ;;  %v1627_v2 = vpop.f32.mrb[64].mxu0  ;;  %v610_v1 = vld [vmem:[%s4514_s28 + $0x148] sm:$0xff] }
 0x27a   : > { %v1916_v4 = vpop.f32.mrb[64].mxu1  ;;  %v1629_v5 = vpop.f32.mrb[65].mxu0 }
 0x27b   : > { %v1917_v6 = vadd.f32 %v1916_v4, %v1627_v2  ;;  %v1918_v7 = vpop.f32.mrb[65].mxu1  ;;  %v1630_v8 = vpop.f32.mrb[66].mxu0 }
 0x27c   : > { %v1919_v10 = vpop.f32.mrb[66].mxu1  ;;  %v1632_v11 = vpop.f32.mrb[67].mxu0 }
 0x27d   : > { %v2075_v12 = vadd.f32 %v1917_v6, %v601_v3  ;;  %v1920_v13 = vadd.f32 %v1919_v10, %v1630_v8  ;;  %v1921_v14 = vpop.f32.mrb[67].mxu1 }
 0x27f   : > { %2139 = vst [vmem:[%s4514_s28 + $0x100] sm:$0xff] %v2075_v12  ;;  %v2076_v15 = vadd.f32 %v1920_v13, %v602_v9  ;;  %v611_v9 = vld [vmem:[%s4514_s28 + $0x150] sm:$0xff] }
 0x281   : > { %2140 = vst [vmem:[%s4514_s28 + $0x108] sm:$0xff] %v2076_v15  ;;  %v1635_v16 = vpop.f32.mrb[68].mxu0  ;;  %v612_v15 = vld [vmem:[%s4514_s28 + $0x158] sm:$0xff] }
 0x282   : > { %v1924_v18 = vpop.f32.mrb[68].mxu1  ;;  %v1637_v19 = vpop.f32.mrb[69].mxu0 }
 0x283   : > { %v1925_v20 = vadd.f32 %v1924_v18, %v1635_v16  ;;  %v1926_v21 = vpop.f32.mrb[69].mxu1  ;;  %v1638_v22 = vpop.f32.mrb[70].mxu0 }
 0x284   : > { %v1927_v24 = vpop.f32.mrb[70].mxu1  ;;  %v1640_v25 = vpop.f32.mrb[71].mxu0 }
 0x285   : > { %v2077_v26 = vadd.f32 %v1925_v20, %v603_v17  ;;  %v1928_v27 = vadd.f32 %v1927_v24, %v1638_v22  ;;  %v1929_v28 = vpop.f32.mrb[71].mxu1 }
 0x287   : > { %2141 = vst [vmem:[%s4514_s28 + $0x110] sm:$0xff] %v2077_v26  ;;  %v2078_v29 = vadd.f32 %v1928_v27, %v604_v23  ;;  %v613_v23 = vld [vmem:[%s4514_s28 + $0x160] sm:$0xff] }
 0x289   : > { %2142 = vst [vmem:[%s4514_s28 + $0x118] sm:$0xff] %v2078_v29  ;;  %v1643_v30 = vpop.f32.mrb[72].mxu0  ;;  %v614_v29 = vld [vmem:[%s4514_s28 + $0x168] sm:$0xff] }
 0x28a   : > { %v1932_v32 = vpop.f32.mrb[72].mxu1  ;;  %v1645_v33 = vpop.f32.mrb[73].mxu0 }
 0x28b   : > { %v1933_v34 = vadd.f32 %v1932_v32, %v1643_v30  ;;  %v1934_v35 = vpop.f32.mrb[73].mxu1  ;;  %v1646_v36 = vpop.f32.mrb[74].mxu0 }
 0x28c   : > { %v1935_v38 = vpop.f32.mrb[74].mxu1  ;;  %v1648_v39 = vpop.f32.mrb[75].mxu0 }
 0x28d   : > { %v2079_v40 = vadd.f32 %v1933_v34, %v605_v31  ;;  %v1936_v41 = vadd.f32 %v1935_v38, %v1646_v36  ;;  %v1937_v42 = vpop.f32.mrb[75].mxu1 }
 0x28f   : > { %2143 = vst [vmem:[%s4514_s28 + $0x120] sm:$0xff] %v2079_v40  ;;  %v2080_v43 = vadd.f32 %v1936_v41, %v606_v37  ;;  %v615_v37 = vld [vmem:[%s4514_s28 + $0x170] sm:$0xff] }
 0x291   : > { %2144 = vst [vmem:[%s4514_s28 + $0x128] sm:$0xff] %v2080_v43  ;;  %v1651_v44 = vpop.f32.mrb[76].mxu0  ;;  %v616_v43 = vld [vmem:[%s4514_s28 + $0x178] sm:$0xff] }
 0x292   : > { %v1940_v46 = vpop.f32.mrb[76].mxu1  ;;  %v1653_v47 = vpop.f32.mrb[77].mxu0 }
 0x293   : > { %v1941_v48 = vadd.f32 %v1940_v46, %v1651_v44  ;;  %v1942_v49 = vpop.f32.mrb[77].mxu1  ;;  %v1654_v50 = vpop.f32.mrb[78].mxu0 }
 0x294   : > { %v1943_v52 = vpop.f32.mrb[78].mxu1  ;;  %v1656_v53 = vpop.f32.mrb[79].mxu0 }
 0x295   : > { %v2081_v54 = vadd.f32 %v1941_v48, %v607_v45  ;;  %v1944_v55 = vadd.f32 %v1943_v52, %v1654_v50  ;;  %v1945_v56 = vpop.f32.mrb[79].mxu1 }
 0x297   : > { %2145 = vst [vmem:[%s4514_s28 + $0x130] sm:$0xff] %v2081_v54  ;;  %v2082_v57 = vadd.f32 %v1944_v55, %v608_v51  ;;  %v617_v51 = vld [vmem:[%s4514_s28 + $0x180] sm:$0xff] }
 0x299   : > { %2146 = vst [vmem:[%s4514_s28 + $0x138] sm:$0xff] %v2082_v57  ;;  %v1659_v58 = vpop.f32.mrb[80].mxu0  ;;  %v618_v57 = vld [vmem:[%s4514_s28 + $0x188] sm:$0xff] }
 0x29a   : > { %v1948_v60 = vpop.f32.mrb[80].mxu1  ;;  %v1661_v61 = vpop.f32.mrb[81].mxu0 }
 0x29b   : > { %v1949_v62 = vadd.f32 %v1948_v60, %v1659_v58  ;;  %v1950_v63 = vpop.f32.mrb[81].mxu1  ;;  %v1662_v0 = vpop.f32.mrb[82].mxu0 }
 0x29c   : > { %v1951_v2 = vpop.f32.mrb[82].mxu1  ;;  %v1664_v3 = vpop.f32.mrb[83].mxu0 }
 0x29d   : > { %v2083_v4 = vadd.f32 %v1949_v62, %v609_v59  ;;  %v1952_v5 = vadd.f32 %v1951_v2, %v1662_v0  ;;  %v1953_v6 = vpop.f32.mrb[83].mxu1 }
 0x29f   : > { %2147 = vst [vmem:[%s4514_s28 + $0x140] sm:$0xff] %v2083_v4  ;;  %v2084_v7 = vadd.f32 %v1952_v5, %v610_v1  ;;  %v619_v1 = vld [vmem:[%s4514_s28 + $0x190] sm:$0xff] }
 0x2a1   : > { %2148 = vst [vmem:[%s4514_s28 + $0x148] sm:$0xff] %v2084_v7  ;;  %v1667_v8 = vpop.f32.mrb[84].mxu0  ;;  %v620_v7 = vld [vmem:[%s4514_s28 + $0x198] sm:$0xff] }
 0x2a2   : > { %v1956_v10 = vpop.f32.mrb[84].mxu1  ;;  %v1669_v11 = vpop.f32.mrb[85].mxu0 }
 0x2a3   : > { %v1957_v12 = vadd.f32 %v1956_v10, %v1667_v8  ;;  %v1958_v13 = vpop.f32.mrb[85].mxu1  ;;  %v1670_v14 = vpop.f32.mrb[86].mxu0 }
 0x2a4   : > { %v1959_v16 = vpop.f32.mrb[86].mxu1  ;;  %v1672_v17 = vpop.f32.mrb[87].mxu0 }
 0x2a5   : > { %v2085_v18 = vadd.f32 %v1957_v12, %v611_v9  ;;  %v1960_v19 = vadd.f32 %v1959_v16, %v1670_v14  ;;  %v1961_v20 = vpop.f32.mrb[87].mxu1 }
 0x2a7   : > { %2149 = vst [vmem:[%s4514_s28 + $0x150] sm:$0xff] %v2085_v18  ;;  %v2086_v21 = vadd.f32 %v1960_v19, %v612_v15  ;;  %v621_v15 = vld [vmem:[%s4514_s28 + $0x1a0] sm:$0xff] }
 0x2a9   : > { %2150 = vst [vmem:[%s4514_s28 + $0x158] sm:$0xff] %v2086_v21  ;;  %v1675_v22 = vpop.f32.mrb[88].mxu0  ;;  %v622_v21 = vld [vmem:[%s4514_s28 + $0x1a8] sm:$0xff] }
 0x2aa   : > { %v1964_v24 = vpop.f32.mrb[88].mxu1  ;;  %v1677_v25 = vpop.f32.mrb[89].mxu0 }
 0x2ab   : > { %v1965_v26 = vadd.f32 %v1964_v24, %v1675_v22  ;;  %v1966_v27 = vpop.f32.mrb[89].mxu1  ;;  %v1678_v28 = vpop.f32.mrb[90].mxu0 }
 0x2ac   : > { %v1967_v30 = vpop.f32.mrb[90].mxu1  ;;  %v1680_v31 = vpop.f32.mrb[91].mxu0 }
 0x2ad   : > { %v2087_v32 = vadd.f32 %v1965_v26, %v613_v23  ;;  %v1968_v33 = vadd.f32 %v1967_v30, %v1678_v28  ;;  %v1969_v34 = vpop.f32.mrb[91].mxu1 }
 0x2af   : > { %2151 = vst [vmem:[%s4514_s28 + $0x160] sm:$0xff] %v2087_v32  ;;  %v2088_v35 = vadd.f32 %v1968_v33, %v614_v29  ;;  %v623_v29 = vld [vmem:[%s4514_s28 + $0x1b0] sm:$0xff] }
 0x2b1   : > { %2152 = vst [vmem:[%s4514_s28 + $0x168] sm:$0xff] %v2088_v35  ;;  %v1683_v36 = vpop.f32.mrb[92].mxu0  ;;  %v624_v35 = vld [vmem:[%s4514_s28 + $0x1b8] sm:$0xff] }
 0x2b2   : > { %v1972_v38 = vpop.f32.mrb[92].mxu1  ;;  %v1685_v39 = vpop.f32.mrb[93].mxu0 }
 0x2b3   : > { %v1973_v40 = vadd.f32 %v1972_v38, %v1683_v36  ;;  %v1974_v41 = vpop.f32.mrb[93].mxu1  ;;  %v1686_v42 = vpop.f32.mrb[94].mxu0 }
 0x2b4   : > { %v1975_v44 = vpop.f32.mrb[94].mxu1  ;;  %v1688_v45 = vpop.f32.mrb[95].mxu0 }
 0x2b5   : > { %v2089_v46 = vadd.f32 %v1973_v40, %v615_v37  ;;  %v1976_v47 = vadd.f32 %v1975_v44, %v1686_v42  ;;  %v1977_v48 = vpop.f32.mrb[95].mxu1 }
 0x2b7   : > { %2153 = vst [vmem:[%s4514_s28 + $0x170] sm:$0xff] %v2089_v46  ;;  %v2090_v49 = vadd.f32 %v1976_v47, %v616_v43  ;;  %v625_v43 = vld [vmem:[%s4514_s28 + $0x1c0] sm:$0xff] }
 0x2b9   : > { %2154 = vst [vmem:[%s4514_s28 + $0x178] sm:$0xff] %v2090_v49  ;;  %v1691_v50 = vpop.f32.mrb[96].mxu0  ;;  %v626_v49 = vld [vmem:[%s4514_s28 + $0x1c8] sm:$0xff] }
 0x2ba   : > { %v1980_v52 = vpop.f32.mrb[96].mxu1  ;;  %v1693_v53 = vpop.f32.mrb[97].mxu0 }
 0x2bb   : > { %v1981_v54 = vadd.f32 %v1980_v52, %v1691_v50  ;;  %v1982_v55 = vpop.f32.mrb[97].mxu1  ;;  %v1694_v56 = vpop.f32.mrb[98].mxu0 }
 0x2bc   : > { %v1983_v58 = vpop.f32.mrb[98].mxu1  ;;  %v1696_v59 = vpop.f32.mrb[99].mxu0 }
 0x2bd   : > { %v2091_v60 = vadd.f32 %v1981_v54, %v617_v51  ;;  %v1984_v61 = vadd.f32 %v1983_v58, %v1694_v56  ;;  %v1985_v62 = vpop.f32.mrb[99].mxu1 }
 0x2bf   : > { %2155 = vst [vmem:[%s4514_s28 + $0x180] sm:$0xff] %v2091_v60  ;;  %v2092_v63 = vadd.f32 %v1984_v61, %v618_v57  ;;  %v627_v57 = vld [vmem:[%s4514_s28 + $0x1d0] sm:$0xff] }
 0x2c1   : > { %2156 = vst [vmem:[%s4514_s28 + $0x188] sm:$0xff] %v2092_v63  ;;  %v1699_v0 = vpop.f32.mrb[100].mxu0  ;;  %v628_v63 = vld [vmem:[%s4514_s28 + $0x1d8] sm:$0xff] }
 0x2c2   : > { %v1988_v2 = vpop.f32.mrb[100].mxu1  ;;  %v1701_v3 = vpop.f32.mrb[101].mxu0 }
 0x2c3   : > { %v1989_v4 = vadd.f32 %v1988_v2, %v1699_v0  ;;  %v1990_v5 = vpop.f32.mrb[101].mxu1  ;;  %v1702_v6 = vpop.f32.mrb[102].mxu0 }
 0x2c4   : > { %v1991_v8 = vpop.f32.mrb[102].mxu1  ;;  %v1704_v9 = vpop.f32.mrb[103].mxu0 }
 0x2c5   : > { %v2093_v10 = vadd.f32 %v1989_v4, %v619_v1  ;;  %v1992_v11 = vadd.f32 %v1991_v8, %v1702_v6  ;;  %v1993_v12 = vpop.f32.mrb[103].mxu1 }
 0x2c7   : > { %2157 = vst [vmem:[%s4514_s28 + $0x190] sm:$0xff] %v2093_v10  ;;  %v2094_v13 = vadd.f32 %v1992_v11, %v620_v7  ;;  %v629_v7 = vld [vmem:[%s4514_s28 + $0x1e0] sm:$0xff] }
 0x2c9   : > { %2158 = vst [vmem:[%s4514_s28 + $0x198] sm:$0xff] %v2094_v13  ;;  %v1707_v14 = vpop.f32.mrb[104].mxu0  ;;  %v630_v13 = vld [vmem:[%s4514_s28 + $0x1e8] sm:$0xff] }
 0x2ca   : > { %v1996_v16 = vpop.f32.mrb[104].mxu1  ;;  %v1709_v17 = vpop.f32.mrb[105].mxu0 }
 0x2cb   : > { %v1997_v18 = vadd.f32 %v1996_v16, %v1707_v14  ;;  %v1998_v19 = vpop.f32.mrb[105].mxu1  ;;  %v1710_v20 = vpop.f32.mrb[106].mxu0 }
 0x2cc   : > { %v1999_v22 = vpop.f32.mrb[106].mxu1  ;;  %v1712_v23 = vpop.f32.mrb[107].mxu0 }
 0x2cd   : > { %v2095_v24 = vadd.f32 %v1997_v18, %v621_v15  ;;  %v2000_v25 = vadd.f32 %v1999_v22, %v1710_v20  ;;  %v2001_v26 = vpop.f32.mrb[107].mxu1 }
 0x2cf   : > { %2159 = vst [vmem:[%s4514_s28 + $0x1a0] sm:$0xff] %v2095_v24  ;;  %v2096_v27 = vadd.f32 %v2000_v25, %v622_v21  ;;  %v631_v21 = vld [vmem:[%s4514_s28 + $0x1f0] sm:$0xff] }
 0x2d1   : > { %2160 = vst [vmem:[%s4514_s28 + $0x1a8] sm:$0xff] %v2096_v27  ;;  %v1715_v28 = vpop.f32.mrb[108].mxu0  ;;  %v632_v27 = vld [vmem:[%s4514_s28 + $0x1f8] sm:$0xff] }
 0x2d2   : > { %v2004_v30 = vpop.f32.mrb[108].mxu1  ;;  %v1717_v31 = vpop.f32.mrb[109].mxu0 }
 0x2d3   : > { %v2005_v32 = vadd.f32 %v2004_v30, %v1715_v28  ;;  %v2006_v33 = vpop.f32.mrb[109].mxu1  ;;  %v1718_v34 = vpop.f32.mrb[110].mxu0 }
 0x2d4   : > { %v2007_v36 = vpop.f32.mrb[110].mxu1  ;;  %v1720_v37 = vpop.f32.mrb[111].mxu0 }
 0x2d5   : > { %v2097_v38 = vadd.f32 %v2005_v32, %v623_v29  ;;  %v2008_v39 = vadd.f32 %v2007_v36, %v1718_v34  ;;  %v2009_v40 = vpop.f32.mrb[111].mxu1 }
 0x2d7   : > { %2161 = vst [vmem:[%s4514_s28 + $0x1b0] sm:$0xff] %v2097_v38  ;;  %v2098_v41 = vadd.f32 %v2008_v39, %v624_v35 }
 0x2d9   : > { %2162 = vst [vmem:[%s4514_s28 + $0x1b8] sm:$0xff] %v2098_v41  ;;  %v1723_v42 = vpop.f32.mrb[112].mxu0 }
 0x2da   : > { %v2012_v44 = vpop.f32.mrb[112].mxu1  ;;  %v1725_v45 = vpop.f32.mrb[113].mxu0 }
 0x2db   : > { %v2013_v46 = vadd.f32 %v2012_v44, %v1723_v42  ;;  %v2014_v47 = vpop.f32.mrb[113].mxu1  ;;  %v1726_v48 = vpop.f32.mrb[114].mxu0 }
 0x2dc   : > { %v2015_v50 = vpop.f32.mrb[114].mxu1  ;;  %v1728_v51 = vpop.f32.mrb[115].mxu0 }
 0x2dd   : > { %v2099_v52 = vadd.f32 %v2013_v46, %v625_v43  ;;  %v2016_v53 = vadd.f32 %v2015_v50, %v1726_v48  ;;  %v2017_v54 = vpop.f32.mrb[115].mxu1 }
 0x2df   : > { %2163 = vst [vmem:[%s4514_s28 + $0x1c0] sm:$0xff] %v2099_v52  ;;  %v2100_v55 = vadd.f32 %v2016_v53, %v626_v49 }
 0x2e1   : > { %2164 = vst [vmem:[%s4514_s28 + $0x1c8] sm:$0xff] %v2100_v55  ;;  %v1731_v56 = vpop.f32.mrb[116].mxu0 }
 0x2e2   : > { %v2020_v58 = vpop.f32.mrb[116].mxu1  ;;  %v1733_v59 = vpop.f32.mrb[117].mxu0 }
 0x2e3   : > { %v2021_v60 = vadd.f32 %v2020_v58, %v1731_v56  ;;  %v2022_v61 = vpop.f32.mrb[117].mxu1  ;;  %v1734_v62 = vpop.f32.mrb[118].mxu0 }
 0x2e4   : > { %v2023_v0 = vpop.f32.mrb[118].mxu1  ;;  %v1736_v1 = vpop.f32.mrb[119].mxu0 }
 0x2e5   : > { %v2101_v2 = vadd.f32 %v2021_v60, %v627_v57  ;;  %v2024_v3 = vadd.f32 %v2023_v0, %v1734_v62  ;;  %v2025_v4 = vpop.f32.mrb[119].mxu1 }
 0x2e7   : > { %2165 = vst [vmem:[%s4514_s28 + $0x1d0] sm:$0xff] %v2101_v2  ;;  %v2102_v5 = vadd.f32 %v2024_v3, %v628_v63 }
 0x2e9   : > { %2166 = vst [vmem:[%s4514_s28 + $0x1d8] sm:$0xff] %v2102_v5  ;;  %v1739_v6 = vpop.f32.mrb[120].mxu0 }
 0x2ea   : > { %v2028_v8 = vpop.f32.mrb[120].mxu1  ;;  %v1741_v9 = vpop.f32.mrb[121].mxu0 }
 0x2eb   : > { %v2029_v10 = vadd.f32 %v2028_v8, %v1739_v6  ;;  %v2030_v11 = vpop.f32.mrb[121].mxu1  ;;  %v1742_v12 = vpop.f32.mrb[122].mxu0 }
 0x2ec   : > { %v2031_v14 = vpop.f32.mrb[122].mxu1  ;;  %v1744_v15 = vpop.f32.mrb[123].mxu0 }
 0x2ed   : > { %v2103_v16 = vadd.f32 %v2029_v10, %v629_v7  ;;  %v2032_v17 = vadd.f32 %v2031_v14, %v1742_v12  ;;  %v2033_v18 = vpop.f32.mrb[123].mxu1 }
 0x2ef   : > { %2167 = vst [vmem:[%s4514_s28 + $0x1e0] sm:$0xff] %v2103_v16  ;;  %v2104_v19 = vadd.f32 %v2032_v17, %v630_v13 }
 0x2f1   : > { %2168 = vst [vmem:[%s4514_s28 + $0x1e8] sm:$0xff] %v2104_v19  ;;  %v1747_v20 = vpop.f32.mrb[124].mxu0 }
 0x2f2   : > { %v2036_v22 = vpop.f32.mrb[124].mxu1  ;;  %v1749_v23 = vpop.f32.mrb[125].mxu0 }
 0x2f3   : > { %v2037_v24 = vadd.f32 %v2036_v22, %v1747_v20  ;;  %v2038_v25 = vpop.f32.mrb[125].mxu1  ;;  %v1750_v26 = vpop.f32.mrb[126].mxu0  ;;  %2174 = sbr.rel (%p3397_p7) target bundleno = 1078 (0x436), region = 60 }
 0x2f4   : > { %v2039_v28 = vpop.f32.mrb[126].mxu1  ;;  %v1752_v29 = vpop.f32.mrb[127].mxu0 }
 0x2f5   : > { %v2105_v30 = vadd.f32 %v2037_v24, %v631_v21  ;;  %v2040_v31 = vadd.f32 %v2039_v28, %v1750_v26  ;;  %v2041_v32 = vpop.f32.mrb[127].mxu1 }
 0x2f7   : > { %2169 = vst [vmem:[%s4514_s28 + $0x1f0] sm:$0xff] %v2105_v30  ;;  %v2106_v33 = vadd.f32 %v2040_v31, %v632_v27 }
 0x2f9   : > { %2170 = vst [vmem:[%s4514_s28 + $0x1f8] sm:$0xff] %v2106_v33 }
 0x2fa   : > { %v3913_v34 = vld [vmem:[#allocation8] sm:$0xff]   ;;  %v3914_v35 = vld [vmem:[#allocation8 + $0x8] sm:$0xff]   ;;  %v3915_v36 = vld [vmem:[#allocation8 + $0x10] sm:$0xff]  }
 0x2fb   : > { %3454 = vmatprep.subr.bf16.mxu0 %v3913_v34  ;;  %3534 = vmatprep.subr.bf16.mxu1 %v3913_v34  ;;  %v3916_v37 = vld [vmem:[#allocation8 + $0x18] sm:$0xff]   ;;  %v2175_v38 = vld [vmem:[%s4514_s28] sm:$0xff]  ;;  %v2176_v39 = vld [vmem:[%s4514_s28 + $0x8] sm:$0xff] }
 0x2fc   : > { %3455 = vmatpush3.bf16.msra.mxu0 %v3913_v34  ;;  %3542 = vmatpush3.bf16.msra.mxu1 %v3913_v34  ;;  %v2239_v40 = vld [vmem:[%s4504_s21] sm:$0xff]  ;;  %v2240_v41 = vld [vmem:[%s4504_s21 + $0x8] sm:$0xff]  ;;  %v3919_v54 = vld [vmem:[#allocation8 + $0x30] sm:$0xff]  }
 0x2fd   : > { %3456 = vmatprep.subr.bf16.mxu0 %v3914_v35  ;;  %3535 = vmatprep.subr.bf16.mxu1 %v3914_v35  ;;  %v4973_v42 = vadd.f32 %v2239_v40, %v2175_v38  ;;  %v2207_v43 = vld [vmem:[%s4514_s28 + $0x100] sm:$0xff]  ;;  %v2208_v44 = vld [vmem:[%s4514_s28 + $0x108] sm:$0xff]  ;;  %v4977_v45 = vadd.f32 %v2240_v41, %v2176_v39  ;;  %v2177_v55 = vld [vmem:[%s4514_s28 + $0x10] sm:$0xff] }
 0x2fe   : > { %v2271_v46 = vld [vmem:[%s4504_s21 + $0x100] sm:$0xff]  ;;  %v2272_v47 = vld [vmem:[%s4504_s21 + $0x108] sm:$0xff]  ;;  %v2241_v56 = vld [vmem:[%s4504_s21 + $0x10] sm:$0xff] }
 0x2ff   : > { %v4981_v48 = vadd.f32 %v2271_v46, %v2207_v43  ;;  %v4983_v49 = vadd.f32 %v2272_v47, %v2208_v44  ;;  %v3917_v50 = vld [vmem:[#allocation8 + $0x20] sm:$0xff]   ;;  %v2367_v51 = vpack.c.bf16 %v4977_v45, %v4973_v42  ;;  %v3918_v53 = vld [vmem:[#allocation8 + $0x28] sm:$0xff]   ;;  %v2178_v57 = vld [vmem:[%s4514_s28 + $0x18] sm:$0xff]  ;;  %v5005_v8 = vadd.f32 %v2241_v56, %v2177_v55 }
 0x300   : > { %3457 = vmatpush3.bf16.msra.mxu0 %v3914_v35  ;;  %3543 = vmatpush3.bf16.msra.mxu1 %v3914_v35  ;;  %v2242_v58 = vld [vmem:[%s4504_s21 + $0x18] sm:$0xff]  ;;  %v2209_v59 = vld [vmem:[%s4514_s28 + $0x110] sm:$0xff]  ;;  %v2179_v0 = vld [vmem:[%s4514_s28 + $0x20] sm:$0xff] }
 0x301   : > { %3458 = vmatprep.subr.bf16.mxu0 %v3915_v36  ;;  %3536 = vmatprep.subr.bf16.mxu1 %v3915_v36  ;;  %v2383_v52 = vpack.c.bf16 %v4983_v49, %v4981_v48  ;;  %v2210_v60 = vld [vmem:[%s4514_s28 + $0x118] sm:$0xff]  ;;  %v2273_v61 = vld [vmem:[%s4504_s21 + $0x110] sm:$0xff]  ;;  %v2180_v1 = vld [vmem:[%s4514_s28 + $0x28] sm:$0xff]  ;;  %v5007_v9 = vadd.f32 %v2242_v58, %v2178_v57 }
 0x302   : > { %3470 = vmatprep.mubr.bf16.mxu0 %v2367_v51  ;;  %v3920_v62 = vld [vmem:[#allocation8 + $0x38] sm:$0xff]   ;;  %v2243_v2 = vld [vmem:[%s4504_s21 + $0x20] sm:$0xff]  ;;  %v2244_v3 = vld [vmem:[%s4504_s21 + $0x28] sm:$0xff]  ;;  %v5009_v10 = vadd.f32 %v2273_v61, %v2209_v59 }
 0x303   : > { %3502 = vmatprep.mubr.bf16.mxu1 %v2383_v52  ;;  %v2274_v63 = vld [vmem:[%s4504_s21 + $0x118] sm:$0xff]  ;;  %v2211_v4 = vld [vmem:[%s4514_s28 + $0x120] sm:$0xff]  ;;  %v2212_v5 = vld [vmem:[%s4514_s28 + $0x128] sm:$0xff]  ;;  %v5013_v12 = vadd.f32 %v2243_v2, %v2179_v0  ;;  %v5015_v13 = vadd.f32 %v2244_v3, %v2180_v1  ;;  %v2368_v23 = vpack.c.bf16 %v5007_v9, %v5005_v8 }
 0x304   : > { %3459 = vmatpush3.bf16.msra.mxu0 %v3915_v36  ;;  %3544 = vmatpush3.bf16.msra.mxu1 %v3915_v36  ;;  %v2275_v6 = vld [vmem:[%s4504_s21 + $0x120] sm:$0xff]  ;;  %v2276_v7 = vld [vmem:[%s4504_s21 + $0x128] sm:$0xff]  ;;  %v5011_v11 = vadd.f32 %v2274_v63, %v2210_v60  ;;  %v2181_v16 = vld [vmem:[%s4514_s28 + $0x30] sm:$0xff] }
 0x305   : > { %3460 = vmatprep.subr.bf16.mxu0 %v3916_v37  ;;  %3537 = vmatprep.subr.bf16.mxu1 %v3916_v37  ;;  %v5017_v14 = vadd.f32 %v2275_v6, %v2211_v4  ;;  %v5019_v15 = vadd.f32 %v2276_v7, %v2212_v5  ;;  %v2182_v17 = vld [vmem:[%s4514_s28 + $0x38] sm:$0xff]  ;;  %v2245_v18 = vld [vmem:[%s4504_s21 + $0x30] sm:$0xff]  ;;  %v2183_v26 = vld [vmem:[%s4514_s28 + $0x40] sm:$0xff]  ;;  %v2369_v28 = vpack.c.bf16 %v5015_v13, %v5013_v12 }
 0x306   : > { %v2246_v19 = vld [vmem:[%s4504_s21 + $0x38] sm:$0xff]  ;;  %v2213_v20 = vld [vmem:[%s4514_s28 + $0x130] sm:$0xff]  ;;  %v2384_v24 = vpack.c.bf16 %v5011_v11, %v5009_v10  ;;  %v2184_v27 = vld [vmem:[%s4514_s28 + $0x48] sm:$0xff]  ;;  %v5045_v36 = vadd.f32 %v2245_v18, %v2181_v16 }
 0x307   : > { %v2214_v21 = vld [vmem:[%s4514_s28 + $0x138] sm:$0xff]  ;;  %v2277_v22 = vld [vmem:[%s4504_s21 + $0x130] sm:$0xff]  ;;  %v2385_v29 = vpack.c.bf16 %v5019_v15, %v5017_v14  ;;  %v2247_v30 = vld [vmem:[%s4504_s21 + $0x40] sm:$0xff] }
 0x308   : > { %3461 = vmatpush3.bf16.msra.mxu0 %v3916_v37  ;;  %3545 = vmatpush3.bf16.msra.mxu1 %v3916_v37  ;;  %v2278_v25 = vld [vmem:[%s4504_s21 + $0x138] sm:$0xff]  ;;  %v2248_v31 = vld [vmem:[%s4504_s21 + $0x48] sm:$0xff]  ;;  %v2215_v32 = vld [vmem:[%s4514_s28 + $0x140] sm:$0xff]  ;;  %v5047_v37 = vadd.f32 %v2246_v19, %v2182_v17  ;;  %v5049_v38 = vadd.f32 %v2277_v22, %v2213_v20  ;;  %v5053_v40 = vadd.f32 %v2247_v30, %v2183_v26 }
 0x309   : > { %3462 = vmatprep.subr.bf16.mxu0 %v3917_v50  ;;  %3538 = vmatprep.subr.bf16.mxu1 %v3917_v50  ;;  %v2216_v33 = vld [vmem:[%s4514_s28 + $0x148] sm:$0xff]  ;;  %v2279_v34 = vld [vmem:[%s4504_s21 + $0x140] sm:$0xff]  ;;  %v5051_v39 = vadd.f32 %v2278_v25, %v2214_v21  ;;  %v5055_v41 = vadd.f32 %v2248_v31, %v2184_v27  ;;  %v2185_v46 = vld [vmem:[%s4514_s28 + $0x50] sm:$0xff] }
 0x30a   : > { %v2280_v35 = vld [vmem:[%s4504_s21 + $0x148] sm:$0xff]  ;;  %v5057_v43 = vadd.f32 %v2279_v34, %v2215_v32  ;;  %v2186_v47 = vld [vmem:[%s4514_s28 + $0x58] sm:$0xff]  ;;  %v2217_v52 = vld [vmem:[%s4514_s28 + $0x150] sm:$0xff]  ;;  %v2370_v55 = vpack.c.bf16 %v5047_v37, %v5045_v36 }
 0x30b   : > { %v5059_v44 = vadd.f32 %v2280_v35, %v2216_v33  ;;  %v2250_v51 = vld [vmem:[%s4504_s21 + $0x58] sm:$0xff]  ;;  %v2386_v56 = vpack.c.bf16 %v5051_v39, %v5049_v38  ;;  %v2187_v58 = vld [vmem:[%s4514_s28 + $0x60] sm:$0xff]  ;;  %v2188_v59 = vld [vmem:[%s4514_s28 + $0x68] sm:$0xff]  ;;  %v2371_v60 = vpack.c.bf16 %v5055_v41, %v5053_v40 }
 0x30c   : > { %3463 = vmatpush3.bf16.msra.mxu0 %v3917_v50  ;;  %3546 = vmatpush3.bf16.msra.mxu1 %v3917_v50  ;;  %v2249_v50 = vld [vmem:[%s4504_s21 + $0x50] sm:$0xff]  ;;  %v2282_v57 = vld [vmem:[%s4504_s21 + $0x158] sm:$0xff]  ;;  %v2252_v63 = vld [vmem:[%s4504_s21 + $0x68] sm:$0xff]  ;;  %v5087_v5 = vadd.f32 %v2250_v51, %v2186_v47 }
 0x30d   : > { %3464 = vmatprep.subr.bf16.mxu0 %v3918_v53  ;;  %3539 = vmatprep.subr.bf16.mxu1 %v3918_v53  ;;  %v2387_v61 = vpack.c.bf16 %v5059_v44, %v5057_v43  ;;  %v2219_v0 = vld [vmem:[%s4514_s28 + $0x160] sm:$0xff]  ;;  %v2220_v1 = vld [vmem:[%s4514_s28 + $0x168] sm:$0xff]  ;;  %v5085_v4 = vadd.f32 %v2249_v50, %v2185_v46  ;;  %v5095_v17 = vadd.f32 %v2252_v63, %v2188_v59  ;;  %v2189_v20 = vld [vmem:[%s4514_s28 + $0x70] sm:$0xff] }
 0x30e   : > { %v2283_v2 = vld [vmem:[%s4504_s21 + $0x160] sm:$0xff]  ;;  %v2284_v3 = vld [vmem:[%s4504_s21 + $0x168] sm:$0xff]  ;;  %v2190_v21 = vld [vmem:[%s4514_s28 + $0x78] sm:$0xff] }
 0x30f   : > { %v5097_v18 = vadd.f32 %v2283_v2, %v2219_v0  ;;  %v5099_v19 = vadd.f32 %v2284_v3, %v2220_v1  ;;  %v2253_v22 = vld [vmem:[%s4504_s21 + $0x70] sm:$0xff]  ;;  %v2222_v25 = vld [vmem:[%s4514_s28 + $0x178] sm:$0xff]  ;;  %v2372_v27 = vpack.c.bf16 %v5087_v5, %v5085_v4  ;;  %v2191_v30 = vld [vmem:[%s4514_s28 + $0x80] sm:$0xff] }
 0x310   : > { %3465 = vmatpush3.bf16.msra.mxu0 %v3918_v53  ;;  %3547 = vmatpush3.bf16.msra.mxu1 %v3918_v53  ;;  %v2218_v53 = vld [vmem:[%s4514_s28 + $0x158] sm:$0xff]  ;;  %v2285_v26 = vld [vmem:[%s4504_s21 + $0x170] sm:$0xff]  ;;  %v2192_v31 = vld [vmem:[%s4514_s28 + $0x88] sm:$0xff] }
 0x311   : > { %3466 = vmatprep.subr.bf16.mxu0 %v3919_v54  ;;  %3540 = vmatprep.subr.bf16.mxu1 %v3919_v54  ;;  %v5091_v7 = vadd.f32 %v2282_v57, %v2218_v53  ;;  %v2389_v33 = vpack.c.bf16 %v5099_v19, %v5097_v18  ;;  %v2255_v34 = vld [vmem:[%s4504_s21 + $0x80] sm:$0xff]  ;;  %v2256_v35 = vld [vmem:[%s4504_s21 + $0x88] sm:$0xff]  ;;  %v2258_v63 = vld [vmem:[%s4504_s21 + $0x98] sm:$0xff] }
 0x312   : > { %v2223_v46 = vld [vmem:[%s4514_s28 + $0x180] sm:$0xff]  ;;  %v2224_v47 = vld [vmem:[%s4514_s28 + $0x188] sm:$0xff]  ;;  %v5135_v57 = vadd.f32 %v2256_v35, %v2192_v31  ;;  %v2225_v0 = vld [vmem:[%s4514_s28 + $0x190] sm:$0xff] }
 0x313   : > { %v2287_v50 = vld [vmem:[%s4504_s21 + $0x180] sm:$0xff]  ;;  %v2288_v51 = vld [vmem:[%s4504_s21 + $0x188] sm:$0xff]  ;;  %v2226_v1 = vld [vmem:[%s4514_s28 + $0x198] sm:$0xff] }
 0x314   : > { %3467 = vmatpush3.bf16.msra.mxu0 %v3919_v54  ;;  %3548 = vmatpush3.bf16.msra.mxu1 %v3919_v54  ;;  %v2281_v54 = vld [vmem:[%s4504_s21 + $0x150] sm:$0xff]  ;;  %5740 = vst [vmem:[#allocation23_spill] sm:$0xff] %v5135_v57  ;;  %v5139_v59 = vadd.f32 %v2288_v51, %v2224_v47  ;;  %v2292_v31 = vld [vmem:[%s4504_s21 + $0x1a8] sm:$0xff] }
 0x315   : > { %3468 = vmatprep.subr.bf16.mxu0 %v3920_v62  ;;  %3541 = vmatprep.subr.bf16.mxu1 %v3920_v62  ;;  %v5089_v6 = vadd.f32 %v2281_v54, %v2217_v52  ;;  %v5125_v52 = vadd.f32 %v2253_v22, %v2189_v20  ;;  %v2289_v2 = vld [vmem:[%s4504_s21 + $0x190] sm:$0xff]  ;;  %v2195_v22 = vld [vmem:[%s4514_s28 + $0xa0] sm:$0xff] }
 0x316   : > { %5741 = vst [vmem:[#allocation24_spill] sm:$0xff] %v5139_v59 }
 0x318   : > { %3469 = vmatpush3.bf16.msra.mxu0 %v3920_v62  ;;  %3549 = vmatpush3.bf16.msra.mxu1 %v3920_v62  ;;  %v2251_v62 = vld [vmem:[%s4504_s21 + $0x60] sm:$0xff] }
 0x319   : > { %v5093_v16 = vadd.f32 %v2251_v62, %v2187_v58  ;;  %v5137_v58 = vadd.f32 %v2287_v50, %v2223_v46  ;;  %v2257_v62 = vld [vmem:[%s4504_s21 + $0x90] sm:$0xff] }
 0x31b   : > { %3471 = vmatmul.mubr.bf16.vlgmr.msra.gmra.mrb[0].mxu0 %v2368_v23  ;;  %3503 = vmatmul.mubr.bf16.vlgmr.msra.gmra.mrb[0].mxu1 %v2384_v24  ;;  %v2254_v23 = vld [vmem:[%s4504_s21 + $0x78] sm:$0xff]  ;;  %v2221_v24 = vld [vmem:[%s4514_s28 + $0x170] sm:$0xff]  ;;  %v2373_v32 = vpack.c.bf16 %v5095_v17, %v5093_v16 }
 0x31c   : > { %3474 = vmatprep.mubr.bf16.mxu0 %v2369_v28  ;;  %3506 = vmatprep.mubr.bf16.mxu1 %v2385_v29  ;;  %v2388_v28 = vpack.c.bf16 %v5091_v7, %v5089_v6  ;;  %v2286_v29 = vld [vmem:[%s4504_s21 + $0x178] sm:$0xff]  ;;  %v5127_v53 = vadd.f32 %v2254_v23, %v2190_v21  ;;  %v5129_v54 = vadd.f32 %v2285_v26, %v2221_v24  ;;  %v2196_v23 = vld [vmem:[%s4514_s28 + $0xa8] sm:$0xff]  ;;  %v2259_v26 = vld [vmem:[%s4504_s21 + $0xa0] sm:$0xff] }
 0x31d   : > { %v2290_v21 = vld [vmem:[%s4504_s21 + $0x198] sm:$0xff]  ;;  %v5173_v46 = vadd.f32 %v2259_v26, %v2195_v22  ;;  %v2199_v22 = vld [vmem:[%s4514_s28 + $0xc0] sm:$0xff] }
 0x31e   : > { %v2374_v3 = vpack.c.bf16 %v5127_v53, %v5125_v52  ;;  %v5171_v35 = vadd.f32 %v2290_v21, %v2226_v1  ;;  %v2230_v1 = vld [vmem:[%s4514_s28 + $0x1b8] sm:$0xff]  ;;  %v2263_v26 = vld [vmem:[%s4504_s21 + $0xc0] sm:$0xff] }
 0x31f   : > { %5743 = vst [vmem:[#allocation26_spill] sm:$0xff] %v5173_v46  ;;  %v2294_v21 = vld [vmem:[%s4504_s21 + $0x1b8] sm:$0xff] }
 0x320   : > { %5742 = vst [vmem:[#allocation25_spill] sm:$0xff] %v5171_v35 }
 0x323   : > { %3475 = vmatmul.mubr.bf16.gmra.mrb[4].mxu0 %v2370_v55  ;;  %3507 = vmatmul.mubr.bf16.gmra.mrb[4].mxu1 %v2386_v56  ;;  %v5131_v55 = vadd.f32 %v2286_v29, %v2222_v25  ;;  %v5133_v56 = vadd.f32 %v2255_v34, %v2191_v30  ;;  %v2391_v25 = vpack.c.bf16 %v5139_v59, %v5137_v58  ;;  %v2228_v29 = vld [vmem:[%s4514_s28 + $0x1a8] sm:$0xff]  ;;  %v2291_v30 = vld [vmem:[%s4504_s21 + $0x1a0] sm:$0xff] }
 0x324   : > { %3478 = vmatprep.mubr.bf16.mxu0 %v2371_v60  ;;  %3510 = vmatprep.mubr.bf16.mxu1 %v2387_v61  ;;  %v2193_v60 = vld [vmem:[%s4514_s28 + $0x90] sm:$0xff]  ;;  %v2194_v61 = vld [vmem:[%s4514_s28 + $0x98] sm:$0xff]  ;;  %v5169_v34 = vadd.f32 %v2289_v2, %v2225_v0  ;;  %v5179_v51 = vadd.f32 %v2292_v31, %v2228_v29  ;;  %v2232_v29 = vld [vmem:[%s4514_s28 + $0x1c8] sm:$0xff] }
 0x325   : > { %v2390_v20 = vpack.c.bf16 %v5131_v55, %v5129_v54  ;;  %v2375_v24 = vpack.c.bf16 %v5135_v57, %v5133_v56  ;;  %v2229_v0 = vld [vmem:[%s4514_s28 + $0x1b0] sm:$0xff]  ;;  %v2296_v31 = vld [vmem:[%s4504_s21 + $0x1c8] sm:$0xff] }
 0x326   : > { %5746 = vst [vmem:[#allocation29_spill] sm:$0xff] %v5179_v51  ;;  %v2293_v2 = vld [vmem:[%s4504_s21 + $0x1b0] sm:$0xff] }
 0x32b   : > { %3479 = vmatmul.mubr.bf16.gmra.mrb[8].mxu0 %v2372_v27  ;;  %3511 = vmatmul.mubr.bf16.gmra.mrb[8].mxu1 %v2388_v28  ;;  %v2260_v27 = vld [vmem:[%s4504_s21 + $0xa8] sm:$0xff]  ;;  %v2227_v28 = vld [vmem:[%s4514_s28 + $0x1a0] sm:$0xff] }
 0x32c   : > { %3482 = vmatprep.mubr.bf16.mxu0 %v2373_v32  ;;  %3514 = vmatprep.mubr.bf16.mxu1 %v2389_v33  ;;  %v5165_v32 = vadd.f32 %v2257_v62, %v2193_v60  ;;  %v5167_v33 = vadd.f32 %v2258_v63, %v2194_v61  ;;  %v5175_v47 = vadd.f32 %v2260_v27, %v2196_v23  ;;  %v2197_v60 = vld [vmem:[%s4514_s28 + $0xb0] sm:$0xff]  ;;  %v2198_v61 = vld [vmem:[%s4514_s28 + $0xb8] sm:$0xff]  ;;  %v2200_v23 = vld [vmem:[%s4514_s28 + $0xc8] sm:$0xff] }
 0x32d   : > { %v5177_v50 = vadd.f32 %v2291_v30, %v2227_v28  ;;  %v2261_v62 = vld [vmem:[%s4504_s21 + $0xb0] sm:$0xff]  ;;  %v2262_v63 = vld [vmem:[%s4504_s21 + $0xb8] sm:$0xff]  ;;  %v2264_v27 = vld [vmem:[%s4504_s21 + $0xc8] sm:$0xff] }
 0x32e   : > { %5744 = vst [vmem:[#allocation27_spill] sm:$0xff] %v5175_v47  ;;  %v2231_v28 = vld [vmem:[%s4514_s28 + $0x1c0] sm:$0xff]  ;;  %v5205_v59 = vadd.f32 %v2261_v62, %v2197_v60  ;;  %v5207_v57 = vadd.f32 %v2262_v63, %v2198_v61  ;;  %v5215_v60 = vadd.f32 %v2264_v27, %v2200_v23  ;;  %v5219_v61 = vadd.f32 %v2296_v31, %v2232_v29  ;;  %v2201_v63 = vld [vmem:[%s4514_s28 + $0xd0] sm:$0xff] }
 0x32f   : > { %5745 = vst [vmem:[#allocation28_spill] sm:$0xff] %v5177_v50  ;;  %v2295_v30 = vld [vmem:[%s4504_s21 + $0x1c0] sm:$0xff] }
 0x330   : > { %5747 = vst [vmem:[#allocation30_spill] sm:$0xff] %v5205_v59  ;;  %5748 = vst [vmem:[#allocation31_spill] sm:$0xff] %v5207_v57  ;;  %v5217_v62 = vadd.f32 %v2295_v30, %v2231_v28  ;;  %v2267_v29 = vld [vmem:[%s4504_s21 + $0xe0] sm:$0xff]  ;;  %v2268_v30 = vld [vmem:[%s4504_s21 + $0xe8] sm:$0xff] }
 0x331   : > { %5750 = vst [vmem:[#allocation33_spill] sm:$0xff] %v5215_v60  ;;  %5752 = vst [vmem:[#allocation35_spill] sm:$0xff] %v5219_v61  ;;  %v2235_v31 = vld [vmem:[%s4514_s28 + $0x1e0] sm:$0xff] }
 0x332   : > { %5751 = vst [vmem:[#allocation34_spill] sm:$0xff] %v5217_v62  ;;  %v2395_v28 = vpack.c.bf16 %v5219_v61, %v5217_v62 }
 0x333   : > { %3483 = vmatmul.mubr.bf16.gmra.mrb[12].mxu0 %v2374_v3  ;;  %3515 = vmatmul.mubr.bf16.gmra.mrb[12].mxu1 %v2390_v20  ;;  %v2376_v3 = vpack.c.bf16 %v5167_v33, %v5165_v32  ;;  %v2392_v20 = vpack.c.bf16 %v5171_v35, %v5169_v34  ;;  %v2299_v35 = vld [vmem:[%s4504_s21 + $0x1e0] sm:$0xff] }
 0x334   : > { %3486 = vmatprep.mubr.bf16.mxu0 %v2375_v24  ;;  %3518 = vmatprep.mubr.bf16.mxu1 %v2391_v25  ;;  %v2377_v24 = vpack.c.bf16 %v5175_v47, %v5173_v46  ;;  %v2393_v25 = vpack.c.bf16 %v5179_v51, %v5177_v50  ;;  %v5209_v51 = vadd.f32 %v2293_v2, %v2229_v0  ;;  %v2202_v0 = vld [vmem:[%s4514_s28 + $0xd8] sm:$0xff]  ;;  %v2236_v46 = vld [vmem:[%s4514_s28 + $0x1e8] sm:$0xff] }
 0x335   : > { %v5211_v47 = vadd.f32 %v2294_v21, %v2230_v1  ;;  %v5213_v50 = vadd.f32 %v2263_v26, %v2199_v22  ;;  %v2265_v1 = vld [vmem:[%s4504_s21 + $0xd0] sm:$0xff]  ;;  %v2266_v2 = vld [vmem:[%s4504_s21 + $0xd8] sm:$0xff]  ;;  %v2378_v22 = vpack.c.bf16 %v5207_v57, %v5205_v59  ;;  %v2204_v26 = vld [vmem:[%s4514_s28 + $0xe8] sm:$0xff] }
 0x336   : > { %v2297_v21 = vld [vmem:[%s4504_s21 + $0x1d0] sm:$0xff]  ;;  %v2300_v57 = vld [vmem:[%s4504_s21 + $0x1e8] sm:$0xff]  ;;  %v5245_v59 = vadd.f32 %v2265_v1, %v2201_v63  ;;  %v5255_v63 = vadd.f32 %v2268_v30, %v2204_v26  ;;  %v5257_v1 = vadd.f32 %v2299_v35, %v2235_v31  ;;  %v2238_v26 = vld [vmem:[%s4514_s28 + $0x1f8] sm:$0xff] }
 0x337   : > { %5749 = vst [vmem:[#allocation32_spill] sm:$0xff] %v5211_v47  ;;  %v2394_v23 = vpack.c.bf16 %v5211_v47, %v5209_v51  ;;  %v2379_v27 = vpack.c.bf16 %v5215_v60, %v5213_v50  ;;  %v5247_v47 = vadd.f32 %v2266_v2, %v2202_v0  ;;  %v5259_v0 = vadd.f32 %v2300_v57, %v2236_v46  ;;  %v2205_v2 = vld [vmem:[%s4514_s28 + $0xf0] sm:$0xff]  ;;  %v2302_v46 = vld [vmem:[%s4504_s21 + $0x1f8] sm:$0xff] }
 0x338   : > { %5754 = vst [vmem:[#allocation37_spill] sm:$0xff] %v5255_v63  ;;  %5755 = vst [vmem:[#allocation38_spill] sm:$0xff] %v5257_v1  ;;  %v2301_v57 = vld [vmem:[%s4504_s21 + $0x1f0] sm:$0xff]  ;;  %v5283_v30 = vadd.f32 %v2302_v46, %v2238_v26  ;;  %v5770_v46 = vld [vmem:[#allocation26_spill] sm:$0xff] }
 0x339   : > { %5756 = vst [vmem:[#allocation39_spill] sm:$0xff] %v5259_v0  ;;  %v2397_v35 = vpack.c.bf16 %v5259_v0, %v5257_v1 }
 0x33a   : > { %5760 = vst [vmem:[#allocation43_spill] sm:$0xff] %v5283_v30 }
 0x33b   : > { %3487 = vmatmul.mubr.bf16.gmra.mrb[16].mxu0 %v2376_v3  ;;  %3519 = vmatmul.mubr.bf16.gmra.mrb[16].mxu1 %v2392_v20  ;;  %v2233_v3 = vld [vmem:[%s4514_s28 + $0x1d0] sm:$0xff]  ;;  %v2234_v20 = vld [vmem:[%s4514_s28 + $0x1d8] sm:$0xff] }
 0x33c   : > { %3490 = vmatprep.mubr.bf16.mxu0 %v2377_v24  ;;  %3522 = vmatprep.mubr.bf16.mxu1 %v2393_v25  ;;  %v2298_v24 = vld [vmem:[%s4504_s21 + $0x1d8] sm:$0xff]  ;;  %v2203_v25 = vld [vmem:[%s4514_s28 + $0xe0] sm:$0xff]  ;;  %v5249_v60 = vadd.f32 %v2297_v21, %v2233_v3  ;;  %v2380_v3 = vpack.c.bf16 %v5247_v47, %v5245_v59  ;;  %v2269_v21 = vld [vmem:[%s4504_s21 + $0xf0] sm:$0xff] }
 0x33d   : > { %v5251_v61 = vadd.f32 %v2298_v24, %v2234_v20  ;;  %v5253_v62 = vadd.f32 %v2267_v29, %v2203_v25  ;;  %v2237_v24 = vld [vmem:[%s4514_s28 + $0x1f0] sm:$0xff] }
 0x33e   : > { %v5281_v29 = vadd.f32 %v2301_v57, %v2237_v24  ;;  %v2819_v24 = vmul.f32 0.5945349, %v5007_v9  ;;  %v5320_v9 = vmul.f32 0.5945349, %v5015_v13  ;;  %v5341_v13 = vmul.f32 0.5945349, %v5091_v7 }
 0x33f   : > { %5753 = vst [vmem:[#allocation36_spill] sm:$0xff] %v5253_v62  ;;  %v2396_v20 = vpack.c.bf16 %v5251_v61, %v5249_v60  ;;  %v2381_v25 = vpack.c.bf16 %v5255_v63, %v5253_v62  ;;  %v5374_v7 = vmul.f32 0.5945349, %v5165_v32  ;;  %v5765_v32 = vld [vmem:[#allocation24_spill] sm:$0xff] }
 0x340   : > { %5759 = vst [vmem:[#allocation42_spill] sm:$0xff] %v5281_v29  ;;  %v2398_v0 = vpack.c.bf16 %v5283_v30, %v5281_v29 }
 0x343   : > { %3491 = vmatmul.mubr.bf16.gmra.mrb[20].mxu0 %v2378_v22  ;;  %3523 = vmatmul.mubr.bf16.gmra.mrb[20].mxu1 %v2394_v23  ;;  %v2206_v22 = vld [vmem:[%s4514_s28 + $0xf8] sm:$0xff] }
 0x344   : > { %3494 = vmatprep.mubr.bf16.mxu0 %v2379_v27  ;;  %3526 = vmatprep.mubr.bf16.mxu1 %v2395_v28  ;;  %v2270_v23 = vld [vmem:[%s4504_s21 + $0xf8] sm:$0xff]  ;;  %v5277_v27 = vadd.f32 %v2269_v21, %v2205_v2  ;;  %v2816_v2 = vmul.f32 0.5945349, %v4973_v42  ;;  %v2818_v21 = vmul.f32 0.5945349, %v5005_v8 }
 0x345   : > { %v5279_v28 = vadd.f32 %v2270_v23, %v2206_v22  ;;  %v2848_v22 = vmul.f32 0.5945349, %v4981_v48  ;;  %v2850_v23 = vmul.f32 0.5945349, %v5009_v10  ;;  %v5305_v42 = vmul.f32 0.5945349, %v5049_v38 }
 0x346   : > { %5757 = vst [vmem:[#allocation40_spill] sm:$0xff] %v5277_v27  ;;  %v5311_v48 = vmul.f32 0.5945349, %v5017_v14  ;;  %v5317_v8 = vmul.f32 0.5945349, %v5051_v39 }
 0x347   : > { %5758 = vst [vmem:[#allocation41_spill] sm:$0xff] %v5279_v28  ;;  %v2382_v31 = vpack.c.bf16 %v5279_v28, %v5277_v27  ;;  %v5323_v10 = vmul.f32 0.5945349, %v5019_v15  ;;  %v5332_v14 = vmul.f32 0.5945349, %v5053_v40 }
 0x348   : > { %v5344_v15 = vmul.f32 0.5945349, %v5055_v41  ;;  %v5347_v38 = vmul.f32 0.5945349, %v5059_v44  ;;  %v5350_v39 = vmul.f32 0.5945349, %v5125_v52 }
 0x349   : > { %v5353_v40 = vmul.f32 0.5945349, %v5129_v54  ;;  %v5365_v41 = vmul.f32 0.5945349, %v5131_v55  ;;  %v5368_v44 = vmul.f32 0.5945349, %v5095_v17 }
 0x34a   : > { %v5383_v52 = vmul.f32 0.5945349, %v5137_v58  ;;  %v5761_v17 = vld [vmem:[#allocation25_spill] sm:$0xff]  ;;  %v5401_v58 = vmul.f32 0.5945349, %v5209_v51 }
 0x34b   : > { %3495 = vmatmul.mubr.bf16.gmra.mrb[24].mxu0 %v2380_v3  ;;  %3527 = vmatmul.mubr.bf16.gmra.mrb[24].mxu1 %v2396_v20  ;;  %v5291_v3 = vmul.f32 0.5945349, %v4977_v45  ;;  %v5295_v20 = vmul.f32 0.5945349, %v4983_v49  ;;  %v5308_v45 = vmul.f32 0.5945349, %v5013_v12 }
 0x34c   : > { %3498 = vmatprep.mubr.bf16.mxu0 %v2381_v25  ;;  %3530 = vmatprep.mubr.bf16.mxu1 %v2397_v35  ;;  %v2851_v25 = vmul.f32 0.5945349, %v5011_v11  ;;  %v5314_v49 = vmul.f32 0.5945349, %v5047_v37  ;;  %v5326_v11 = vmul.f32 0.5945349, %v5085_v4 }
 0x34d   : > { %v5329_v12 = vmul.f32 0.5945349, %v5089_v6  ;;  %v5338_v37 = vmul.f32 0.5945349, %v5087_v5  ;;  %v5359_v4 = vmul.f32 0.5945349, %v5097_v18 }
 0x34e   : > { %v5362_v5 = vmul.f32 0.5945349, %v5127_v53  ;;  %v5371_v6 = vmul.f32 0.5945349, %v5099_v19  ;;  %v5380_v18 = vmul.f32 0.5945349, %v5133_v56 }
 0x34f   : > { %v5386_v53 = vmul.f32 0.5945349, %v5167_v33  ;;  %v5389_v54 = vmul.f32 0.5945349, %v5761_v17  ;;  %v5763_v19 = vld [vmem:[#allocation23_spill] sm:$0xff]  ;;  %5769 = vst [vmem:[#allocation44_spill] sm:$0xff] %v5401_v58 }
 0x350   : > { %v5392_v55 = vmul.f32 0.5945349, %v5763_v19  ;;  %v5395_v35 = vmul.f32 0.5945349, %v5765_v32  ;;  %v5404_v33 = vmul.f32 0.5945349, %v5770_v46 }
 0x351   : > { %5762 = vst [vmem:[#allocation25_spill] sm:$0xff] %v5389_v54 }
 0x352   : > { %5764 = vst [vmem:[#allocation23_spill] sm:$0xff] %v5392_v55  ;;  %5766 = vst [vmem:[#allocation24_spill] sm:$0xff] %v5395_v35 }
 0x353   : > { %3499 = vmatmul.mubr.bf16.gmra.mrb[28].mxu0 %v2382_v31  ;;  %3531 = vmatmul.mubr.bf16.gmra.mrb[28].mxu1 %v2398_v0  ;;  %v5302_v0 = vmul.f32 0.5945349, %v5045_v36  ;;  %v5335_v36 = vmul.f32 0.5945349, %v5057_v43  ;;  %v5356_v43 = vmul.f32 0.5945349, %v5093_v16 }
 0x354   : > { %v5377_v16 = vmul.f32 0.5945349, %v5169_v34  ;;  %v5767_v34 = vld [vmem:[#allocation30_spill] sm:$0xff]  ;;  %5771 = vst [vmem:[#allocation26_spill] sm:$0xff] %v5404_v33 }
 0x355   : > { %v5398_v26 = vmul.f32 0.5945349, %v5767_v34 }
 0x357   : > { %5768 = vst [vmem:[#allocation30_spill] sm:$0xff] %v5398_v26 }
 0x3ee   : > { %v3472_v56 = vpop.f32.mrb[0].mxu0  ;;  %v3504_v57 = vpop.f32.mrb[0].mxu1 }
 0x3ef   : > { %v2754_v31 = vmul.f32 0.4054651, %v3472_v56  ;;  %v2786_v17 = vmul.f32 0.4054651, %v3504_v57  ;;  %v2497_v63 = vpop.f32.mrb[1].mxu0  ;;  %v2625_v30 = vpop.f32.mrb[1].mxu1 }
 0x3f0   : > { %v2752_v19 = vmul.f32 0.4054651, %v2497_v63  ;;  %v2784_v28 = vmul.f32 0.4054651, %v2625_v30  ;;  %v3473_v1 = vpop.f32.mrb[2].mxu0  ;;  %v3505_v32 = vpop.f32.mrb[2].mxu1 }
 0x3f1   : > { %v2882_v62 = vadd.f32 %v2818_v21, %v2754_v31  ;;  %v2914_v29 = vadd.f32 %v2850_v23, %v2786_v17  ;;  %v2755_v34 = vmul.f32 0.4054651, %v3473_v1  ;;  %v2787_v26 = vmul.f32 0.4054651, %v3505_v32  ;;  %v2500_v27 = vpop.f32.mrb[3].mxu0  ;;  %v2628_v51 = vpop.f32.mrb[3].mxu1 }
 0x3f2   : > { %v2880_v58 = vadd.f32 %v2816_v2, %v2752_v19  ;;  %v2912_v35 = vadd.f32 %v2848_v22, %v2784_v28  ;;  %v2753_v46 = vmul.f32 0.4054651, %v2500_v27  ;;  %v2785_v56 = vmul.f32 0.4054651, %v2628_v51  ;;  %v5772_v27 = vld [vmem:[#allocation28_spill] sm:$0xff] }
 0x3f3   : > { %v2946_v57 = vmax.f32 %v2882_v62, 0.0  ;;  %v2978_v33 = vmax.f32 %v2914_v29, 0.0  ;;  %v2883_v63 = vadd.f32 %v2819_v24, %v2755_v34  ;;  %v2915_v30 = vadd.f32 %v2851_v25, %v2787_v26  ;;  %v5773_v62 = vld [vmem:[#allocation31_spill] sm:$0xff] }
 0x3f4   : > { %v2944_v55 = vmax.f32 %v2880_v58, 0.0  ;;  %v2976_v54 = vmax.f32 %v2912_v35, 0.0  ;;  %v2881_v1 = vadd.f32 %v5291_v3, %v2753_v46  ;;  %v2913_v21 = vadd.f32 %v5295_v20, %v2785_v56  ;;  %v5774_v35 = vld [vmem:[#allocation32_spill] sm:$0xff] }
 0x3f5   : > { %3010 = vst [vmem:[%s4514_s28 + $0x10] sm:$0xff] %v2946_v57  ;;  %3042 = vst [vmem:[%s4514_s28 + $0x110] sm:$0xff] %v2978_v33  ;;  %v2947_v2 = vmax.f32 %v2883_v63, 0.0  ;;  %v2979_v28 = vmax.f32 %v2915_v30, 0.0  ;;  %v5411_v22 = vmul.f32 0.5945349, %v5772_v27 }
 0x3f6   : > { %v5414_v29 = vmul.f32 0.5945349, %v5773_v62  ;;  %3008 = vst [vmem:[%s4514_s28] sm:$0xff] %v2944_v55  ;;  %3040 = vst [vmem:[%s4514_s28 + $0x100] sm:$0xff] %v2976_v54  ;;  %v2945_v23 = vmax.f32 %v2881_v1, 0.0  ;;  %v2977_v24 = vmax.f32 %v2913_v21, 0.0  ;;  %v3476_v3 = vpop.f32.mrb[4].mxu0 }
 0x3f7   : > { %v3508_v25 = vpop.f32.mrb[4].mxu1  ;;  %v5419_v20 = vmul.f32 0.5945349, %v5774_v35  ;;  %3011 = vst [vmem:[%s4514_s28 + $0x18] sm:$0xff] %v2947_v2  ;;  %3043 = vst [vmem:[%s4514_s28 + $0x118] sm:$0xff] %v2979_v28  ;;  %v2513_v33 = vpop.f32.mrb[5].mxu0 }
 0x3f8   : > { %v2758_v26 = vmul.f32 0.4054651, %v3476_v3  ;;  %v2790_v58 = vmul.f32 0.4054651, %v3508_v25  ;;  %v2641_v31 = vpop.f32.mrb[5].mxu1  ;;  %3009 = vst [vmem:[%s4514_s28 + $0x8] sm:$0xff] %v2945_v23 }
 0x3f9   : > { %3041 = vst [vmem:[%s4514_s28 + $0x108] sm:$0xff] %v2977_v24  ;;  %v2756_v17 = vmul.f32 0.4054651, %v2513_v33  ;;  %v2788_v19 = vmul.f32 0.4054651, %v2641_v31  ;;  %v3477_v32 = vpop.f32.mrb[6].mxu0 }
 0x3fa   : > { %v3509_v55 = vpop.f32.mrb[6].mxu1  ;;  %v2886_v54 = vadd.f32 %v5302_v0, %v2758_v26  ;;  %v2918_v34 = vadd.f32 %v5305_v42, %v2790_v58  ;;  %v2759_v51 = vmul.f32 0.4054651, %v3477_v32  ;;  %v2516_v56 = vpop.f32.mrb[7].mxu0  ;;  %v5775_v3 = vld [vmem:[#allocation27_spill] sm:$0xff]  ;;  %v5776_v35 = vld [vmem:[#allocation29_spill] sm:$0xff] }
 0x3fb   : > { %v2791_v46 = vmul.f32 0.4054651, %v3509_v55  ;;  %v2644_v57 = vpop.f32.mrb[7].mxu1  ;;  %v2884_v63 = vadd.f32 %v5308_v45, %v2756_v17  ;;  %v2916_v30 = vadd.f32 %v5311_v48, %v2788_v19  ;;  %v2757_v1 = vmul.f32 0.4054651, %v2516_v56 }
 0x3fc   : > { %v2789_v21 = vmul.f32 0.4054651, %v2644_v57  ;;  %v2950_v2 = vmax.f32 %v2886_v54, 0.0  ;;  %v2982_v28 = vmax.f32 %v2918_v34, 0.0  ;;  %v2887_v0 = vadd.f32 %v5314_v49, %v2759_v51 }
 0x3fd   : > { %v2919_v42 = vadd.f32 %v5317_v8, %v2791_v46  ;;  %v2948_v27 = vmax.f32 %v2884_v63, 0.0  ;;  %v2980_v62 = vmax.f32 %v2916_v30, 0.0  ;;  %v2885_v23 = vadd.f32 %v5320_v9, %v2757_v1 }
 0x3fe   : > { %v2917_v45 = vadd.f32 %v5323_v10, %v2789_v21  ;;  %3014 = vst [vmem:[%s4514_s28 + $0x30] sm:$0xff] %v2950_v2  ;;  %3046 = vst [vmem:[%s4514_s28 + $0x130] sm:$0xff] %v2982_v28  ;;  %v2951_v48 = vmax.f32 %v2887_v0, 0.0  ;;  %v5436_v25 = vmul.f32 0.5945349, %v5775_v3  ;;  %v3480_v9 = vpop.f32.mrb[8].mxu0 }
 0x3ff   : > { %v2983_v24 = vmax.f32 %v2919_v42, 0.0  ;;  %v5439_v49 = vmul.f32 0.5945349, %v5776_v35  ;;  %3012 = vst [vmem:[%s4514_s28 + $0x20] sm:$0xff] %v2948_v27  ;;  %3044 = vst [vmem:[%s4514_s28 + $0x120] sm:$0xff] %v2980_v62  ;;  %v2949_v8 = vmax.f32 %v2885_v23, 0.0 }
 0x400   : > { %v2981_v26 = vmax.f32 %v2917_v45, 0.0  ;;  %v3512_v58 = vpop.f32.mrb[8].mxu1  ;;  %v5444_v10 = vmul.f32 0.5945349, %v5245_v59  ;;  %3015 = vst [vmem:[%s4514_s28 + $0x38] sm:$0xff] %v2951_v48  ;;  %v2529_v17 = vpop.f32.mrb[9].mxu0 }
 0x401   : > { %3047 = vst [vmem:[%s4514_s28 + $0x138] sm:$0xff] %v2983_v24  ;;  %v2762_v33 = vmul.f32 0.4054651, %v3480_v9  ;;  %v2794_v31 = vmul.f32 0.4054651, %v3512_v58  ;;  %v2657_v19 = vpop.f32.mrb[9].mxu1 }
 0x402   : > { %3013 = vst [vmem:[%s4514_s28 + $0x28] sm:$0xff] %v2949_v8  ;;  %3045 = vst [vmem:[%s4514_s28 + $0x128] sm:$0xff] %v2981_v26  ;;  %v2760_v32 = vmul.f32 0.4054651, %v2529_v17  ;;  %v2792_v55 = vmul.f32 0.4054651, %v2657_v19 }
 0x403   : > { %v3481_v54 = vpop.f32.mrb[10].mxu0  ;;  %v3513_v34 = vpop.f32.mrb[10].mxu1  ;;  %v2890_v51 = vadd.f32 %v5326_v11, %v2762_v33  ;;  %v2922_v46 = vadd.f32 %v5329_v12, %v2794_v31  ;;  %v5461_v45 = vmul.f32 0.5945349, %v5249_v60  ;;  %v5777_v3 = vld [vmem:[#allocation34_spill] sm:$0xff] }
 0x404   : > { %v2763_v56 = vmul.f32 0.4054651, %v3481_v54  ;;  %v2795_v59 = vmul.f32 0.4054651, %v3513_v34  ;;  %v2532_v57 = vpop.f32.mrb[11].mxu0  ;;  %v2660_v63 = vpop.f32.mrb[11].mxu1  ;;  %v2888_v30 = vadd.f32 %v5332_v14, %v2760_v32  ;;  %v2920_v1 = vadd.f32 %v5335_v36, %v2792_v55 }
 0x405   : > { %v2761_v21 = vmul.f32 0.4054651, %v2532_v57  ;;  %v2793_v2 = vmul.f32 0.4054651, %v2660_v63  ;;  %v2954_v28 = vmax.f32 %v2890_v51, 0.0  ;;  %v2986_v0 = vmax.f32 %v2922_v46, 0.0 }
 0x406   : > { %v2891_v11 = vadd.f32 %v5338_v37, %v2763_v56  ;;  %v2923_v12 = vadd.f32 %v5341_v13, %v2795_v59  ;;  %v2952_v42 = vmax.f32 %v2888_v30, 0.0  ;;  %v2984_v27 = vmax.f32 %v2920_v1, 0.0  ;;  %v3516_v24 = vpop.f32.mrb[12].mxu1 }
 0x407   : > { %v2889_v62 = vadd.f32 %v5344_v15, %v2761_v21  ;;  %v2921_v14 = vadd.f32 %v5347_v38, %v2793_v2  ;;  %3018 = vst [vmem:[%s4514_s28 + $0x50] sm:$0xff] %v2954_v28  ;;  %3050 = vst [vmem:[%s4514_s28 + $0x150] sm:$0xff] %v2986_v0  ;;  %v5464_v37 = vmul.f32 0.5945349, %v5213_v50  ;;  %v3484_v15 = vpop.f32.mrb[12].mxu0  ;;  %v2673_v60 = vpop.f32.mrb[13].mxu1 }
 0x408   : > { %v2955_v36 = vmax.f32 %v2891_v11, 0.0  ;;  %v2987_v23 = vmax.f32 %v2923_v12, 0.0  ;;  %3016 = vst [vmem:[%s4514_s28 + $0x40] sm:$0xff] %v2952_v42  ;;  %3048 = vst [vmem:[%s4514_s28 + $0x140] sm:$0xff] %v2984_v27  ;;  %v5469_v38 = vmul.f32 0.5945349, %v5777_v3 }
 0x409   : > { %v2953_v13 = vmax.f32 %v2889_v62, 0.0  ;;  %v2985_v48 = vmax.f32 %v2921_v14, 0.0  ;;  %v2766_v35 = vmul.f32 0.4054651, %v3484_v15  ;;  %v2798_v8 = vmul.f32 0.4054651, %v3516_v24 }
 0x40a   : > { %3019 = vst [vmem:[%s4514_s28 + $0x58] sm:$0xff] %v2955_v36  ;;  %3051 = vst [vmem:[%s4514_s28 + $0x158] sm:$0xff] %v2987_v23  ;;  %v2545_v26 = vpop.f32.mrb[13].mxu0  ;;  %v2796_v50 = vmul.f32 0.4054651, %v2673_v60  ;;  %v3517_v33 = vpop.f32.mrb[14].mxu1 }
 0x40b   : > { %3017 = vst [vmem:[%s4514_s28 + $0x48] sm:$0xff] %v2953_v13  ;;  %3049 = vst [vmem:[%s4514_s28 + $0x148] sm:$0xff] %v2985_v48  ;;  %v2764_v9 = vmul.f32 0.4054651, %v2545_v26  ;;  %v3485_v58 = vpop.f32.mrb[14].mxu0  ;;  %v2894_v31 = vadd.f32 %v5350_v39, %v2766_v35  ;;  %v2926_v17 = vadd.f32 %v5353_v40, %v2798_v8  ;;  %v2676_v54 = vpop.f32.mrb[15].mxu1 }
 0x40c   : > { %v2767_v19 = vmul.f32 0.4054651, %v3485_v58  ;;  %v2799_v32 = vmul.f32 0.4054651, %v3517_v33  ;;  %v2548_v55 = vpop.f32.mrb[15].mxu0  ;;  %v2924_v51 = vadd.f32 %v5359_v4, %v2796_v50  ;;  %v5778_v11 = vld [vmem:[#allocation33_spill] sm:$0xff] }
 0x40d   : > { %v2892_v34 = vadd.f32 %v5356_v43, %v2764_v9  ;;  %v2765_v46 = vmul.f32 0.4054651, %v2548_v55  ;;  %v2797_v56 = vmul.f32 0.4054651, %v2676_v54  ;;  %v2958_v59 = vmax.f32 %v2894_v31, 0.0  ;;  %v5779_v58 = vld [vmem:[#allocation25_spill] sm:$0xff] }
 0x40e   : > { %v2990_v57 = vmax.f32 %v2926_v17, 0.0  ;;  %v2895_v39 = vadd.f32 %v5362_v5, %v2767_v19  ;;  %v2927_v40 = vadd.f32 %v5365_v41, %v2799_v32  ;;  %v2988_v30 = vmax.f32 %v2924_v51, 0.0  ;;  %v3520_v0 = vpop.f32.mrb[16].mxu1  ;;  %v5780_v17 = vld [vmem:[#allocation23_spill] sm:$0xff]  ;;  %v5781_v32 = vld [vmem:[#allocation24_spill] sm:$0xff] }
 0x40f   : > { %v2956_v63 = vmax.f32 %v2892_v34, 0.0  ;;  %v2893_v1 = vadd.f32 %v5368_v44, %v2765_v46  ;;  %v2925_v43 = vadd.f32 %v5371_v6, %v2797_v56  ;;  %3022 = vst [vmem:[%s4514_s28 + $0x70] sm:$0xff] %v2958_v59  ;;  %v5486_v2 = vmul.f32 0.5945349, %v5247_v47  ;;  %v3488_v44 = vpop.f32.mrb[16].mxu0  ;;  %v2689_v47 = vpop.f32.mrb[17].mxu1 }
 0x410   : > { %3054 = vst [vmem:[%s4514_s28 + $0x170] sm:$0xff] %v2990_v57  ;;  %v2959_v4 = vmax.f32 %v2895_v39, 0.0  ;;  %v2991_v21 = vmax.f32 %v2927_v40, 0.0  ;;  %v5489_v5 = vmul.f32 0.5945349, %v5251_v61  ;;  %3052 = vst [vmem:[%s4514_s28 + $0x160] sm:$0xff] %v2988_v30 }
 0x411   : > { %3020 = vst [vmem:[%s4514_s28 + $0x60] sm:$0xff] %v2956_v63  ;;  %v2957_v41 = vmax.f32 %v2893_v1, 0.0  ;;  %v2989_v28 = vmax.f32 %v2925_v43, 0.0  ;;  %v5494_v6 = vmul.f32 0.5945349, %v5778_v11  ;;  %v2561_v27 = vpop.f32.mrb[17].mxu0 }
 0x412   : > { %3023 = vst [vmem:[%s4514_s28 + $0x78] sm:$0xff] %v2959_v4  ;;  %3055 = vst [vmem:[%s4514_s28 + $0x178] sm:$0xff] %v2991_v21  ;;  %v2770_v12 = vmul.f32 0.4054651, %v3488_v44  ;;  %v2802_v42 = vmul.f32 0.4054651, %v3520_v0 }
 0x413   : > { %3021 = vst [vmem:[%s4514_s28 + $0x68] sm:$0xff] %v2957_v41  ;;  %3053 = vst [vmem:[%s4514_s28 + $0x168] sm:$0xff] %v2989_v28  ;;  %v2768_v62 = vmul.f32 0.4054651, %v2561_v27  ;;  %v2800_v61 = vmul.f32 0.4054651, %v2689_v47 }
 0x414   : > { %v3489_v14 = vpop.f32.mrb[18].mxu0  ;;  %v3521_v36 = vpop.f32.mrb[18].mxu1  ;;  %v2898_v23 = vadd.f32 %v5374_v7, %v2770_v12  ;;  %v2930_v13 = vadd.f32 %v5377_v16, %v2802_v42  ;;  %v5782_v54 = vld [vmem:[#allocation35_spill] sm:$0xff]  ;;  %v5783_v51 = vld [vmem:[#allocation40_spill] sm:$0xff]  ;;  %v5784_v39 = vld [vmem:[#allocation42_spill] sm:$0xff] }
 0x415   : > { %v2771_v48 = vmul.f32 0.4054651, %v3489_v14  ;;  %v2803_v15 = vmul.f32 0.4054651, %v3521_v36  ;;  %v2564_v24 = vpop.f32.mrb[19].mxu0  ;;  %v2692_v3 = vpop.f32.mrb[19].mxu1  ;;  %v2896_v35 = vadd.f32 %v5380_v18, %v2768_v62  ;;  %v2928_v8 = vadd.f32 %v5383_v52, %v2800_v61 }
 0x416   : > { %v2769_v26 = vmul.f32 0.4054651, %v2564_v24  ;;  %v2801_v60 = vmul.f32 0.4054651, %v2692_v3  ;;  %v2962_v9 = vmax.f32 %v2898_v23, 0.0  ;;  %v2994_v50 = vmax.f32 %v2930_v13, 0.0 }
 0x417   : > { %v2899_v7 = vadd.f32 %v5386_v53, %v2771_v48  ;;  %v2931_v16 = vadd.f32 %v5779_v58, %v2803_v15  ;;  %v2960_v33 = vmax.f32 %v2896_v35, 0.0  ;;  %v2992_v31 = vmax.f32 %v2928_v8, 0.0  ;;  %v3492_v59 = vpop.f32.mrb[20].mxu0  ;;  %v3524_v57 = vpop.f32.mrb[20].mxu1  ;;  %v5785_v44 = vld [vmem:[#allocation30_spill] sm:$0xff]  ;;  %v5786_v11 = vld [vmem:[#allocation44_spill] sm:$0xff] }
 0x418   : > { %v2897_v19 = vadd.f32 %v5780_v17, %v2769_v26  ;;  %v2929_v18 = vadd.f32 %v5781_v32, %v2801_v60  ;;  %3026 = vst [vmem:[%s4514_s28 + $0x90] sm:$0xff] %v2962_v9  ;;  %3058 = vst [vmem:[%s4514_s28 + $0x190] sm:$0xff] %v2994_v50  ;;  %v5511_v34 = vmul.f32 0.5945349, %v5782_v54  ;;  %v5514_v53 = vmul.f32 0.5945349, %v5783_v51 }
 0x419   : > { %v2963_v52 = vmax.f32 %v2899_v7, 0.0  ;;  %v2995_v55 = vmax.f32 %v2931_v16, 0.0  ;;  %3024 = vst [vmem:[%s4514_s28 + $0x80] sm:$0xff] %v2960_v33  ;;  %3056 = vst [vmem:[%s4514_s28 + $0x180] sm:$0xff] %v2992_v31  ;;  %v5519_v40 = vmul.f32 0.5945349, %v5784_v39 }
 0x41a   : > { %v2961_v46 = vmax.f32 %v2897_v19, 0.0  ;;  %v2993_v56 = vmax.f32 %v2929_v18, 0.0  ;;  %v2774_v63 = vmul.f32 0.4054651, %v3492_v59  ;;  %v2806_v30 = vmul.f32 0.4054651, %v3524_v57 }
 0x41b   : > { %3027 = vst [vmem:[%s4514_s28 + $0x98] sm:$0xff] %v2963_v52  ;;  %3059 = vst [vmem:[%s4514_s28 + $0x198] sm:$0xff] %v2995_v55  ;;  %v2577_v1 = vpop.f32.mrb[21].mxu0  ;;  %v2705_v43 = vpop.f32.mrb[21].mxu1  ;;  %v5787_v61 = vld [vmem:[#allocation26_spill] sm:$0xff]  ;;  %v5788_v50 = vld [vmem:[#allocation36_spill] sm:$0xff] }
 0x41c   : > { %3025 = vst [vmem:[%s4514_s28 + $0x88] sm:$0xff] %v2961_v46  ;;  %3057 = vst [vmem:[%s4514_s28 + $0x188] sm:$0xff] %v2993_v56  ;;  %v2772_v4 = vmul.f32 0.4054651, %v2577_v1  ;;  %v2804_v21 = vmul.f32 0.4054651, %v2705_v43  ;;  %v2902_v0 = vadd.f32 %v5785_v44, %v2774_v63  ;;  %v2934_v12 = vadd.f32 %v5786_v11, %v2806_v30 }
 0x41d   : > { %v3493_v41 = vpop.f32.mrb[22].mxu0  ;;  %v3525_v28 = vpop.f32.mrb[22].mxu1  ;;  %v5536_v7 = vmul.f32 0.5945349, %v5788_v50  ;;  %v5789_v58 = vld [vmem:[#allocation38_spill] sm:$0xff]  ;;  %v5790_v31 = vld [vmem:[#allocation41_spill] sm:$0xff] }
 0x41e   : > { %v2775_v42 = vmul.f32 0.4054651, %v3493_v41  ;;  %v2807_v27 = vmul.f32 0.4054651, %v3525_v28  ;;  %v2580_v47 = vpop.f32.mrb[23].mxu0  ;;  %v2708_v62 = vpop.f32.mrb[23].mxu1  ;;  %v2900_v14 = vadd.f32 %v5787_v61, %v2772_v4  ;;  %v2932_v36 = vadd.f32 %v5411_v22, %v2804_v21 }
 0x41f   : > { %v2773_v23 = vmul.f32 0.4054651, %v2580_v47  ;;  %v2805_v13 = vmul.f32 0.4054651, %v2708_v62  ;;  %v2966_v48 = vmax.f32 %v2902_v0, 0.0  ;;  %v2998_v15 = vmax.f32 %v2934_v12, 0.0 }
 0x420   : > { %v2903_v24 = vadd.f32 %v5414_v29, %v2775_v42  ;;  %v2935_v3 = vadd.f32 %v5419_v20, %v2807_v27  ;;  %v2964_v35 = vmax.f32 %v2900_v14, 0.0  ;;  %v2996_v8 = vmax.f32 %v2932_v36, 0.0  ;;  %v3528_v33 = vpop.f32.mrb[24].mxu1  ;;  %v5791_v12 = vld [vmem:[#allocation43_spill] sm:$0xff]  ;;  %v5792_v27 = vld [vmem:[#allocation37_spill] sm:$0xff] }
 0x421   : > { %v2901_v26 = vadd.f32 %v5436_v25, %v2773_v23  ;;  %v2933_v60 = vadd.f32 %v5439_v49, %v2805_v13  ;;  %3030 = vst [vmem:[%s4514_s28 + $0xb0] sm:$0xff] %v2966_v48  ;;  %3062 = vst [vmem:[%s4514_s28 + $0x1b0] sm:$0xff] %v2998_v15  ;;  %v5539_v29 = vmul.f32 0.5945349, %v5789_v58  ;;  %v3496_v25 = vpop.f32.mrb[24].mxu0  ;;  %v2721_v18 = vpop.f32.mrb[25].mxu1 }
 0x422   : > { %v2967_v22 = vmax.f32 %v2903_v24, 0.0  ;;  %v2999_v9 = vmax.f32 %v2935_v3, 0.0  ;;  %3028 = vst [vmem:[%s4514_s28 + $0xa0] sm:$0xff] %v2964_v35  ;;  %3060 = vst [vmem:[%s4514_s28 + $0x1a0] sm:$0xff] %v2996_v8  ;;  %v5544_v49 = vmul.f32 0.5945349, %v5790_v31 }
 0x423   : > { %v2965_v20 = vmax.f32 %v2901_v26, 0.0  ;;  %v2997_v16 = vmax.f32 %v2933_v60, 0.0  ;;  %v2778_v17 = vmul.f32 0.4054651, %v3496_v25  ;;  %v2810_v19 = vmul.f32 0.4054651, %v3528_v33 }
 0x424   : > { %3031 = vst [vmem:[%s4514_s28 + $0xb8] sm:$0xff] %v2967_v22  ;;  %3063 = vst [vmem:[%s4514_s28 + $0x1b8] sm:$0xff] %v2999_v9  ;;  %v2593_v32 = vpop.f32.mrb[25].mxu0  ;;  %v2808_v55 = vmul.f32 0.4054651, %v2721_v18  ;;  %v3529_v51 = vpop.f32.mrb[26].mxu1 }
 0x425   : > { %3029 = vst [vmem:[%s4514_s28 + $0xa8] sm:$0xff] %v2965_v20  ;;  %3061 = vst [vmem:[%s4514_s28 + $0x1a8] sm:$0xff] %v2997_v16  ;;  %v2776_v52 = vmul.f32 0.4054651, %v2593_v32  ;;  %v3497_v54 = vpop.f32.mrb[26].mxu0  ;;  %v2906_v46 = vadd.f32 %v5444_v10, %v2778_v17  ;;  %v2938_v56 = vadd.f32 %v5461_v45, %v2810_v19  ;;  %v2724_v63 = vpop.f32.mrb[27].mxu1 }
 0x426   : > { %v2779_v59 = vmul.f32 0.4054651, %v3497_v54  ;;  %v2811_v57 = vmul.f32 0.4054651, %v3529_v51  ;;  %v2596_v39 = vpop.f32.mrb[27].mxu0  ;;  %v2936_v1 = vadd.f32 %v5469_v38, %v2808_v55  ;;  %v3532_v61 = vpop.f32.mrb[28].mxu1 }
 0x427   : > { %v2904_v30 = vadd.f32 %v5464_v37, %v2776_v52  ;;  %v2777_v43 = vmul.f32 0.4054651, %v2596_v39  ;;  %v2809_v4 = vmul.f32 0.4054651, %v2724_v63  ;;  %v2970_v21 = vmax.f32 %v2906_v46, 0.0  ;;  %v3500_v62 = vpop.f32.mrb[28].mxu0 }
 0x428   : > { %v3002_v41 = vmax.f32 %v2938_v56, 0.0  ;;  %v2907_v10 = vadd.f32 %v5486_v2, %v2779_v59  ;;  %v2939_v45 = vadd.f32 %v5489_v5, %v2811_v57  ;;  %v3000_v44 = vmax.f32 %v2936_v1, 0.0  ;;  %v2609_v23 = vpop.f32.mrb[29].mxu0  ;;  %v2737_v13 = vpop.f32.mrb[29].mxu1 }
 0x429   : > { %v2968_v28 = vmax.f32 %v2904_v30, 0.0  ;;  %v2905_v0 = vadd.f32 %v5494_v6, %v2777_v43  ;;  %v2937_v37 = vadd.f32 %v5511_v34, %v2809_v4  ;;  %3034 = vst [vmem:[%s4514_s28 + $0xd0] sm:$0xff] %v2970_v21  ;;  %v2879_v42 = vmul.f32 0.5945349, %v5791_v12  ;;  %v5793_v6 = vld [vmem:[#allocation39_spill] sm:$0xff]  ;;  %v3501_v24 = vpop.f32.mrb[30].mxu0 }
 0x42a   : > { %3066 = vst [vmem:[%s4514_s28 + $0x1d0] sm:$0xff] %v3002_v41  ;;  %v2971_v38 = vmax.f32 %v2907_v10, 0.0  ;;  %v3003_v11 = vmax.f32 %v2939_v45, 0.0  ;;  %v2845_v2 = vmul.f32 0.5945349, %v5792_v27  ;;  %3064 = vst [vmem:[%s4514_s28 + $0x1c0] sm:$0xff] %v3000_v44 }
 0x42b   : > { %3032 = vst [vmem:[%s4514_s28 + $0xc0] sm:$0xff] %v2968_v28  ;;  %v2969_v5 = vmax.f32 %v2905_v0, 0.0  ;;  %v3001_v47 = vmax.f32 %v2937_v37, 0.0  ;;  %v2877_v14 = vmul.f32 0.5945349, %v5793_v6  ;;  %v3533_v3 = vpop.f32.mrb[30].mxu1 }
 0x42c   : > { %3035 = vst [vmem:[%s4514_s28 + $0xd8] sm:$0xff] %v2971_v38  ;;  %3067 = vst [vmem:[%s4514_s28 + $0x1d8] sm:$0xff] %v3003_v11  ;;  %v2782_v34 = vmul.f32 0.4054651, %v3500_v62  ;;  %v2814_v36 = vmul.f32 0.4054651, %v3532_v61 }
 0x42d   : > { %3033 = vst [vmem:[%s4514_s28 + $0xc8] sm:$0xff] %v2969_v5  ;;  %3065 = vst [vmem:[%s4514_s28 + $0x1c8] sm:$0xff] %v3001_v47  ;;  %v2780_v48 = vmul.f32 0.4054651, %v2609_v23  ;;  %v2812_v15 = vmul.f32 0.4054651, %v2737_v13 }
 0x42e   : > { %v2910_v35 = vadd.f32 %v5514_v53, %v2782_v34  ;;  %v2942_v8 = vadd.f32 %v5519_v40, %v2814_v36  ;;  %v2783_v26 = vmul.f32 0.4054651, %v3501_v24  ;;  %v2815_v60 = vmul.f32 0.4054651, %v3533_v3  ;;  %v2612_v22 = vpop.f32.mrb[31].mxu0  ;;  %v2740_v9 = vpop.f32.mrb[31].mxu1 }
 0x42f   : > { %v2908_v50 = vadd.f32 %v5536_v7, %v2780_v48  ;;  %v2940_v58 = vadd.f32 %v5539_v29, %v2812_v15  ;;  %v2781_v20 = vmul.f32 0.4054651, %v2612_v22  ;;  %v2813_v16 = vmul.f32 0.4054651, %v2740_v9 }
 0x430   : > { %v2974_v25 = vmax.f32 %v2910_v35, 0.0  ;;  %v3006_v33 = vmax.f32 %v2942_v8, 0.0  ;;  %v2911_v53 = vadd.f32 %v5544_v49, %v2783_v26  ;;  %v2943_v40 = vadd.f32 %v2879_v42, %v2815_v60 }
 0x431   : > { %v2972_v31 = vmax.f32 %v2908_v50, 0.0  ;;  %v3004_v17 = vmax.f32 %v2940_v58, 0.0  ;;  %v2909_v19 = vadd.f32 %v2845_v2, %v2781_v20  ;;  %v2941_v32 = vadd.f32 %v2877_v14, %v2813_v16 }
 0x432   : > { %3038 = vst [vmem:[%s4514_s28 + $0xf0] sm:$0xff] %v2974_v25  ;;  %3070 = vst [vmem:[%s4514_s28 + $0x1f0] sm:$0xff] %v3006_v33  ;;  %v2975_v7 = vmax.f32 %v2911_v53, 0.0  ;;  %v3007_v29 = vmax.f32 %v2943_v40, 0.0 }
 0x433   : > { %3036 = vst [vmem:[%s4514_s28 + $0xe0] sm:$0xff] %v2972_v31  ;;  %3068 = vst [vmem:[%s4514_s28 + $0x1e0] sm:$0xff] %v3004_v17  ;;  %v2973_v18 = vmax.f32 %v2909_v19, 0.0  ;;  %v3005_v52 = vmax.f32 %v2941_v32, 0.0 }
 0x434   : > { %3039 = vst [vmem:[%s4514_s28 + $0xf8] sm:$0xff] %v2975_v7  ;;  %3071 = vst [vmem:[%s4514_s28 + $0x1f8] sm:$0xff] %v3007_v29 }
 0x435   : > { %3037 = vst [vmem:[%s4514_s28 + $0xe8] sm:$0xff] %v2973_v18  ;;  %3069 = vst [vmem:[%s4514_s28 + $0x1e8] sm:$0xff] %v3005_v52 }
 0x436 PF: > { %s5794_s6 = sld [smem:[#allocation17_spill]]  ;;  %s5795_s7 = sld [smem:[#allocation47_spill]] }
 0x437   : > { %s3086_s13 = sshll.u32 %s4514_s28, 4  ;;  %s5593_s9 = scalar_lea.sflag [#allocation4], %s263_s1  ;;  %s5589_s13 = int_to_ptr.vmem [resolvable:$true] %s3086_s13 }
 0x438   : > { %s4037_s5 = scalar_lea.vmem %s5589_s13, 8192  ;;  %s4186_s14 = smov [#allocation9]  }
 0x439   : > { %p4038_p3 = scmp.ne.s32.totalorder %s5589_s13, %s4037_s5  ;;  %s4041_s21 = sshll.u32 %s4186_s14, 4  ;;  %s4042_s21 = int_to_ptr.vmem [resolvable:$false] %s4041_s21 }
 0x43a   : > { %s4043_s0 = scalar_lea.vmem %s4042_s21, 16384  ;;  %p4044_p4 = scmp.lt.s32.totalorder %s5589_s13, %s4042_s21 }
 0x43b   : > { %p4039_p10 = pnand %p4038_p3, %p4444_p1  ;;  %p4045_p11 = scmp.lt.s32.totalorder %s4043_s0, %s4037_s5 }
 0x43c   : > { %s3413_s12 = sshll.u32 %s5794_s6, 13 }
 0x43d   : > { %s5586_s22 = scalar_lea.hbm %s5795_s7, %s3413_s12  ;;  %p4040_p0 = pneg %p4039_p10 }
 0x43e   : > { %p4046_p6 = por %p4045_p11, %p4044_p4 }
 0x440   : > { %p4047_p8 = pnand %p4046_p6, %p4040_p0 }
 0x442   : > { %4050 = shalt.err (!%p4047_p8)
}
 0x443   : > { %s4051_s1 = scalar_lea.hbm %s5586_s22, 8192  ;;  %s4055_s27 = scalar_lea.hbm %s5795_s7, 16384 }
 0x444   : > { %p4052_p2 = scmp.ne.s32.totalorder %s5586_s22, %s4051_s1  ;;  %p4056_p9 = scmp.lt.u32.totalorder %s5586_s22, %s5795_s7 }
 0x445   : > { %p4057_p12 = scmp.lt.u32.totalorder %s4055_s27, %s4051_s1  ;;  %p4059_p3 = scmp.lt.u32.totalorder %s4051_s1, %s5586_s22 }
 0x446   : > { %p4053_p13 = pnand %p4052_p2, %p4444_p1 }
 0x447   : > { %p4058_p7 = por %p4057_p12, %p4056_p9 }
 0x448   : > { %p4054_p5 = pneg %p4053_p13 }
 0x449   : > { %p4060_p10 = por %p4059_p3, %p4058_p7 }
 0x44b   : > { %p4061_p0 = pnand %p4060_p10, %p4054_p5 }
 0x44d   : > { %4064 = shalt.err (!%p4061_p0)
}
 0x44e   : > { %s4187_s15 = smov 128   ;;  %s4188_s6 = smov 8  }
 0x44f   : > { %3562 = dma.vmem_to_hbm [thread:$0]  (%p4444_p1), %s5589_s13, 8192, %s5586_s22, %s5593_s9, %s4187_s15, %s4187_s15, %s4188_s6  }
 0x450 PF: > { %s5796_s12 = sld [smem:[#allocation15_spill]]  ;;  %s5797_s11 = sld [smem:[#allocation20_spill]] }
 0x451   : > { %p3587_p4 = scmp.ge.s32.totalorder %s4171_s25, 2 }
 0x456   : > { %s3101_s18 = sand.u32 1, %s5796_s12   ;;  %p5798_p11 = scmp.ne.s32.totalorder %s5797_s11, 0 }
 0x457   : > { %s3102_s5 = scalar_lea.sflag [#allocation4], %s3101_s18 }
 0x458   : > { %p3579_p6 = pnand %p3587_p4, %p5798_p11 }
 0x45a   : > { %4126 = dma.done.wait (!%p3579_p6), %s3102_s5, 8192  }
 0x45b   : > { %4128 = vsyncadd (!%p3579_p6), %s3102_s5, 4294959104  ;;  %s21_s25 = sadd.s32 1, %s4171_s25   ;;  %s5799_s29 = sld [smem:[#allocation21_spill]] }
 0x45c   : > { %p18_p8 = scmp.ge.s32.totalorder %s21_s25, 6   ;;  %s5800_s13 = sld [smem:[#allocation22_spill]] }
 0x45d   : > { %s5801_s15 = smov %s4135_s16  ;;  %s5802_s16 = smov %s4139_s17 }
 0x45e   : > { %s5803_s17 = smov %s4434_s10  ;;  %s5804_s18 = smov %s4147_s19 }
 0x45f   : > { %s5805_s19 = smov %s4151_s20  ;;  %s5806_s20 = smov %s4362_s30 }
 0x460   : > { %s5807_s21 = smov %s4163_s23  ;;  %s5808_s22 = smov %s4167_s24 }
 0x461   : > { %s5809_s23 = smov %s5799_s29  ;;  %20 = sbr.rel (!%p18_p8) target bundleno = 14 (0xe), region = 109 }
 0x462   : > { %s5810_s24 = smov %s5800_s13 }
 0x468   :  { %3107 = vsyncpa [#allocation3], 1 }
 0x469   :  { %3109 = vsyncpa [#allocation3 + $0x1], 1 }
 0x46a   :  { %3110 = vsyncpa [#allocation6], 1 }
 0x46b   :  { %3111 = vsyncpa [#allocation4], 1 }
 0x46c   :  { %3113 = vsyncpa [#allocation4 + $0x1], 1 }

</bundles_post_ra>
